<compile_context>
chip_gen: v5e
topology: v5e:2x2
jax: 0.10.0
libtpu: 0.0.40
codegen_flags: <defaults>
</compile_context>

<pallas_src>
import functools

import jax
import jax.numpy as jnp
from jax import lax
from jax.experimental import pallas as pl
from jax.experimental.pallas import tpu as pltpu

EPS = 1e-5                       # RMSNorm eps (config.eps)


def _vmem_limit_bytes():
    """~3/4 of physical VMEM (96 MiB on 128 MiB parts, 48 MiB on v7x)."""
    try:
        cap = int(pltpu.get_tpu_info().vmem_capacity_bytes)
        return max(32 * 1024 * 1024, (cap * 3) // 4)
    except Exception:
        return 48 * 1024 * 1024


# ---------------------------------------------------------------------------
# kernel 1: masked input -> pre-RMSNorm -> one QKV chunk -> RoPE -> head-major
#   grid = (3, B, L/TL); chunk axis outermost so each Wqkv chunk is DMA'd once
# ---------------------------------------------------------------------------
def _qkv_kernel(um_ref, scale_ref, w_ref, b_ref, cos_ref, sin_ref, out_ref, *,
                eps, sm_scale, num_heads, head_dim):
    f32 = jnp.float32
    c = pl.program_id(0)                          # 0 = q, 1 = k, 2 = v
    x = um_ref[0].astype(f32)                     # (TL, D)
    d = x.shape[-1]
    # StripedHyena RMSNorm: x / (sqrt(mean(x^2)) + eps) * scale (eps OUTSIDE).
    mean_sq = jnp.sum(x * x, axis=-1, keepdims=True) * (1.0 / d)
    y = x / (jnp.sqrt(mean_sq) + eps) * scale_ref[...].astype(f32)
    y16 = y.astype(jnp.bfloat16)
    # bf16 x bf16 projection with f32 accumulation on the MXU.  The norm is
    # recomputed once per chunk -- negligible vs. the matmul, and it buys
    # streaming Wqkv in thirds instead of keeping (D, 3D) resident.
    proj = jnp.dot(y16, w_ref[0], preferred_element_type=f32)
    proj = proj + b_ref[0].astype(f32)            # (TL, D)
    # fold the softmax scale into the q chunk while still in f32
    proj = proj * jnp.where(c == 0, jnp.float32(sm_scale), jnp.float32(1.0))

    cos = cos_ref[...]                            # (TL, hd//2) f32
    sin = sin_ref[...]
    is_v = c == 2
    half = head_dim // 2
    # Per-head lane-dense stores: head-major output without an in-kernel
    # 3-D transpose; RoPE done in f32 with the half-split convention.
    for h in range(num_heads):
        base = h * head_dim
        xh = proj[:, base:base + head_dim]        # (TL, hd)
        x1 = xh[:, :half]
        x2 = xh[:, half:]
        roped = jnp.concatenate([x1 * cos - x2 * sin,
                                 x1 * sin + x2 * cos], axis=1)
        out_ref[0, 0, h] = jnp.where(is_v, xh, roped).astype(out_ref.dtype)


# ---------------------------------------------------------------------------
# kernel 2: causal flash attention on pre-roped / pre-scaled q, k
#   q/k/v laid out (3, B, H, L, hd); grid = (B, L/TQ, L/TK)
# ---------------------------------------------------------------------------
def _flash_kernel(q_ref, k_ref, v_ref, o_ref, m_sc, l_sc, acc_sc, *,
                  block_q, block_k):
    f32 = jnp.float32
    qi = pl.program_id(1)
    ki = pl.program_id(2)
    num_heads = q_ref.shape[2]
    head_dim = q_ref.shape[4]

    @pl.when(ki == 0)
    def _():
        m_sc[...] = jnp.full(m_sc.shape, -1e30, m_sc.dtype)
        l_sc[...] = jnp.zeros(l_sc.shape, l_sc.dtype)
        acc_sc[...] = jnp.zeros(acc_sc.shape, acc_sc.dtype)

    # tile contributes iff its first key column <= last query row
    compute = ki * block_k <= qi * block_q + (block_q - 1)
    # tile needs masking iff its last key column > first query row
    needs_mask = ki * block_k + (block_k - 1) > qi * block_q

    def _update(masked):
        q = q_ref[0, 0]                           # (H, TQ, hd) bf16 (roped+scaled)
        k = k_ref[0, 0]                           # (H, TK, hd) bf16 (roped)
        s = jnp.einsum("hqd,hkd->hqk", q, k,
                       preferred_element_type=f32)       # (H, TQ, TK)
        if masked:
            row = qi * block_q + lax.broadcasted_iota(
                jnp.int32, (block_q, block_k), 0)
            col = ki * block_k + lax.broadcasted_iota(
                jnp.int32, (block_q, block_k), 1)
            s = jnp.where((col <= row)[None, :, :], s, -1e30)
        m_prev = m_sc[...]
        m_new = jnp.maximum(m_prev, jnp.max(s, axis=-1, keepdims=True))
        alpha = jnp.exp(m_prev - m_new)
        p = jnp.exp(s - m_new)
        l_sc[...] = alpha * l_sc[...] + jnp.sum(p, axis=-1, keepdims=True)
        acc_sc[...] = alpha * acc_sc[...] + jnp.einsum(
            "hqk,hkd->hqd", p.astype(jnp.bfloat16), v_ref[0, 0],
            preferred_element_type=f32)
        m_sc[...] = m_new

    # Mask math (iota + compare + where) only exists on diagonal-straddling
    # tiles; fully-below-diagonal tiles take the unmasked branch.
    @pl.when(jnp.logical_and(compute, jnp.logical_not(needs_mask)))
    def _():
        _update(masked=False)

    @pl.when(jnp.logical_and(compute, needs_mask))
    def _():
        _update(masked=True)

    @pl.when(ki == pl.num_programs(2) - 1)
    def _():
        inv_l = 1.0 / l_sc[...]                   # (H, TQ, 1) exact
        for h in range(num_heads):
            o_ref[0, :, h * head_dim:(h + 1) * head_dim] = (
                acc_sc[h] * inv_l[h]).astype(o_ref.dtype)


# ---------------------------------------------------------------------------
# kernel 3: out-proj + residual (+mask) + post-RMSNorm + gated MLP + residual
#   grid = (B, L/TL, inner/TI); axis 2 streams w1/w2/w3 inner-dim tiles
# ---------------------------------------------------------------------------
def _mlp_kernel(*refs, eps, has_mask):
    f32 = jnp.float32
    if has_mask:
        (ctx_ref, um_ref, mask_ref, wout_ref, bout_ref, pscale_ref,
         w1_ref, w2_ref, w3_ref, out_ref, z_sc, acc_sc) = refs
    else:
        (ctx_ref, um_ref, wout_ref, bout_ref, pscale_ref,
         w1_ref, w2_ref, w3_ref, out_ref, z_sc, acc_sc) = refs
        mask_ref = None
    i = pl.program_id(2)

    @pl.when(i == 0)
    def _():
        d = um_ref.shape[-1]
        mha = jnp.dot(ctx_ref[0], wout_ref[...], preferred_element_type=f32)
        u1 = mha + bout_ref[...].astype(f32) + um_ref[0].astype(f32)
        if has_mask:
            u1 = u1 * mask_ref[0].astype(f32)
        mean_sq = jnp.sum(u1 * u1, axis=-1, keepdims=True) * (1.0 / d)
        z = u1 / (jnp.sqrt(mean_sq) + eps) * pscale_ref[...].astype(f32)
        z_sc[...] = z.astype(jnp.bfloat16)
        acc_sc[...] = u1                     # seed accumulator with residual

    z16 = z_sc[...]
    z1 = jnp.dot(z16, w1_ref[...], preferred_element_type=f32)
    z2 = jnp.dot(z16, w2_ref[...], preferred_element_type=f32)
    g = (jax.nn.silu(z1) * z2).astype(jnp.bfloat16)
    acc_sc[...] += jnp.dot(g, w3_ref[...], preferred_element_type=f32)

    @pl.when(i == pl.num_programs(2) - 1)
    def _():
        out_ref[0] = acc_sc[...].astype(out_ref.dtype)


# ---------------------------------------------------------------------------
# host-side helpers
# ---------------------------------------------------------------------------
def _rotary_tables(seq_len, rotary_dim, base=10000.0):
    """Half-width (L, rotary_dim // 2) cos / sin tables (f32)."""
    inv_freq = 1.0 / (base ** (jnp.arange(0, rotary_dim, 2, dtype=jnp.float32)
                               / rotary_dim))
    t = jnp.arange(seq_len, dtype=jnp.float32)
    freqs = jnp.outer(t, inv_freq)                           # (L, hd // 2)
    return jnp.cos(freqs), jnp.sin(freqs)


def init_params(key, hidden_size, num_heads, inner_size_multiple_of=64,
                rotary_base=10000.0):
    """Deterministic synthetic parameters matching the module's shapes."""
    D = hidden_size
    inner = int(2 * D * 4 / 3)
    inner = inner_size_multiple_of * (
        (inner + inner_size_multiple_of - 1) // inner_size_multiple_of)
    ks = jax.random.split(key, 8)

    def lin_w(k, fan_in, fan_out):
        bound = 1.0 / (fan_in ** 0.5)
        return jax.random.uniform(k, (fan_in, fan_out), jnp.float32,
                                  -bound, bound).astype(jnp.bfloat16)

    def lin_b(k, fan_in, fan_out):
        bound = 1.0 / (fan_in ** 0.5)
        return jax.random.uniform(k, (1, fan_out), jnp.float32,
                                  -bound, bound).astype(jnp.bfloat16)

    return {
        "num_heads": num_heads,
        "rotary_base": rotary_base,
        "inner_size": inner,
        # RMSNorm scales (torch.ones(hidden_size), f32)
        "pre_scale": jnp.ones((1, D), jnp.float32),
        "post_scale": jnp.ones((1, D), jnp.float32),
        # MHA: fused Wqkv (bias=True, [Q|K|V] column layout), out_proj, bf16
        "wqkv": lin_w(ks[0], D, 3 * D),
        "bqkv": lin_b(ks[1], D, 3 * D),
        "wout": lin_w(ks[2], D, D),
        "bout": lin_b(ks[3], D, D),
        # ParallelGatedMLP: l1, l2 (D -> inner), l3 (inner -> D), no bias, bf16
        "w1": lin_w(ks[4], D, inner),
        "w2": lin_w(ks[5], D, inner),
        "w3": lin_w(ks[6], inner, D),
    }


def attention_block_forward(u, params, padding_mask=None, *,
                            block_l=256, block_q=256, block_k=256,
                            block_inner=1024):
    """u: (B, L, D) bf16.  Returns (out, None) like the torch module."""
    B, L, D = u.shape
    H = int(params["num_heads"])
    assert D % H == 0
    hd = D // H
    assert hd % 2 == 0
    inner = params["w1"].shape[1]
    has_mask = padding_mask is not None

    bf16, f32 = jnp.bfloat16, jnp.float32
    vmem_limit = _vmem_limit_bytes()

    # tile sizes (fall back to the full dim when it does not divide evenly)
    TL = block_l if L % block_l == 0 else L
    TQ = block_q if L % block_q == 0 else L
    TK = block_k if L % block_k == 0 else L
    TI = block_inner if inner % block_inner == 0 else inner

    if has_mask:
        mask = padding_mask.astype(f32).reshape(B, L, 1)
        u_m = u * mask.astype(u.dtype)           # masked residual input
    else:
        mask = None
        u_m = u

    # Wqkv column layout is [Q|K|V] -> three (D, D) chunks
    wqkv3 = params["wqkv"].reshape(D, 3, D).transpose(1, 0, 2)    # (3, D, D)
    bqkv3 = params["bqkv"].reshape(3, 1, D)                       # (3, 1, D)
    cos, sin = _rotary_tables(L, hd, params["rotary_base"])       # (L, hd//2)
    sm_scale = 1.0 / (hd ** 0.5)

    # -------- kernel 1: pre-norm + QKV projection + RoPE, head-major out ----
    qkv = pl.pallas_call(
        functools.partial(_qkv_kernel, eps=EPS, sm_scale=sm_scale,
                          num_heads=H, head_dim=hd),
        out_shape=jax.ShapeDtypeStruct((3, B, H, L, hd), bf16),
        grid_spec=pltpu.PrefetchScalarGridSpec(
            num_scalar_prefetch=0,
            grid=(3, B, L // TL),                 # chunk axis outermost
            in_specs=[
                pl.BlockSpec((1, TL, D), lambda c, b, l: (b, l, 0)),
                pl.BlockSpec((1, D), lambda c, b, l: (0, 0)),
                pl.BlockSpec((1, D, D), lambda c, b, l: (c, 0, 0)),
                pl.BlockSpec((1, 1, D), lambda c, b, l: (c, 0, 0)),
                pl.BlockSpec((TL, hd // 2), lambda c, b, l: (l, 0)),
                pl.BlockSpec((TL, hd // 2), lambda c, b, l: (l, 0)),
            ],
            out_specs=pl.BlockSpec((1, 1, H, TL, hd),
                                   lambda c, b, l: (c, b, 0, l, 0)),
        ),
        compiler_params=pltpu.CompilerParams(
            dimension_semantics=("parallel", "parallel", "parallel"),
            vmem_limit_bytes=vmem_limit),
    )(u_m, params["pre_scale"], wqkv3, bqkv3, cos, sin)

    # -------- kernel 2: causal flash attention -> (B, L, D) directly --------
    def _kv_block(chunk):
        def im(b, qi, ki):
            # clamp: upper-triangle kv tiles keep the previous block index,
            # which suppresses their DMA entirely
            last = (qi * TQ + (TQ - 1)) // TK
            return (chunk, b, 0, jnp.minimum(ki, last), 0)
        return im

    ctx = pl.pallas_call(
        functools.partial(_flash_kernel, block_q=TQ, block_k=TK),
        out_shape=jax.ShapeDtypeStruct((B, L, D), bf16),
        grid_spec=pltpu.PrefetchScalarGridSpec(
            num_scalar_prefetch=0,
            grid=(B, L // TQ, L // TK),
            in_specs=[
                pl.BlockSpec((1, 1, H, TQ, hd),
                             lambda b, qi, ki: (0, b, 0, qi, 0)),
                pl.BlockSpec((1, 1, H, TK, hd), _kv_block(1)),
                pl.BlockSpec((1, 1, H, TK, hd), _kv_block(2)),
            ],
            out_specs=pl.BlockSpec((1, TQ, D), lambda b, qi, ki: (b, qi, 0)),
            scratch_shapes=[
                pltpu.VMEM((H, TQ, 1), f32),     # running max
                pltpu.VMEM((H, TQ, 1), f32),     # running sum
                pltpu.VMEM((H, TQ, hd), f32),    # output accumulator
            ],
        ),
        compiler_params=pltpu.CompilerParams(
            dimension_semantics=("parallel", "parallel", "arbitrary"),
            vmem_limit_bytes=vmem_limit),
    )(qkv, qkv, qkv)   # same buffer three times; BlockSpecs pick q / k / v

    # -------- kernel 3: out-proj + post-norm + gated MLP --------------------
    mlp_in = [ctx, u_m]
    in_specs = [
        pl.BlockSpec((1, TL, D), lambda b, l, i: (b, l, 0)),
        pl.BlockSpec((1, TL, D), lambda b, l, i: (b, l, 0)),
    ]
    if has_mask:
        mlp_in.append(mask)
        in_specs.append(pl.BlockSpec((1, TL, 1), lambda b, l, i: (b, l, 0)))
    mlp_in += [params["wout"], params["bout"], params["post_scale"],
               params["w1"], params["w2"], params["w3"]]
    in_specs += [
        pl.BlockSpec((D, D), lambda b, l, i: (0, 0)),
        pl.BlockSpec((1, D), lambda b, l, i: (0, 0)),
        pl.BlockSpec((1, D), lambda b, l, i: (0, 0)),
        pl.BlockSpec((D, TI), lambda b, l, i: (0, i)),
        pl.BlockSpec((D, TI), lambda b, l, i: (0, i)),
        pl.BlockSpec((TI, D), lambda b, l, i: (i, 0)),
    ]

    out = pl.pallas_call(
        functools.partial(_mlp_kernel, eps=EPS, has_mask=has_mask),
        out_shape=jax.ShapeDtypeStruct((B, L, D), bf16),
        grid_spec=pltpu.PrefetchScalarGridSpec(
            num_scalar_prefetch=0,
            grid=(B, L // TL, inner // TI),
            in_specs=in_specs,
            out_specs=pl.BlockSpec((1, TL, D), lambda b, l, i: (b, l, 0)),
            scratch_shapes=[
                pltpu.VMEM((TL, D), bf16),   # post-norm activations
                pltpu.VMEM((TL, D), f32),    # residual-seeded MLP accumulator
            ],
        ),
        compiler_params=pltpu.CompilerParams(
            dimension_semantics=("parallel", "parallel", "arbitrary"),
            vmem_limit_bytes=vmem_limit),
    )(*mlp_in)

    return out, None


# ---------------------------------------------------------------------------
# pure-JAX f32 reference (for in-script sanity check only)
# ---------------------------------------------------------------------------
def _reference_forward(u, params, padding_mask=None):
    f32 = jnp.float32
    B, L, D = u.shape
    H = int(params["num_heads"])
    hd = D // H
    x = u.astype(f32)
    if padding_mask is not None:
        x = x * padding_mask.astype(f32)[..., None]

    def rmsnorm(t, scale):
        rms = jnp.sqrt(jnp.mean(t * t, axis=-1, keepdims=True))
        return t / (rms + EPS) * scale.astype(f32).reshape(1, 1, D)

    y = rmsnorm(x, params["pre_scale"])
    qkv = y @ params["wqkv"].astype(f32) + params["bqkv"].astype(f32)
    q, k, v = qkv[..., :D], qkv[..., D:2 * D], qkv[..., 2 * D:]

    def heads(t):
        return t.reshape(B, L, H, hd).transpose(0, 2, 1, 3)

    q, k, v = heads(q), heads(k), heads(v)
    inv_freq = 1.0 / (params["rotary_base"] **
                      (jnp.arange(0, hd, 2, dtype=f32) / hd))
    freqs = jnp.outer(jnp.arange(L, dtype=f32), inv_freq)
    cos, sin = jnp.cos(freqs), jnp.sin(freqs)

    def rope(t):
        t1, t2 = t[..., :hd // 2], t[..., hd // 2:]
        return jnp.concatenate([t1 * cos - t2 * sin, t1 * sin + t2 * cos], -1)

    q, k = rope(q), rope(k)
    s = jnp.einsum("bhqd,bhkd->bhqk", q, k) * (1.0 / (hd ** 0.5))
    causal = jnp.tril(jnp.ones((L, L), dtype=jnp.bool_))
    s = jnp.where(causal, s, -jnp.inf)
    p = jax.nn.softmax(s, axis=-1)
    ctx = jnp.einsum("bhqk,bhkd->bhqd", p, v)
    ctx = ctx.transpose(0, 2, 1, 3).reshape(B, L, D)
    u1 = ctx @ params["wout"].astype(f32) + params["bout"].astype(f32) + x
    if padding_mask is not None:
        u1 = u1 * padding_mask.astype(f32)[..., None]
    z = rmsnorm(u1, params["post_scale"])
    g = jax.nn.silu(z @ params["w1"].astype(f32)) * (z @ params["w2"].astype(f32))
    return g @ params["w3"].astype(f32) + u1


if __name__ == "__main__":
    # Small but lane-aligned shapes: head_dim = 128 keeps RoPE and the flash
    # tiles on native (8, 128) tiles; MLP inner = 1024 -> 4 inner tiles.
    # 128-wide q/k tiles give a 2x2 causal grid (exercises skip + diagonal).
    B, L, D, H = 2, 256, 384, 3
    key = jax.random.PRNGKey(0)
    k_u, k_p, k_m = jax.random.split(key, 3)

    u = jax.random.normal(k_u, (B, L, D), jnp.float32).astype(jnp.bfloat16)
    params = init_params(k_p, hidden_size=D, num_heads=H)

    fwd = functools.partial(attention_block_forward,
                            block_l=128, block_q=128, block_k=128,
                            block_inner=256)

    # no padding mask
    out, _ = fwd(u, params, padding_mask=None)
    out = jax.block_until_ready(out)
    assert out.shape == (B, L, D) and out.dtype == jnp.bfloat16
    ref = _reference_forward(u, params, padding_mask=None)
    err = float(jnp.max(jnp.abs(out.astype(jnp.float32) - ref)))
    assert err < 0.1, f"max |err| vs reference = {err}"

    # with a padding mask (exercises the has_mask specialization)
    mask = (jax.random.uniform(k_m, (B, L)) > 0.2).astype(jnp.float32)
    out_m, _ = fwd(u, params, padding_mask=mask)
    out_m = jax.block_until_ready(out_m)
    ref_m = _reference_forward(u, params, padding_mask=mask)
    err_m = float(jnp.max(jnp.abs(out_m.astype(jnp.float32) - ref_m)))
    assert err_m < 0.1, f"max |err| vs reference (masked) = {err_m}"

    print("KERNEL_OK")
</pallas_src>

<mosaic_0001>
module attributes {stable_mosaic.version = 11 : i64} {
  func.func @_qkv_kernel(%arg0: i32, %arg1: i32, %arg2: i32, %arg3: memref<1x128x384xbf16, #tpu.memory_space<vmem>>, %arg4: memref<1x384xf32, #tpu.memory_space<vmem>>, %arg5: memref<1x384x384xbf16, #tpu.memory_space<vmem>>, %arg6: memref<1x1x384xbf16, #tpu.memory_space<vmem>>, %arg7: memref<128x64xf32, #tpu.memory_space<vmem>>, %arg8: memref<128x64xf32, #tpu.memory_space<vmem>>, %arg9: memref<1x1x3x128x128xbf16, #tpu.memory_space<vmem>>) attributes {dimension_semantics = [#tpu.dimension_semantics<parallel>, #tpu.dimension_semantics<parallel>, #tpu.dimension_semantics<parallel>], iteration_bounds = array<i64: 3, 2, 2>, scalar_prefetch = 0 : i64, scratch_operands = 0 : i64, tpu.core_type = #tpu.core_type<tc>, window_params = [{transform_indices = @transform_0, window_bounds = array<i64: 1, 128, 384>}, {pipeline_mode = #tpu.pipeline_mode<synchronous>, transform_indices = @transform_1, window_bounds = array<i64: 1, 384>}, {transform_indices = @transform_2, window_bounds = array<i64: 1, 384, 384>}, {transform_indices = @transform_3, window_bounds = array<i64: 1, 1, 384>}, {transform_indices = @transform_4, window_bounds = array<i64: 128, 64>}, {transform_indices = @transform_5, window_bounds = array<i64: 128, 64>}, {transform_indices = @transform_6, window_bounds = array<i64: 1, 1, 3, 128, 128>}]} {
    %c0 = arith.constant 0 : index
    %c0_0 = arith.constant 0 : index
    %c0_1 = arith.constant 0 : index
    %0 = vector.load %arg3[%c0, %c0_0, %c0_1] : memref<1x128x384xbf16, #tpu.memory_space<vmem>>, vector<1x128x384xbf16>
    %1 = vector.shape_cast %0 : vector<1x128x384xbf16> to vector<128x384xbf16>
    %2 = arith.extf %1 : vector<128x384xbf16> to vector<128x384xf32>
    %3 = arith.mulf %2, %2 : vector<128x384xf32>
    %cst = arith.constant dense<0.000000e+00> : vector<128xf32>
    %4 = vector.multi_reduction <add>, %3, %cst [1] : vector<128x384xf32> to vector<128xf32>
    %5 = vector.shape_cast %4 : vector<128xf32> to vector<128x1xf32>
    %cst_2 = arith.constant 0.00260416674 : f32
    %6 = vector.broadcast %cst_2 : f32 to vector<128x1xf32>
    %7 = arith.mulf %5, %6 : vector<128x1xf32>
    %8 = math.sqrt %7 : vector<128x1xf32>
    %cst_3 = arith.constant 9.99999974E-6 : f32
    %9 = vector.broadcast %cst_3 : f32 to vector<128x1xf32>
    %10 = arith.addf %8, %9 : vector<128x1xf32>
    %11 = vector.broadcast %10 : vector<128x1xf32> to vector<128x384xf32>
    %12 = arith.divf %2, %11 : vector<128x384xf32>
    %c0_4 = arith.constant 0 : index
    %c0_5 = arith.constant 0 : index
    %13 = vector.load %arg4[%c0_4, %c0_5] : memref<1x384xf32, #tpu.memory_space<vmem>>, vector<1x384xf32>
    %14 = vector.broadcast %13 : vector<1x384xf32> to vector<128x384xf32>
    %15 = arith.mulf %12, %14 : vector<128x384xf32>
    %16 = arith.truncf %15 : vector<128x384xf32> to vector<128x384xbf16>
    %c0_6 = arith.constant 0 : index
    %c0_7 = arith.constant 0 : index
    %c0_8 = arith.constant 0 : index
    %17 = vector.load %arg5[%c0_6, %c0_7, %c0_8] : memref<1x384x384xbf16, #tpu.memory_space<vmem>>, vector<1x384x384xbf16>
    %18 = vector.shape_cast %17 : vector<1x384x384xbf16> to vector<384x384xbf16>
    %cst_9 = arith.constant dense<0.000000e+00> : vector<128x384xf32>
    %19 = tpu.matmul %16, %18, %cst_9 {dimension_numbers = #tpu.dot_dimension_numbers<[1], [0], [0], [1], [0, 0, 1, 1], [], []>} : vector<128x384xbf16>, vector<384x384xbf16>, vector<128x384xf32> -> vector<128x384xf32>
    %c0_10 = arith.constant 0 : index
    %c0_11 = arith.constant 0 : index
    %c0_12 = arith.constant 0 : index
    %20 = vector.load %arg6[%c0_10, %c0_11, %c0_12] : memref<1x1x384xbf16, #tpu.memory_space<vmem>>, vector<1x1x384xbf16>
    %21 = vector.shape_cast %20 : vector<1x1x384xbf16> to vector<1x384xbf16>
    %22 = arith.extf %21 : vector<1x384xbf16> to vector<1x384xf32>
    %23 = vector.broadcast %22 : vector<1x384xf32> to vector<128x384xf32>
    %24 = arith.addf %19, %23 : vector<128x384xf32>
    %c0_i32 = arith.constant 0 : i32
    %25 = arith.cmpi eq, %arg0, %c0_i32 : i32
    %cst_13 = arith.constant 0.0883883461 : f32
    %cst_14 = arith.constant 1.000000e+00 : f32
    %26 = arith.select %25, %cst_13, %cst_14 : f32
    %27 = vector.broadcast %26 : f32 to vector<128x384xf32>
    %28 = arith.mulf %24, %27 : vector<128x384xf32>
    %c0_15 = arith.constant 0 : index
    %c0_16 = arith.constant 0 : index
    %29 = vector.load %arg7[%c0_15, %c0_16] : memref<128x64xf32, #tpu.memory_space<vmem>>, vector<128x64xf32>
    %c0_17 = arith.constant 0 : index
    %c0_18 = arith.constant 0 : index
    %30 = vector.load %arg8[%c0_17, %c0_18] : memref<128x64xf32, #tpu.memory_space<vmem>>, vector<128x64xf32>
    %c2_i32 = arith.constant 2 : i32
    %31 = arith.cmpi eq, %arg0, %c2_i32 : i32
    %32 = vector.extract_strided_slice %28 {offsets = [0, 0], sizes = [128, 128], strides = [1, 1]} : vector<128x384xf32> to vector<128x128xf32>
    %33 = vector.extract_strided_slice %32 {offsets = [0, 0], sizes = [128, 64], strides = [1, 1]} : vector<128x128xf32> to vector<128x64xf32>
    %34 = vector.extract_strided_slice %32 {offsets = [0, 64], sizes = [128, 64], strides = [1, 1]} : vector<128x128xf32> to vector<128x64xf32>
    %35 = arith.mulf %33, %29 : vector<128x64xf32>
    %36 = arith.mulf %34, %30 : vector<128x64xf32>
    %37 = arith.subf %35, %36 : vector<128x64xf32>
    %38 = arith.mulf %33, %30 : vector<128x64xf32>
    %39 = arith.mulf %34, %29 : vector<128x64xf32>
    %40 = arith.addf %38, %39 : vector<128x64xf32>
    %41 = tpu.concatenate %37, %40 in 1 : vector<128x64xf32>, vector<128x64xf32> -> vector<128x128xf32>
    %42 = arith.select %31, %32, %41 : vector<128x128xf32>
    %43 = arith.truncf %42 : vector<128x128xf32> to vector<128x128xbf16>
    %c0_19 = arith.constant 0 : index
    %c0_20 = arith.constant 0 : index
    %c0_21 = arith.constant 0 : index
    %c0_22 = arith.constant 0 : index
    %c0_23 = arith.constant 0 : index
    %44 = vector.load %arg9[%c0_19, %c0_20, %c0_21, %c0_22, %c0_23] : memref<1x1x3x128x128xbf16, #tpu.memory_space<vmem>>, vector<1x1x1x128x128xbf16>
    %45 = vector.shape_cast %44 : vector<1x1x1x128x128xbf16> to vector<128x128xbf16>
    %46 = vector.shape_cast %43 : vector<128x128xbf16> to vector<1x1x1x128x128xbf16>
    tpu.vector_store %arg9[%c0_19, %c0_20, %c0_21, %c0_22, %c0_23], %46 {strides = array<i32>} : memref<1x1x3x128x128xbf16, #tpu.memory_space<vmem>>, vector<1x1x1x128x128xbf16>,
    %47 = vector.extract_strided_slice %28 {offsets = [0, 128], sizes = [128, 128], strides = [1, 1]} : vector<128x384xf32> to vector<128x128xf32>
    %48 = vector.extract_strided_slice %47 {offsets = [0, 0], sizes = [128, 64], strides = [1, 1]} : vector<128x128xf32> to vector<128x64xf32>
    %49 = vector.extract_strided_slice %47 {offsets = [0, 64], sizes = [128, 64], strides = [1, 1]} : vector<128x128xf32> to vector<128x64xf32>
    %50 = arith.mulf %48, %29 : vector<128x64xf32>
    %51 = arith.mulf %49, %30 : vector<128x64xf32>
    %52 = arith.subf %50, %51 : vector<128x64xf32>
    %53 = arith.mulf %48, %30 : vector<128x64xf32>
    %54 = arith.mulf %49, %29 : vector<128x64xf32>
    %55 = arith.addf %53, %54 : vector<128x64xf32>
    %56 = tpu.concatenate %52, %55 in 1 : vector<128x64xf32>, vector<128x64xf32> -> vector<128x128xf32>
    %57 = arith.select %31, %47, %56 : vector<128x128xf32>
    %58 = arith.truncf %57 : vector<128x128xf32> to vector<128x128xbf16>
    %c0_24 = arith.constant 0 : index
    %c0_25 = arith.constant 0 : index
    %c1 = arith.constant 1 : index
    %c0_26 = arith.constant 0 : index
    %c0_27 = arith.constant 0 : index
    %59 = vector.load %arg9[%c0_24, %c0_25, %c1, %c0_26, %c0_27] : memref<1x1x3x128x128xbf16, #tpu.memory_space<vmem>>, vector<1x1x1x128x128xbf16>
    %60 = vector.shape_cast %59 : vector<1x1x1x128x128xbf16> to vector<128x128xbf16>
    %61 = vector.shape_cast %58 : vector<128x128xbf16> to vector<1x1x1x128x128xbf16>
    tpu.vector_store %arg9[%c0_24, %c0_25, %c1, %c0_26, %c0_27], %61 {strides = array<i32>} : memref<1x1x3x128x128xbf16, #tpu.memory_space<vmem>>, vector<1x1x1x128x128xbf16>,
    %62 = vector.extract_strided_slice %28 {offsets = [0, 256], sizes = [128, 128], strides = [1, 1]} : vector<128x384xf32> to vector<128x128xf32>
    %63 = vector.extract_strided_slice %62 {offsets = [0, 0], sizes = [128, 64], strides = [1, 1]} : vector<128x128xf32> to vector<128x64xf32>
    %64 = vector.extract_strided_slice %62 {offsets = [0, 64], sizes = [128, 64], strides = [1, 1]} : vector<128x128xf32> to vector<128x64xf32>
    %65 = arith.mulf %63, %29 : vector<128x64xf32>
    %66 = arith.mulf %64, %30 : vector<128x64xf32>
    %67 = arith.subf %65, %66 : vector<128x64xf32>
    %68 = arith.mulf %63, %30 : vector<128x64xf32>
    %69 = arith.mulf %64, %29 : vector<128x64xf32>
    %70 = arith.addf %68, %69 : vector<128x64xf32>
    %71 = tpu.concatenate %67, %70 in 1 : vector<128x64xf32>, vector<128x64xf32> -> vector<128x128xf32>
    %72 = arith.select %31, %62, %71 : vector<128x128xf32>
    %73 = arith.truncf %72 : vector<128x128xf32> to vector<128x128xbf16>
    %c0_28 = arith.constant 0 : index
    %c0_29 = arith.constant 0 : index
    %c2 = arith.constant 2 : index
    %c0_30 = arith.constant 0 : index
    %c0_31 = arith.constant 0 : index
    %74 = vector.load %arg9[%c0_28, %c0_29, %c2, %c0_30, %c0_31] : memref<1x1x3x128x128xbf16, #tpu.memory_space<vmem>>, vector<1x1x1x128x128xbf16>
    %75 = vector.shape_cast %74 : vector<1x1x1x128x128xbf16> to vector<128x128xbf16>
    %76 = vector.shape_cast %73 : vector<128x128xbf16> to vector<1x1x1x128x128xbf16>
    tpu.vector_store %arg9[%c0_28, %c0_29, %c2, %c0_30, %c0_31], %76 {strides = array<i32>} : memref<1x1x3x128x128xbf16, #tpu.memory_space<vmem>>, vector<1x1x1x128x128xbf16>,
    return
  }
  func.func @transform_0(%arg0: i32, %arg1: i32, %arg2: i32) -> (i32, i32, i32) {
    %c0_i32 = arith.constant 0 : i32
    %c0_i32_0 = arith.constant 0 : i32
    return %arg1, %arg2, %c0_i32 : i32, i32, i32
  }
  func.func @transform_1(%arg0: i32, %arg1: i32, %arg2: i32) -> (i32, i32) {
    %c0_i32 = arith.constant 0 : i32
    %c0_i32_0 = arith.constant 0 : i32
    %c0_i32_1 = arith.constant 0 : i32
    return %c0_i32, %c0_i32_0 : i32, i32
  }
  func.func @transform_2(%arg0: i32, %arg1: i32, %arg2: i32) -> (i32, i32, i32) {
    %c0_i32 = arith.constant 0 : i32
    %c0_i32_0 = arith.constant 0 : i32
    %c0_i32_1 = arith.constant 0 : i32
    return %arg0, %c0_i32, %c0_i32_0 : i32, i32, i32
  }
  func.func @transform_3(%arg0: i32, %arg1: i32, %arg2: i32) -> (i32, i32, i32) {
    %c0_i32 = arith.constant 0 : i32
    %c0_i32_0 = arith.constant 0 : i32
    %c0_i32_1 = arith.constant 0 : i32
    return %arg0, %c0_i32, %c0_i32_0 : i32, i32, i32
  }
  func.func @transform_4(%arg0: i32, %arg1: i32, %arg2: i32) -> (i32, i32) {
    %c0_i32 = arith.constant 0 : i32
    %c0_i32_0 = arith.constant 0 : i32
    return %arg2, %c0_i32 : i32, i32
  }
  func.func @transform_5(%arg0: i32, %arg1: i32, %arg2: i32) -> (i32, i32) {
    %c0_i32 = arith.constant 0 : i32
    %c0_i32_0 = arith.constant 0 : i32
    return %arg2, %c0_i32 : i32, i32
  }
  func.func @transform_6(%arg0: i32, %arg1: i32, %arg2: i32) -> (i32, i32, i32, i32, i32) {
    %c0_i32 = arith.constant 0 : i32
    %c0_i32_0 = arith.constant 0 : i32
    %c0_i32_1 = arith.constant 0 : i32
    return %arg0, %arg1, %c0_i32, %arg2, %c0_i32_0 : i32, i32, i32, i32, i32
  }
}

</mosaic_0001>

<bundles_post_ra>
// kernel: tpu_custom_call.1
= control target key start
LH: loop header
LB: loop body
LE: loop exit
PB: predicated region body
PF: predicated region fallthrough
CT: control target
= control target key end

     0   :  { %s8065_s0 = inlined_call_operand.hbm [shape: bf16[2,256,384], index: 0, kind: input, shape index: {}]   ;;  %s8066_s1 = inlined_call_operand.hbm [shape: f32[1,384], index: 1, kind: input, shape index: {}]   ;;  %s8067_s2 = inlined_call_operand.hbm [shape: bf16[3,384,384], index: 2, kind: input, shape index: {}]   ;;  %s8068_s3 = inlined_call_operand.vmem [shape: bf16[3,1,384], index: 3, kind: input, shape index: {}]   ;;  %s8069_s4 = inlined_call_operand.vmem [shape: f32[256,64], index: 4, kind: input, shape index: {}]   ;;  %s8070_s5 = inlined_call_operand.vmem [shape: f32[256,64], index: 5, kind: input, shape index: {}]   ;;  %s8071_s6 = inlined_call_operand.hbm [shape: bf16[3,2,3,256,128], index: 6, kind: output, shape index: {}]  }
   0x1   :  { %8249 = sst [smem:[#allocation89_spill]] %s8065_s0 }
   0x2   :  { %8250 = sst [smem:[#allocation90_spill]] %s8066_s1 }
   0x3   :  { %8251 = sst [smem:[#allocation91_spill]] %s8067_s2 }
   0x4   :  { %8252 = sst [smem:[#allocation92_spill]] %s8068_s3 }
   0x5   :  { %8253 = sst [smem:[#allocation93_spill]] %s8069_s4 }
   0x6   :  { %8254 = sst [smem:[#allocation94_spill]] %s8070_s5 }
   0x7   :  { %8255 = sst [smem:[#allocation95_spill]] %s8071_s6 }
   0x8   :  { %11 = vsyncpa [#allocation3], 0 }
   0x9   :  { %13 = vsyncpa [#allocation3 + $0x1], 0 }
   0xa   :  { %14 = vsyncpa [#allocation6], 0 }
   0xb   :  { %15 = vsyncpa [#allocation4], 0 }
   0xc   :  { %17 = vsyncpa [#allocation4 + $0x1], 0  ;;  %s4858_s21 = smov 0   ;;  %s4860_s22 = smov 0  }
   0xd   :  { %s4862_s23 = smov 0   ;;  %s4864_s24 = smov 0  }
   0xe   :  { %s4866_s25 = smov 0   ;;  %s4868_s26 = smov 0  }
   0xf   :  { %s4870_s27 = smov 0   ;;  %s4872_s28 = smov 0  }
  0x10   :  { %s4874_s29 = smov 0   ;;  %s4876_s30 = smov 0  }
  0x11   :  { %s4878_s7 = smov 0   ;;  %s4880_s8 = smov 0  }
  0x12   :  { %s4882_s9 = smov 0   ;;  %s4884_s10 = smov 0  }
  0x13   :  { %s4886_s11 = smov 0   ;;  %s4888_s12 = smov 0  }
  0x14 LB: > { %8256 = sst [smem:[#allocation15_spill]] %s4750_s21  ;;  %s35_s13 = sadd.s32 1, %s4798_s9  ;;  %s4810_s12 = sphi %s4888_s12, %s23_s12   ;;  %s4806_s11 = sphi %s4886_s11, %s8659_s11   ;;  %s4802_s10 = sphi %s4884_s10, %s8648_s10   ;;  %s4798_s9 = sphi %s4882_s9, %s8647_s9   ;;  %s4794_s8 = sphi %s4880_s8, %s8658_s8   ;;  %s4790_s7 = sphi %s4878_s7, %s8657_s7   ;;  %s4786_s30 = sphi %s4876_s30, %s8645_s30   ;;  %s4782_s29 = sphi %s4874_s29, %s8644_s29   ;;  %s4778_s28 = sphi %s4872_s28, %s8656_s28   ;;  %s4774_s27 = sphi %s4870_s27, %s8655_s27   ;;  %s4770_s26 = sphi %s4868_s26, %s8654_s26   ;;  %s4766_s25 = sphi %s4866_s25, %s8653_s25   ;;  %s4762_s24 = sphi %s4864_s24, %s8652_s24   ;;  %s4758_s23 = sphi %s4862_s23, %s8651_s23   ;;  %s4754_s22 = sphi %s4860_s22, %s8650_s22   ;;  %s4750_s21 = sphi %s4858_s21, %s8649_s21  }
  0x15   : > { %8257 = sst [smem:[#allocation16_spill]] %s4782_s29  ;;  %s38_s14 = sadd.s32 1, %s4802_s10 }
  0x16   : > { %8258 = sst [smem:[#allocation17_spill]] %s4786_s30  ;;  %p36_p0 = scmp.ge.s32.totalorder %s35_s13, 2 }
  0x17   : > { %8259 = sst [smem:[#allocation18_spill]] %s4790_s7  ;;  %s51_s15 = sadd.s32 1, %s4782_s29 }
  0x18   : > { %8260 = sst [smem:[#allocation19_spill]] %s4794_s8  ;;  %p58_p1 = scmp.ne.s32.totalorder %s4782_s29, %s4778_s28 }
  0x19   : > { %8261 = sst [smem:[#allocation20_spill]] %s4798_s9  ;;  %p59_p2 = scmp.eq.s32.totalorder %s4810_s12, 0 }
  0x1a   : > { %8262 = sst [smem:[#allocation21_spill]] %s4802_s10  ;;  %s8661_s13 = smov (%p36_p0, %s35_s13), 0 }
  0x1b   : > { %8263 = sst [smem:[#allocation22_spill]] %s4810_s12  ;;  %s8663_s14 = smov (!%p36_p0, %s38_s14), %s4802_s10 }
  0x1c   : > { %8264 = sst [smem:[#allocation23_spill]] %s8661_s13  ;;  %s4951_s16 = ssub.s32 %s4798_s9, %s8661_s13 }
  0x1d   : > { %p4955_p3 = por %p59_p2, %p58_p1  ;;  %p8075_p4 = scmp.ge.s32.totalorder %s8663_s14, 2 }
  0x1e   : > { %p4220_p5 = scmp.lt.s32.totalorder %s4810_s12, 12  ;;  %s255_s18 = sand.u32 1, %s4810_s12  }
  0x1f   : > { %s4965_s19 = scalar_select %p8075_p4, 0, %s8663_s14  }
  0x20   : > { %s257_s20 = sand.u32 1, %s4782_s29   ;;  %s4178_s3 = smul.u32 48, %s4798_s9 }
  0x21   : > { %8266 = sst [smem:[#allocation24_spill]] %s4965_s19  ;;  %s4970_s6 = ssub.s32 %s4802_s10, %s4965_s19 }
  0x22   : > { %s4177_s13 = smul.u32 192, %s257_s20  ;;  %s48_s7 = sor.u32 %s4951_s16, %s4970_s6 }
  0x23   : > { %p49_p6 = scmp.eq.s32.totalorder %s48_s7, 0  ;;  %s4179_s8 = smul.u32 96, %s4802_s10 }
  0x24   : > { %s259_s4 = scalar_lea.vmem [#allocation2], %s4177_s13  ;;  %p4209_p7 = pnand %p4220_p5, %p4955_p3 }
  0x25   : > { %s270_s5 = sshll.u32 %s259_s4, 4  ;;  %s265_s2 = sadd.s32 %s4179_s8, %s4178_s3  ;;  %s271_s5 = int_to_ptr.vmem [resolvable:$true] %s270_s5 }
  0x26   : > { %s4977_s30 = scalar_select %p49_p6, %s4782_s29, %s51_s15  }
  0x27   : > { %s3606_s19 = sshll.u32 %s265_s2, 2  ;;  %s8268_s0 = sld [smem:[#allocation89_spill]] }
  0x28   : > { %8267 = sst [smem:[#allocation25_spill]] %s4977_s30  ;;  %s4986_s15 = scalar_lea.sflag [#allocation3], %s255_s18 }
  0x29   : > { %s8076_s3 = smov 192   ;;  %s8077_s2 = smov 12  }
  0x2a   : > { %s4993_s8 = sadd.s32 4294967295, %s4810_s12   ;;  %p64_p8 = scmp.ne.s32.totalorder %s4778_s28, %s4774_s27 }
  0x2b   : > { %p65_p9 = scmp.eq.s32.totalorder %s4993_s8, 0  ;;  %s3600_s17 = sadd.s32 4294967294, %s4810_s12  }
  0x2c   : > { %p105_p10 = scmp.ne.s32.totalorder %s4770_s26, %s4766_s25  ;;  %p111_p12 = scmp.ne.s32.totalorder %s4766_s25, %s4762_s24 }
  0x2d   : > { %s267_s13 = scalar_lea.hbm %s8268_s0, %s3606_s19  ;;  %p5003_p11 = por %p65_p9, %p64_p8 }
  0x2e   : > { %s268_s4 = sshll.u32 %s267_s13, 4  ;;  %p5012_p13 = por %p105_p10, %p59_p2  ;;  %s269_s4 = int_to_ptr.hbm [resolvable:$true] %s268_s4 }
  0x2f   : > { %4211 = dma.hbm_to_vmem [thread:$0]  (!%p4209_p7), %s269_s4, 3072, %s271_s5, %s4986_s15, %s8076_s3, %s8076_s3, %s8077_s2  }
  0x30   : > { %p5018_p0 = por %p111_p12, %p65_p9  ;;  %p216_p1 = scmp.ne.s32.totalorder %s4758_s23, %s4754_s22 }
  0x31   : > { %p217_p3 = scmp.eq.s32.totalorder %s4993_s8, 11  ;;  %p222_p6 = scmp.ne.s32.totalorder %s4754_s22, %s4750_s21 }
  0x32   : > { %p223_p7 = scmp.eq.s32.totalorder %s3600_s17, 11  ;;  %p3601_p8 = scmp.ge.s32.totalorder %s4810_s12, 1 }
  0x33   : > { %p5028_p2 = por %p217_p3, %p216_p1  ;;  %p230_p10 = scmp.lt.s32.totalorder %s4810_s12, 13 }
  0x34   : > { %p5033_p12 = por %p223_p7, %p222_p6  ;;  %s8277_s1 = sld [smem:[#allocation90_spill]] }
  0x35   : > { %s8272_s24 = scalar_select %p5028_p2, 1, 0 }
  0x36   : > { %s8274_s27 = scalar_select %p5033_p12, 1, 0 }
  0x37   : > { %8273 = sst [smem:[#allocation26_spill]] %s8272_s24  ;;  %p5037_p4 = pnand %p3601_p8, %p230_p10 }
  0x38   : > { %8275 = sst [smem:[#allocation27_spill]] %s8274_s27  ;;  %s4814_s3 = smov [#allocation5]  }
  0x39   : > { %p4204_p1 = pneg %p5037_p4  ;;  %s244_s2 = sshll.u32 %s4814_s3, 4  ;;  %s245_s2 = int_to_ptr.vmem [resolvable:$true] %s244_s2 }
  0x3a   : > { %s242_s17 = sshll.u32 %s8277_s1, 4  ;;  %p5050_p3 = pnand %p4220_p5, %p5012_p13  ;;  %s243_s17 = int_to_ptr.hbm [resolvable:$true] %s242_s17 }
  0x3b   : > { %p4205_p6 = pnand %p4204_p1, %p65_p9  ;;  %s42_s13 = sadd.s32 1, %s4806_s11 }
  0x3c   : > { %p8279_p7 = scmp.ge.s32.totalorder %s8663_s14, 2  ;;  %s282_s4 = sand.u32 1, %s4770_s26  }
  0x3d   : > { %4207 = dma.hbm_to_vmem [thread:$0]  (!%p4205_p6), %s243_s17, 48, %s245_s2, [#allocation6]  }
  0x3e   : > { %s8665_s13 = smov (!%p8279_p7, %s42_s13), %s4806_s11  ;;  %s4181_s0 = smul.u32 576, %s4806_s11 }
  0x3f   : > { %p44_p8 = scmp.ge.s32.totalorder %s8665_s13, 3  ;;  %s4180_s3 = smul.u32 576, %s282_s4 }
  0x40   : > { %s206_s5 = sadd.s32 1, %s4758_s23  ;;  %s8280_s9 = sld [smem:[#allocation91_spill]] }
  0x41   : > { %s8667_s13 = smov (%p44_p8, %s8665_s13), 0  ;;  %s284_s27 = scalar_lea.vmem [#allocation7], %s4180_s3 }
  0x42   : > { %s95_s14 = ssub.s32 %s4806_s11, %s8667_s13  ;;  %s292_s21 = sshll.u32 %s284_s27, 4  ;;  %s293_s21 = int_to_ptr.vmem [resolvable:$true] %s292_s21 }
  0x43   : > { %p96_p5 = scmp.eq.s32.totalorder %s95_s14, 0  ;;  %s201_s17 = sor.u32 %s95_s14, %s4970_s6 }
  0x44   : > { %s203_s29 = sor.u32 %s201_s17, %s4951_s16  ;;  %s8281_s12 = sadd.s32 1, %s4770_s26 }
  0x45   : > { %s5075_s24 = scalar_select %p96_p5, %s4770_s26, %s8281_s12  }
  0x46   : > { %s289_s30 = scalar_lea.hbm %s8280_s9, %s4181_s0  ;;  %p204_p13 = scmp.eq.s32.totalorder %s203_s29, 0 }
  0x47   : > { %s290_s2 = sshll.u32 %s289_s30, 4  ;;  %s8282_s4 = smov 12   ;;  %s291_s2 = int_to_ptr.hbm [resolvable:$true] %s290_s2 }
  0x48   : > { %s8283_s1 = smov 192   ;;  %329 = sbr.rel (%p5037_p4) target bundleno = 1093 (0x445), region = 44 }
  0x49   : > { %4214 = dma.hbm_to_vmem [thread:$0]  (!%p5050_p3), %s291_s2, 9216, %s293_s21, %s4986_s15, %s8283_s1, %s8283_s1, %s8282_s4  }
  0x4a   : > { %s5084_s0 = scalar_select %p204_p13, %s4758_s23, %s206_s5  }
  0x4d   : > { %s331_s6 = sand.u32 1, %s4993_s8   ;;  %s333_s30 = sand.u32 1, %s4778_s28  }
  0x4e   : > { %s4182_s9 = smul.u32 192, %s333_s30  ;;  %s332_s10 = scalar_lea.sflag [#allocation3], %s331_s6 }
  0x50   : > { %s5090_s12 = scalar_lea.vmem [#allocation2], %s4182_s9 }
  0x51   : > { %4733 = dma.done.wait (%p5003_p11), %s332_s10, 3072  }
  0x52   : > { %4735 = vsyncadd (%p5003_p11), %s332_s10, 4294964224 }
  0x53   : > { %4737 = dma.done.wait (%p65_p9), [#allocation6], 48  }
  0x54   : > { %4739 = vsyncadd (%p65_p9), [#allocation6], 4294967248  ;;  %s348_s21 = sand.u32 1, %s4766_s25  }
  0x55   : > { %s4183_s29 = smul.u32 576, %s348_s21 }
  0x57   : > { %s5101_s16 = scalar_lea.vmem [#allocation7], %s4183_s29 }
  0x58   : > { %4741 = dma.done.wait (%p5018_p0), %s332_s10, 9216  }
  0x59   : > { %4743 = vsyncadd (%p5018_p0), %s332_s10, 4294958080  ;;  %v441_v0 = vld [vmem:[%s5090_s12 + $0x90] sm:$0xff]  ;;  %v442_v1 = vld [vmem:[%s5090_s12 + $0x98] sm:$0xf]  ;;  %s8343_s15 = sld [smem:[#allocation17_spill]]  ;;  %s4815_s5 = smov 64  }
  0x5a   : > { %v433_v2 = vld [vmem:[%s5090_s12 + $0x60] sm:$0xff]  ;;  %v5110_v3 = vunpack.c.l.bf16 %v441_v0  ;;  %v5112_v4 = vunpack.c.h.bf16 %v441_v0  ;;  %v5114_v5 = vunpack.c.l.bf16 %v442_v1  ;;  %v434_v6 = vld [vmem:[%s5090_s12 + $0x68] sm:$0xf]  ;;  %v435_v20 = vld [vmem:[%s5090_s12 + $0x6c] sm:$0xff]  ;;  %s8355_s20 = sld [smem:[#allocation94_spill]] }
  0x5b   : > { %v5117_v7 = vunpack.c.l.bf16 %v433_v2  ;;  %v417_v8 = vld [vmem:[%s5090_s12] sm:$0xff]  ;;  %v418_v9 = vld [vmem:[%s5090_s12 + $0x8] sm:$0xf]  ;;  %v5121_v10 = vunpack.c.h.bf16 %v433_v2  ;;  %v5123_v11 = vunpack.c.l.bf16 %v434_v6  ;;  %v436_v29 = vld [vmem:[%s5090_s12 + $0x74] sm:$0xf]  ;;  %v5159_v33 = vunpack.c.l.bf16 %v435_v20  ;;  %s8382_s17 = sld [smem:[#allocation93_spill]] }
  0x5c   : > { %8284 = vst [vmem:[#allocation28_spill] sm:$0xff] %v5112_v4  ;;  %v5125_v12 = vunpack.c.l.bf16 %v417_v8  ;;  %v5127_v13 = vunpack.c.h.bf16 %v417_v8  ;;  %v443_v14 = vld [vmem:[%s5090_s12 + $0x9c] sm:$0xff]  ;;  %v533_v15 = vmul.f32 %v5110_v3, %v5110_v3  ;;  %v534_v16 = vmul.f32 %v5112_v4, %v5112_v4  ;;  %v444_v19 = vld [vmem:[%s5090_s12 + $0xa4] sm:$0xf]  ;;  %v419_v34 = vld [vmem:[%s5090_s12 + $0xc] sm:$0xff]  ;;  %s8412_s1 = sld [smem:[#allocation19_spill]] }
  0x5d   : > { %8285 = vst [vmem:[#allocation29_spill] sm:$0xff] %v5114_v5  ;;  %v535_v17 = vmul.f32 %v5114_v5, %v5114_v5  ;;  %v521_v18 = vmul.f32 %v5117_v7, %v5117_v7  ;;  %v522_v21 = vmul.f32 %v5121_v10, %v5121_v10  ;;  %v523_v22 = vmul.f32 %v5123_v11, %v5123_v11  ;;  %v420_v39 = vld [vmem:[%s5090_s12 + $0x14] sm:$0xf]  ;;  %v427_v44 = vld [vmem:[%s5090_s12 + $0x3c] sm:$0xff]  ;;  %v428_v49 = vld [vmem:[%s5090_s12 + $0x44] sm:$0xf] }
  0x5e   : > { %8286 = vst [vmem:[#allocation30_spill] sm:$0xff] %v5121_v10  ;;  %v5144_v23 = vunpack.c.l.bf16 %v418_v9  ;;  %v497_v24 = vmul.f32 %v5125_v12, %v5125_v12  ;;  %v593_v25 = vadd.f32 %v534_v16, %v533_v15  ;;  %v498_v26 = vmul.f32 %v5127_v13, %v5127_v13  ;;  %v425_v54 = vld [vmem:[%s5090_s12 + $0x30] sm:$0xff]  ;;  %v426_v59 = vld [vmem:[%s5090_s12 + $0x38] sm:$0xf]  ;;  %v438_v9 = vld [vmem:[%s5090_s12 + $0x80] sm:$0xf] }
  0x5f   : > { %8287 = vst [vmem:[#allocation31_spill] sm:$0xff] %v5123_v11  ;;  %v5150_v27 = vunpack.c.l.bf16 %v443_v14  ;;  %v5152_v28 = vunpack.c.h.bf16 %v443_v14  ;;  %v577_v30 = vadd.f32 %v522_v21, %v521_v18  ;;  %v5157_v32 = vunpack.c.l.bf16 %v444_v19  ;;  %v437_v0 = vld [vmem:[%s5090_s12 + $0x78] sm:$0xff]  ;;  %s5825_s8 = sshll.u32 %s8343_s15, 4 }
  0x60   : > { %8288 = vst [vmem:[#allocation32_spill] sm:$0xff] %v5127_v13  ;;  %v499_v31 = vmul.f32 %v5144_v23, %v5144_v23  ;;  %v594_v35 = vadd.f32 %v593_v25, %v535_v17  ;;  %v545_v36 = vadd.f32 %v498_v26, %v497_v24  ;;  %v5169_v42 = vunpack.c.h.bf16 %v435_v20  ;;  %v445_v17 = vld [vmem:[%s5090_s12 + $0xa8] sm:$0xff]  ;;  %p405_p4 = scmp.lt.s32.totalorder %s5825_s8, 31 }
  0x61   : > { %8289 = vst [vmem:[#allocation33_spill] sm:$0xff] %v5152_v28  ;;  %v536_v37 = vmul.f32 %v5150_v27, %v5150_v27  ;;  %v537_v38 = vmul.f32 %v5152_v28, %v5152_v28  ;;  %v578_v40 = vadd.f32 %v577_v30, %v523_v22  ;;  %v538_v41 = vmul.f32 %v5157_v32, %v5157_v32 }
  0x62   : > { %8290 = vst [vmem:[#allocation34_spill] sm:$0xff] %v5157_v32  ;;  %v5171_v43 = vunpack.c.l.bf16 %v436_v29  ;;  %595 = vadd.xlane.f32.xlu1 %v594_v35  ;;  %v546_v45 = vadd.f32 %v545_v36, %v499_v31  ;;  %v524_v47 = vmul.f32 %v5159_v33, %v5159_v33  ;;  %v5176_v48 = vunpack.c.l.bf16 %v419_v34  ;;  %v439_v29 = vld [vmem:[%s5090_s12 + $0x84] sm:$0xff]  ;;  %v446_v31 = vld [vmem:[%s5090_s12 + $0xb0] sm:$0xf]  ;;  %s5877_s18 = scalar_select %p405_p4, %s5825_s8, 31 }
  0x63   : > { %8291 = vst [vmem:[#allocation35_spill] sm:$0xff] %v5169_v42  ;;  %v597_v46 = vadd.f32 %v537_v38, %v536_v37  ;;  %579 = vadd.xlane.f32.xlu0 %v578_v40  ;;  %v525_v50 = vmul.f32 %v5169_v42, %v5169_v42  ;;  %v5183_v52 = vunpack.c.h.bf16 %v419_v34  ;;  %v5185_v53 = vunpack.c.l.bf16 %v420_v39  ;;  %v447_v39 = vld [vmem:[%s5090_s12 + $0xb4] sm:$0xff]  ;;  %p400_p9 = scmp.lt.s32.totalorder %s8412_s1, 2  ;;  %p2118_p11 = scmp.eq.s32.totalorder %s8412_s1, 0 }
  0x64   : > { %8292 = vst [vmem:[#allocation36_spill] sm:$0xff] %v5171_v43  ;;  %v526_v51 = vmul.f32 %v5171_v43, %v5171_v43  ;;  %547 = vadd.xlane.f32.xlu2 %v546_v45  ;;  %v500_v56 = vmul.f32 %v5176_v48, %v5176_v48  ;;  %v5190_v57 = vunpack.c.l.bf16 %v427_v44  ;;  %v5192_v58 = vunpack.c.h.bf16 %v427_v44  ;;  %s3611_s19 = sshll.u32 %s5877_s18, 3  ;;  %p2201_p0 = scmp.eq.s32.totalorder %s8412_s1, 2 }
  0x65   : > { %8293 = vst [vmem:[#allocation37_spill] sm:$0xff] %v5183_v52  ;;  %v598_v55 = vadd.f32 %v597_v46, %v538_v41  ;;  %v581_v60 = vadd.f32 %v525_v50, %v524_v47  ;;  %v501_v61 = vmul.f32 %v5183_v52, %v5183_v52  ;;  %v502_v62 = vmul.f32 %v5185_v53, %v5185_v53  ;;  %v440_v41 = vld [vmem:[%s5090_s12 + $0x8c] sm:$0xf]  ;;  %v448_v50 = vld [vmem:[%s5090_s12 + $0xbc] sm:$0xf]  ;;  %s5961_s3 = scalar_lea.vmem %s8355_s20, %s3611_s19  ;;  %s6298_s4 = scalar_lea.vmem %s8382_s17, %s3611_s19 }
  0x66   : > { %8294 = vst [vmem:[#allocation38_spill] sm:$0xff] %v5185_v53  ;;  %v5199_v63 = vunpack.c.l.bf16 %v428_v49  ;;  %v512_v1 = vmul.f32 %v5190_v57, %v5190_v57  ;;  %v513_v2 = vmul.f32 %v5192_v58, %v5192_v58  ;;  %v5206_v6 = vunpack.c.l.bf16 %v425_v54  ;;  %s401_s6 = scalar_select %p400_p9, %s8412_s1, 2 }
  0x67   : > { %8295 = vst [vmem:[#allocation39_spill] sm:$0xff] %v5192_v58  ;;  %v5208_v8 = vunpack.c.h.bf16 %v425_v54  ;;  %v582_v14 = vadd.f32 %v581_v60, %v526_v51  ;;  %v549_v15 = vadd.f32 %v501_v61, %v500_v56  ;;  %v5211_v16 = vunpack.c.l.bf16 %v426_v59  ;;  %s2119_s29 = scalar_select %p2118_p11, 0.088388346, 1.0 }
  0x68   : > { %8296 = vst [vmem:[#allocation40_spill] sm:$0xff] %v5199_v63  ;;  %v514_v18 = vmul.f32 %v5199_v63, %v5199_v63  ;;  %v509_v19 = vmul.f32 %v5206_v6, %v5206_v6  ;;  %v5220_v21 = vunpack.c.l.bf16 %v437_v0  ;;  %v565_v24 = vadd.f32 %v513_v2, %v512_v1  ;;  %s4185_s30 = smul.u32 3, %s401_s6 }
  0x69   : > { %8297 = vst [vmem:[#allocation41_spill] sm:$0xff] %v5208_v8  ;;  %v510_v20 = vmul.f32 %v5208_v8, %v5208_v8  ;;  %v550_v22 = vadd.f32 %v549_v15, %v502_v62  ;;  %v5222_v25 = vunpack.c.h.bf16 %v437_v0  ;;  %v5224_v26 = vunpack.c.l.bf16 %v438_v9  ;;  %v423_v0 = vld [vmem:[%s5090_s12 + $0x24] sm:$0xff]  ;;  %v421_v15 = vld [vmem:[%s5090_s12 + $0x18] sm:$0xff]  ;;  %v3939_v8 = vld [vmem:[%s5101_s16 + $0x8] sm:$0xf0] }
  0x6a   : > { %8298 = vst [vmem:[#allocation42_spill] sm:$0xff] %v5211_v16  ;;  %599 = vadd.xlane.f32.xlu1 %v598_v55  ;;  %v527_v30 = vmul.f32 %v5220_v21, %v5220_v21  ;;  %v5230_v34 = vunpack.c.l.bf16 %v445_v17  ;;  %v511_v35 = vmul.f32 %v5211_v16, %v5211_v16  ;;  %v5236_v38 = vunpack.c.h.bf16 %v445_v17  ;;  %v429_v17 = vld [vmem:[%s5090_s12 + $0x48] sm:$0xff]  ;;  %s2635_s15 = scalar_select %p2201_p0, 1, 0 }
  0x6b   : > { %8299 = vst [vmem:[#allocation43_spill] sm:$0xff] %v5222_v25  ;;  %583 = vadd.xlane.f32.xlu0 %v582_v14  ;;  %v561_v36 = vadd.f32 %v510_v20, %v509_v19  ;;  %v528_v37 = vmul.f32 %v5222_v25, %v5222_v25  ;;  %v529_v40 = vmul.f32 %v5224_v26, %v5224_v26  ;;  %v5242_v44 = vunpack.c.l.bf16 %v439_v29 }
  0x6c   : > { %8300 = vst [vmem:[#allocation44_spill] sm:$0xff] %v5224_v26  ;;  %551 = vadd.xlane.f32.xlu2 %v550_v22  ;;  %v5244_v45 = vunpack.c.h.bf16 %v439_v29  ;;  %v566_v46 = vadd.f32 %v565_v24, %v514_v18  ;;  %v5246_v49 = vunpack.c.l.bf16 %v446_v31  ;;  %v539_v51 = vmul.f32 %v5230_v34, %v5230_v34 }
  0x6d   : > { %8301 = vst [vmem:[#allocation45_spill] sm:$0xff] %v5236_v38  ;;  %v585_v47 = vadd.f32 %v528_v37, %v527_v30  ;;  %v540_v54 = vmul.f32 %v5236_v38, %v5236_v38  ;;  %v5253_v55 = vunpack.c.l.bf16 %v447_v39  ;;  %v5255_v56 = vunpack.c.h.bf16 %v447_v39  ;;  %v424_v30 = vld [vmem:[%s5090_s12 + $0x2c] sm:$0xf]  ;;  %v422_v39 = vld [vmem:[%s5090_s12 + $0x20] sm:$0xf] }
  0x6e   : > { %8302 = vst [vmem:[#allocation46_spill] sm:$0xff] %v5244_v45  ;;  %v562_v59 = vadd.f32 %v561_v36, %v511_v35  ;;  %v5257_v60 = vunpack.c.l.bf16 %v440_v41  ;;  %v530_v61 = vmul.f32 %v5242_v44, %v5242_v44  ;;  %v531_v62 = vmul.f32 %v5244_v45, %v5244_v45  ;;  %v3945_v38 = vld [vmem:[%s5101_s16 + $0x38] sm:$0xf0] }
  0x6f   : > { %8303 = vst [vmem:[#allocation47_spill] sm:$0xff] %v5246_v49  ;;  %v586_v1 = vadd.f32 %v585_v47, %v529_v40  ;;  %v5264_v2 = vunpack.c.l.bf16 %v448_v50  ;;  %v542_v9 = vmul.f32 %v5253_v55, %v5253_v55  ;;  %v543_v14 = vmul.f32 %v5255_v56, %v5255_v56 }
  0x70   : > { %8304 = vst [vmem:[#allocation48_spill] sm:$0xff] %v5255_v56  ;;  %v541_v18 = vmul.f32 %v5246_v49, %v5246_v49  ;;  %v601_v19 = vadd.f32 %v540_v54, %v539_v51  ;;  %v5274_v20 = vunpack.c.l.bf16 %v423_v0  ;;  %v5276_v22 = vunpack.c.h.bf16 %v423_v0  ;;  %v3640_v56 = vld [vmem:[%s5101_s16 + $0x30] sm:$0xf] }
  0x71   : > { %8305 = vst [vmem:[#allocation49_spill] sm:$0xff] %v5257_v60  ;;  %v532_v24 = vmul.f32 %v5257_v60, %v5257_v60  ;;  %v589_v29 = vadd.f32 %v531_v62, %v530_v61  ;;  %v5281_v31 = vunpack.c.l.bf16 %v421_v15  ;;  %v5283_v35 = vunpack.c.h.bf16 %v421_v15 }
  0x72   : > { %8306 = vst [vmem:[#allocation50_spill] sm:$0xff] %v5264_v2  ;;  %567 = vadd.xlane.f32.xlu1 %v566_v46  ;;  %v544_v36 = vmul.f32 %v5264_v2, %v5264_v2  ;;  %v605_v37 = vadd.f32 %v543_v14, %v542_v9  ;;  %v5288_v40 = vunpack.c.l.bf16 %v429_v17  ;;  %v5290_v41 = vunpack.c.h.bf16 %v429_v17  ;;  %v430_v46 = vld [vmem:[%s5090_s12 + $0x50] sm:$0xf]  ;;  %v431_v17 = vld [vmem:[%s5090_s12 + $0x54] sm:$0xff] }
  0x73   : > { %8307 = vst [vmem:[#allocation51_spill] sm:$0xff] %v5274_v20  ;;  %563 = vadd.xlane.f32.xlu0 %v562_v59  ;;  %v602_v47 = vadd.f32 %v601_v19, %v541_v18  ;;  %v5293_v50 = vunpack.c.l.bf16 %v424_v30  ;;  %v506_v51 = vmul.f32 %v5274_v20, %v5274_v20  ;;  %v507_v54 = vmul.f32 %v5276_v22, %v5276_v22 }
  0x74   : > { %8308 = vst [vmem:[#allocation52_spill] sm:$0xff] %v5276_v22  ;;  %587 = vadd.xlane.f32.xlu2 %v586_v1  ;;  %v590_v59 = vadd.f32 %v589_v29, %v532_v24  ;;  %v5299_v61 = vunpack.c.l.bf16 %v422_v39  ;;  %v503_v62 = vmul.f32 %v5281_v31, %v5281_v31  ;;  %v504_v0 = vmul.f32 %v5283_v35, %v5283_v35 }
  0x75   : > { %8309 = vst [vmem:[#allocation53_spill] sm:$0xff] %v5281_v31  ;;  %v606_v1 = vadd.f32 %v605_v37, %v544_v36  ;;  %v5305_v9 = vunpack.c.l.bf16 %v430_v46  ;;  %v515_v14 = vmul.f32 %v5288_v40, %v5288_v40  ;;  %v516_v15 = vmul.f32 %v5290_v41, %v5290_v41  ;;  %v432_v46 = vld [vmem:[%s5090_s12 + $0x5c] sm:$0xf]  ;;  %s8415_s12 = sld [smem:[#allocation92_spill]] }
  0x76   : > { %8310 = vst [vmem:[#allocation54_spill] sm:$0xff] %v5283_v35  ;;  %v508_v18 = vmul.f32 %v5293_v50, %v5293_v50  ;;  %v557_v19 = vadd.f32 %v507_v54, %v506_v51  ;;  %v505_v24 = vmul.f32 %v5299_v61, %v5299_v61  ;;  %v553_v29 = vadd.f32 %v504_v0, %v503_v62 }
  0x77   : > { %8311 = vst [vmem:[#allocation55_spill] sm:$0xff] %v5288_v40  ;;  %v5316_v30 = vunpack.c.l.bf16 %v431_v17  ;;  %v5318_v36 = vunpack.c.h.bf16 %v431_v17  ;;  %v517_v37 = vmul.f32 %v5305_v9, %v5305_v9  ;;  %v569_v39 = vadd.f32 %v516_v15, %v515_v14  ;;  %v3700_v15 = vld [vmem:[%s5101_s16 + $0xa8] sm:$0xf]  ;;  %v3960_v17 = vld [vmem:[%s5101_s16 + $0xb0] sm:$0xf0] }
  0x78   : > { %8312 = vst [vmem:[#allocation56_spill] sm:$0xff] %v5290_v41  ;;  %v554_v10 = vadd.f32 %v553_v29, %v505_v24  ;;  %v5323_v51 = vunpack.c.l.bf16 %v432_v46  ;;  %v3957_v46 = vld [vmem:[%s5101_s16 + $0x98] sm:$0xf0] }
  0x79   : > { %8313 = vst [vmem:[#allocation57_spill] sm:$0xff] %v5293_v50  ;;  %v518_v54 = vmul.f32 %v5316_v30, %v5316_v30  ;;  %v570_v62 = vadd.f32 %v569_v39, %v517_v37  ;;  %v3688_v39 = vld [vmem:[%s5101_s16 + $0x90] sm:$0xf] }
  0x7a   : > { %8314 = vst [vmem:[#allocation58_spill] sm:$0xff] %v5299_v61  ;;  %603 = vadd.xlane.f32.xlu1 %v602_v47  ;;  %v558_v47 = vadd.f32 %v557_v19, %v508_v18  ;;  %v520_v0 = vmul.f32 %v5323_v51, %v5323_v51  ;;  %v3701_v19 = vor.u32 %v3960_v17, %v3700_v15 }
  0x7b   : > { %8315 = vst [vmem:[#allocation59_spill] sm:$0xff] %v5305_v9  ;;  %591 = vadd.xlane.f32.xlu0 %v590_v59  ;;  %v519_v59 = vmul.f32 %v5318_v36, %v5318_v36  ;;  %s403_s21 = scalar_lea.vmem %s8415_s12, %s4185_s30 }
  0x7c   : > { %8316 = vst [vmem:[#allocation60_spill] sm:$0xff] %v5316_v30  ;;  %607 = vadd.xlane.f32.xlu2 %v606_v1  ;;  %1677 = vmatpush.bf16.msra.mxu0 %v3701_v19 }
  0x7d   : > { %8317 = vst [vmem:[#allocation61_spill] sm:$0xff] %v5318_v36  ;;  %v573_v1 = vadd.f32 %v519_v59, %v518_v54  ;;  %4154 = vmatpush.bf16.msra.mxu2 %v3701_v19  ;;  %4155 = vmatpush.bf16.msra.mxu3 %v3701_v19  ;;  %v3689_v54 = vor.u32 %v3957_v46, %v3688_v39  ;;  %v3676_v59 = vld [vmem:[%s5101_s16 + $0x78] sm:$0xf] }
  0x7e   : > { %8318 = vst [vmem:[#allocation62_spill] sm:$0xff] %v5323_v51  ;;  %4153 = vmatpush.bf16.msra.mxu1 %v3701_v19 }
  0x7f   : > { %v574_v14 = vadd.f32 %v573_v1, %v520_v0  ;;  %v3954_v0 = vld [vmem:[%s5101_s16 + $0x80] sm:$0xf0] }
  0x80   : > { %1678 = vmatpush.bf16.msra.mxu0 %v3689_v54  ;;  %v3677_v15 = vor.u32 %v3954_v0, %v3676_v59 }
  0x81   : > { %4157 = vmatpush.bf16.msra.mxu2 %v3689_v54  ;;  %4158 = vmatpush.bf16.msra.mxu3 %v3689_v54 }
  0x82   : > { %559 = vadd.xlane.f32.xlu1 %v558_v47  ;;  %4156 = vmatpush.bf16.msra.mxu1 %v3689_v54 }
  0x83   : > { %555 = vadd.xlane.f32.xlu0 %v554_v10 }
  0x84   : > { %571 = vadd.xlane.f32.xlu2 %v570_v62  ;;  %1679 = vmatpush.bf16.msra.mxu0 %v3677_v15 }
  0x85   : > { %4160 = vmatpush.bf16.msra.mxu2 %v3677_v15  ;;  %4161 = vmatpush.bf16.msra.mxu3 %v3677_v15 }
  0x86   : > { %4159 = vmatpush.bf16.msra.mxu1 %v3677_v15  ;;  %v3948_v15 = vld [vmem:[%s5101_s16 + $0x50] sm:$0xf0] }
  0x8b   : > { %575 = vadd.xlane.f32.xlu0 %v574_v14 }
  0xd5   : > { %v596_v18 = vpop.xlane.xlu1 %595 }
  0xd6   : > { %v5333_v24 = vmul.f32 0.0026041667, %v596_v18  ;;  %v580_v29 = vpop.xlane.xlu0 %579 }
  0xd7   : > { %v5335_v37 = vmul.f32 0.0026041667, %v580_v29  ;;  %v548_v10 = vpop.xlane.xlu2 %547  ;;  %v3664_v29 = vld [vmem:[%s5101_s16 + $0x60] sm:$0xf] }
  0xd8   : > { %4482 = vrsqrt.f32 %v5333_v24  ;;  %v5340_v47 = vmul.f32 0.0026041667, %v548_v10  ;;  %v3951_v10 = vld [vmem:[%s5101_s16 + $0x68] sm:$0xf0]  ;;  %vm776_vm0 = vcmp.eq.f32.partialorder %v5333_v24, inf }
  0xd9   : > { %4484 = vrsqrt.f32 %v5335_v37  ;;  %vm728_vm1 = vcmp.eq.f32.partialorder %v5335_v37, inf  ;;  %vm730_vm13 = vcmp.eq.f32.partialorder %v5335_v37, 0.0 }
  0xda   : > { %4486 = vrsqrt.f32 %v5340_v47  ;;  %vm632_vm2 = vcmp.eq.f32.partialorder %v5340_v47, inf  ;;  %vm634_vm6 = vcmp.eq.f32.partialorder %v5340_v47, 0.0 }
  0xdd   : > { %v600_v62 = vpop.xlane.xlu1 %599 }
  0xde   : > { %v5346_v1 = vmul.f32 0.0026041667, %v600_v62  ;;  %v584_v14 = vpop.xlane.xlu0 %583  ;;  %v5350_v19 = vpop.eup %4482  ;;  %v3665_v62 = vor.u32 %v3951_v10, %v3664_v29 }
  0xdf   : > { %v5348_v17 = vmul.f32 0.0026041667, %v584_v14  ;;  %v552_v18 = vpop.xlane.xlu2 %551  ;;  %v5355_v39 = vpop.eup %4484  ;;  %v770_v59 = vmul.f32 %v5350_v19, %v5333_v24  ;;  %v3652_v14 = vld [vmem:[%s5101_s16 + $0x48] sm:$0xf] }
  0xe0   : > { %4488 = vrsqrt.f32 %v5346_v1  ;;  %v5358_v46 = vpop.eup %4486  ;;  %v5360_v54 = vmul.f32 0.0026041667, %v552_v18  ;;  %v722_v0 = vmul.f32 %v5355_v39, %v5335_v37  ;;  %1680 = vmatpush.bf16.msra.mxu0 %v3665_v62  ;;  %4163 = vmatpush.bf16.msra.mxu2 %v3665_v62  ;;  %v3653_v29 = vor.u32 %v3948_v15, %v3652_v14 }
  0xe1   : > { %4490 = vrsqrt.f32 %v5348_v17  ;;  %v626_v42 = vmul.f32 %v5358_v46, %v5340_v47  ;;  %4164 = vmatpush.bf16.msra.mxu3 %v3665_v62  ;;  %4162 = vmatpush.bf16.msra.mxu1 %v3665_v62  ;;  %v771_v43 = vmul.f32 %v5350_v19, %v770_v59  ;;  %vm788_vm3 = vcmp.eq.f32.partialorder %v5346_v1, inf }
  0xe2   : > { %4492 = vrsqrt.f32 %v5360_v54  ;;  %v723_v35 = vmul.f32 %v5355_v39, %v722_v0  ;;  %vm740_vm4 = vcmp.eq.f32.partialorder %v5348_v17, inf  ;;  %vm644_vm5 = vcmp.eq.f32.partialorder %v5360_v54, inf }
  0xe3   : > { %v627_v62 = vmul.f32 %v5358_v46, %v626_v42  ;;  %vm646_vm7 = vcmp.eq.f32.partialorder %v5360_v54, 0.0  ;;  %vm742_vm14 = vcmp.eq.f32.partialorder %v5348_v17, 0.0 }
  0xe4   : > { %1681 = vmatpush.bf16.msra.mxu0 %v3653_v29  ;;  %4166 = vmatpush.bf16.msra.mxu2 %v3653_v29  ;;  %v724_v2 = vmul.f32 0.5, %v723_v35 }
  0xe5   : > { %v568_v41 = vpop.xlane.xlu1 %567  ;;  %4167 = vmatpush.bf16.msra.mxu3 %v3653_v29  ;;  %4165 = vmatpush.bf16.msra.mxu1 %v3653_v29  ;;  %v628_v42 = vmul.f32 0.5, %v627_v62 }
  0xe6   : > { %v5371_v36 = vpop.eup %4488  ;;  %v5373_v18 = vmul.f32 0.0026041667, %v568_v41  ;;  %v564_v11 = vpop.xlane.xlu0 %563  ;;  %v725_v60 = vsub.f32 1.5, %v724_v2 }
  0xe7   : > { %v5375_v10 = vpop.eup %4490  ;;  %v782_v9 = vmul.f32 %v5371_v36, %v5346_v1  ;;  %v5380_v51 = vmul.f32 0.0026041667, %v564_v11  ;;  %v588_v22 = vpop.xlane.xlu2 %587  ;;  %v772_v11 = vmul.f32 0.5, %v771_v43 }
  0xe8   : > { %v734_v41 = vmul.f32 %v5375_v10, %v5348_v17  ;;  %4494 = vrsqrt.f32 %v5373_v18  ;;  %v5387_v59 = vpop.eup %4492  ;;  %v5399_v32 = vmul.f32 0.0026041667, %v588_v22  ;;  %v629_v22 = vsub.f32 1.5, %v628_v42 }
  0xe9   : > { %4496 = vrsqrt.f32 %v5380_v51  ;;  %v783_v14 = vmul.f32 %v5371_v36, %v782_v9  ;;  %v638_v15 = vmul.f32 %v5387_v59, %v5360_v54  ;;  %v3641_v9 = vor.u32 %v3945_v38, %v3640_v56 }
  0xea   : > { %v735_v0 = vmul.f32 %v5375_v10, %v734_v41  ;;  %v773_v5 = vsub.f32 1.5, %v772_v11  ;;  %4498 = vrsqrt.f32 %v5399_v32  ;;  %vm692_vm8 = vcmp.eq.f32.partialorder %v5373_v18, inf }
  0xeb   : > { %v639_v49 = vmul.f32 %v5387_v59, %v638_v15  ;;  %v784_v41 = vmul.f32 0.5, %v783_v14  ;;  %1682 = vmatpush.bf16.msra.mxu0 %v3641_v9  ;;  %4169 = vmatpush.bf16.msra.mxu2 %v3641_v9  ;;  %v726_v14 = vmul.f32 %v5355_v39, %v725_v60  ;;  %v3942_v60 = vld [vmem:[%s5101_s16 + $0x20] sm:$0xf0]  ;;  %vm680_vm9 = vcmp.eq.f32.partialorder %v5380_v51, inf }
  0xec   : > { %v736_v45 = vmul.f32 0.5, %v735_v0  ;;  %4170 = vmatpush.bf16.msra.mxu3 %v3641_v9  ;;  %4168 = vmatpush.bf16.msra.mxu1 %v3641_v9  ;;  %v630_v9 = vmul.f32 %v5358_v46, %v629_v22  ;;  %vm752_vm11 = vcmp.eq.f32.partialorder %v5399_v32, inf }
  0xed   : > { %v604_v28 = vpop.xlane.xlu1 %603  ;;  %v640_v35 = vmul.f32 0.5, %v639_v49  ;;  %v774_v49 = vmul.f32 %v5350_v19, %v773_v5  ;;  %v785_v2 = vsub.f32 1.5, %v784_v41  ;;  %v3628_v5 = vld [vmem:[%s5101_s16 + $0x18] sm:$0xf]  ;;  %v727_v56 = vmul.f32 %v726_v14, %v5335_v37 }
  0xee   : > { %v5397_v4 = vpop.eup %4494  ;;  %v5401_v29 = vmul.f32 0.0026041667, %v604_v28  ;;  %v592_v43 = vpop.xlane.xlu0 %591  ;;  %v737_v11 = vsub.f32 1.5, %v736_v45 }
  0xef   : > { %v608_v25 = vpop.xlane.xlu2 %607  ;;  %v5403_v63 = vpop.eup %4496  ;;  %v686_v62 = vmul.f32 %v5397_v4, %v5373_v18  ;;  %v641_v0 = vsub.f32 1.5, %v640_v35  ;;  %v5418_v42 = vmul.f32 0.0026041667, %v592_v43  ;;  %v775_v41 = vmul.f32 %v774_v49, %v5333_v24 }
  0xf0   : > { %v674_v38 = vmul.f32 %v5403_v63, %v5380_v51  ;;  %4500 = vrsqrt.f32 %v5401_v29  ;;  %v5424_v19 = vmul.f32 0.0026041667, %v608_v25  ;;  %v5426_v45 = vpop.eup %4498  ;;  %v786_v35 = vmul.f32 %v5371_v36, %v785_v2 }
  0xf1   : > { %v687_v15 = vmul.f32 %v5397_v4, %v686_v62  ;;  %4502 = vrsqrt.f32 %v5418_v42  ;;  %v738_v25 = vmul.f32 %v5375_v10, %v737_v11  ;;  %v746_v62 = vmul.f32 %v5426_v45, %v5399_v32 }
  0xf2   : > { %v675_v46 = vmul.f32 %v5403_v63, %v674_v38  ;;  %v642_v49 = vmul.f32 %v5387_v59, %v641_v0  ;;  %4504 = vrsqrt.f32 %v5424_v19  ;;  %v631_v36 = vmul.f32 %v630_v9, %v5340_v47 }
  0xf3   : > { %v688_v39 = vmul.f32 0.5, %v687_v15  ;;  %v747_v2 = vmul.f32 %v5426_v45, %v746_v62  ;;  %v3629_v0 = vor.u32 %v3942_v60, %v3628_v5  ;;  %v5461_v15 = vsel %vm776_vm0, %v5333_v24, %v775_v41 }
  0xf4   : > { %v676_v14 = vmul.f32 0.5, %v675_v46  ;;  %v787_v9 = vmul.f32 %v786_v35, %v5346_v1  ;;  %v739_v62 = vmul.f32 %v738_v25, %v5348_v17  ;;  %v643_v58 = vmul.f32 %v642_v49, %v5360_v54 }
  0xf5   : > { %v560_v22 = vpop.xlane.xlu1 %559  ;;  %v689_v46 = vsub.f32 1.5, %v688_v39  ;;  %1683 = vmatpush.bf16.msra.mxu0 %v3629_v0  ;;  %4172 = vmatpush.bf16.msra.mxu2 %v3629_v0  ;;  %v5473_v5 = vsel %vm728_vm1, %v5335_v37, %v727_v56  ;;  %v748_v60 = vmul.f32 0.5, %v747_v2  ;;  %vm800_vm10 = vcmp.eq.f32.partialorder %v5401_v29, inf }
  0xf6   : > { %v556_v43 = vpop.xlane.xlu0 %555  ;;  %v5442_v38 = vpop.eup %4500  ;;  %v5454_v16 = vmul.f32 0.0026041667, %v560_v22  ;;  %4173 = vmatpush.bf16.msra.mxu3 %v3629_v0  ;;  %4171 = vmatpush.bf16.msra.mxu1 %v3629_v0  ;;  %v677_v25 = vsub.f32 1.5, %v676_v14  ;;  %v5484_v56 = vsel %vm788_vm3, %v5346_v1, %v787_v9  ;;  %v3616_v0 = vld [vmem:[%s5101_s16] sm:$0xf]  ;;  %v645_v14 = vsel %vm644_vm5, %v5360_v54, %v643_v58 }
  0xf7   : > { %v794_v11 = vmul.f32 %v5442_v38, %v5401_v29  ;;  %v572_v28 = vpop.xlane.xlu2 %571  ;;  %v5456_v59 = vmul.f32 0.0026041667, %v556_v43  ;;  %v4503_v26 = vpop.eup %4502  ;;  %v690_v9 = vmul.f32 %v5397_v4, %v689_v46  ;;  %v3617_v58 = vor.u32 %v3939_v8, %v3616_v0 }
  0xf8   : > { %4506 = vrsqrt.f32 %v5454_v16  ;;  %v5468_v43 = vmul.f32 0.0026041667, %v572_v28  ;;  %v758_v35 = vmul.f32 %v4503_v26, %v5418_v42  ;;  %v4505_v39 = vpop.eup %4504  ;;  %v633_v28 = vsel %vm632_vm2, %v5340_v47, %v631_v36 }
  0xf9   : > { %v795_v10 = vmul.f32 %v5442_v38, %v794_v11  ;;  %4508 = vrsqrt.f32 %v5456_v59  ;;  %v806_v2 = vmul.f32 %v4505_v39, %v5424_v19  ;;  %v5493_v36 = vsel %vm740_vm4, %v5348_v17, %v739_v62  ;;  %1684 = vmatpush.bf16.msra.mxu0 %v3617_v58  ;;  %4175 = vmatpush.bf16.msra.mxu2 %v3617_v58  ;;  %v5611_v62 = vld [vmem:[#allocation5] sm:$0x7] }
  0xfa   : > { %4510 = vrsqrt.f32 %v5468_v43  ;;  %v678_v50 = vmul.f32 %v5403_v63, %v677_v25  ;;  %vm764_vm12 = vcmp.eq.f32.partialorder %v5418_v42, inf  ;;  %4176 = vmatpush.bf16.msra.mxu3 %v3617_v58  ;;  %4174 = vmatpush.bf16.msra.mxu1 %v3617_v58  ;;  %vm812_vm15 = vcmp.eq.f32.partialorder %v5424_v19, inf }
  0xfb   : > { %v796_v41 = vmul.f32 0.5, %v795_v10  ;;  %v759_v10 = vmul.f32 %v4503_v26, %v758_v35  ;;  %v749_v35 = vsub.f32 1.5, %v748_v60  ;;  %v807_v30 = vmul.f32 %v4505_v39, %v806_v2 }
  0xfc   : > { %v8319_v60 = vand.u32 2147483648, %v5340_v47  ;;  %v691_v2 = vmul.f32 %v690_v9, %v5373_v18  ;;  %vm668_vm0 = vcmp.eq.f32.partialorder %v5454_v16, inf  ;;  %vm778_vm1 = vcmp.eq.f32.partialorder %v5333_v24, 0.0 }
  0xfd   : > { %v797_v49 = vsub.f32 1.5, %v796_v41  ;;  %v760_v22 = vmul.f32 0.5, %v759_v10  ;;  %v808_v46 = vmul.f32 0.5, %v807_v30  ;;  %v8320_v10 = vand.u32 2147483648, %v5360_v54 }
  0xfe   : > { %v576_v11 = vpop.xlane.xlu0 %575  ;;  %v5501_v40 = vpop.eup %4506  ;;  %v636_v41 = vsel %vm634_vm6, %v8319_v60, %v633_v28  ;;  %v750_v47 = vmul.f32 %v5426_v45, %v749_v35  ;;  %vm790_vm3 = vcmp.eq.f32.partialorder %v5346_v1, 0.0  ;;  %vm656_vm5 = vcmp.eq.f32.partialorder %v5456_v59, inf }
  0xff   : > { %v5506_v61 = vmul.f32 0.0026041667, %v576_v11  ;;  %v761_v4 = vsub.f32 1.5, %v760_v22  ;;  %v648_v63 = vsel %vm646_vm7, %v8320_v10, %v645_v14  ;;  %v5517_v25 = vpop.eup %4508  ;;  %v662_v30 = vmul.f32 %v5501_v40, %v5454_v16 }
 0x100   : > { %v798_v54 = vmul.f32 %v5442_v38, %v797_v49  ;;  %v809_v28 = vsub.f32 1.5, %v808_v46  ;;  %v650_v22 = vmul.f32 %v5517_v25, %v5456_v59  ;;  %v5530_v11 = vpop.eup %4510  ;;  %v5534_v9 = vadd.f32 1e-05, %v636_v41 }
 0x101   : > { %4512 = vrsqrt.f32 %v5506_v61  ;;  %v762_v0 = vmul.f32 %v4503_v26, %v761_v4  ;;  %v663_v14 = vmul.f32 %v5501_v40, %v662_v30  ;;  %v5536_v45 = vadd.f32 1e-05, %v648_v63 }
 0x102   : > { %v679_v38 = vmul.f32 %v678_v50, %v5380_v51  ;;  %v651_v49 = vmul.f32 %v5517_v25, %v650_v22  ;;  %v698_v35 = vmul.f32 %v5530_v11, %v5468_v43  ;;  %v810_v58 = vmul.f32 %v4505_v39, %v809_v28 }
 0x103   : > { %v664_v4 = vmul.f32 0.5, %v663_v14  ;;  %4514 = vrcp.f32 %v5534_v9  ;;  %v5549_v46 = vsel %vm692_vm8, %v5373_v18, %v691_v2  ;;  %v751_v50 = vmul.f32 %v750_v47, %v5399_v32 }
 0x104   : > { %v652_v60 = vmul.f32 0.5, %v651_v49  ;;  %v699_v41 = vmul.f32 %v5530_v11, %v698_v35  ;;  %v799_v63 = vmul.f32 %v798_v54, %v5401_v29  ;;  %v763_v39 = vmul.f32 %v762_v0, %v5418_v42 }
 0x105   : > { %v665_v30 = vsub.f32 1.5, %v664_v4  ;;  %4516 = vrcp.f32 %v5536_v45  ;;  %v5561_v28 = vsel %vm680_vm9, %v5380_v51, %v679_v38  ;;  %v842_v22 = vand.u32 2147483647, %v5534_v9 }
 0x106   : > { %v811_v14 = vmul.f32 %v810_v58, %v5424_v19  ;;  %v653_v54 = vsub.f32 1.5, %v652_v60  ;;  %v5575_v38 = vsel %vm752_vm11, %v5399_v32, %v751_v50  ;;  %v700_v35 = vmul.f32 0.5, %v699_v41 }
 0x107   : > { %v5553_v10 = vpop.eup %4512  ;;  %v844_v2 = vand.u32 2147483648, %v5534_v9  ;;  %v5582_v60 = vsel %vm800_vm10, %v5401_v29, %v799_v63  ;;  %v5587_v49 = vsel %vm764_vm12, %v5418_v42, %v763_v39  ;;  %v666_v0 = vmul.f32 %v5501_v40, %v665_v30 }
 0x108   : > { %v710_v47 = vmul.f32 %v5553_v10, %v5506_v61  ;;  %vm838_vm2 = vweird.f32 %v5534_v9  ;;  %vm5593_vm4 = vcmp.eq.f32.partialorder %v842_v22, 8.507059e+37  ;;  %v859_v63 = vand.u32 2147483647, %v5536_v45 }
 0x109   : > { %v4515_v58 = vpop.eup %4514  ;;  %v5606_v40 = vsel %vm812_vm15, %v5424_v19, %v811_v14  ;;  %v654_v30 = vmul.f32 %v5517_v25, %v653_v54  ;;  %v861_v22 = vand.u32 2147483648, %v5536_v45  ;;  %v8324_v8 = vand.u32 2147483648, %v5348_v17 }
 0x10a   : > { %v711_v4 = vmul.f32 %v5553_v10, %v710_v47  ;;  %v834_v50 = vmul.f32 %v4515_v58, %v5534_v9  ;;  %v8323_v47 = vand.u32 2147483648, %v5335_v37  ;;  %v845_v20 = vor.u32 1.1754944e-38, %v844_v2 }
 0x10b   : > { %v4517_v26 = vpop.eup %4516  ;;  %v744_v37 = vsel %vm742_vm14, %v8324_v8, %v5493_v36  ;;  %v667_v14 = vmul.f32 %v666_v0, %v5454_v16  ;;  %vm839_vm6 = vweird.f32 %v4515_v58  ;;  %vm5624_vm7 = vcmp.eq.f32.partialorder %v859_v63, 8.507059e+37 }
 0x10c   : > { %v732_v39 = vsel %vm730_vm13, %v8323_v47, %v5473_v5  ;;  %v701_v5 = vsub.f32 1.5, %v700_v35  ;;  %v712_v47 = vmul.f32 0.5, %v711_v4  ;;  %v835_v52 = vsub.f32 1.0, %v834_v50  ;;  %vm5636_vm9 = vmor %vm838_vm2, %vm839_vm6  ;;  %v4005_v35 = vld [vmem:[%s5101_s16 + $0x218] sm:$0xf0] }
 0x10d   : > { %v851_v25 = vmul.f32 %v4517_v26, %v5536_v45  ;;  %v5620_v54 = vadd.f32 1e-05, %v732_v39  ;;  %v5622_v31 = vadd.f32 1e-05, %v744_v37  ;;  %v5629_v17 = vperm.slane %v5611_v62, 0 }
 0x10e   : > { %v836_v13 = vmul.f32 %v4515_v58, %v835_v52  ;;  %v655_v36 = vmul.f32 %v654_v30, %v5456_v59  ;;  %v862_v2 = vor.u32 1.1754944e-38, %v861_v22  ;;  %v713_v0 = vsub.f32 1.5, %v712_v47  ;;  %v3892_v30 = vld [vmem:[%s5101_s16 + $0x228] sm:$0xf]  ;;  %v4008_v47 = vld [vmem:[%s5101_s16 + $0x230] sm:$0xf0] }
 0x10f   : > { %v852_v8 = vsub.f32 1.0, %v851_v25  ;;  %4518 = vrcp.f32 %v5620_v54  ;;  %vm856_vm8 = vweird.f32 %v4517_v26  ;;  %v978_v50 = vand.u32 2147483647, %v5620_v54  ;;  %v3959_v25 = vld [vmem:[%s5101_s16 + $0xac] sm:$0xf] }
 0x110   : > { %v837_v52 = vadd.f32 %v4515_v58, %v836_v13  ;;  %4520 = vrcp.f32 %v5622_v31  ;;  %v980_v63 = vand.u32 2147483648, %v5620_v54  ;;  %v8329_v39 = vand.u32 2147483648, %v5333_v24  ;;  %v3702_v24 = vld [vmem:[%s5101_s16 + $0xb4] sm:$0xf0] }
 0x111   : > { %v853_v4 = vmul.f32 %v4517_v26, %v852_v8  ;;  %v5651_v9 = vsel %vm668_vm0, %v5454_v16, %v667_v14  ;;  %v5654_v22 = vmul.f32 %v5530_v11, %v701_v5  ;;  %vm855_vm10 = vweird.f32 %v5536_v45 }
 0x112   : > { %v780_v13 = vsel %vm778_vm1, %v8329_v39, %v5461_v15  ;;  %v841_v37 = vsel %vm5636_vm9, %v4515_v58, %v837_v52  ;;  %vm694_vm11 = vcmp.eq.f32.partialorder %v5373_v18, 0.0  ;;  %vm682_vm12 = vcmp.eq.f32.partialorder %v5380_v51, 0.0  ;;  %vm857_vm13 = vmor %vm855_vm10, %vm856_vm8  ;;  %v3880_v52 = vld [vmem:[%s5101_s16 + $0x210] sm:$0xf] }
 0x113   : > { %v5666_v15 = vsel %vm5593_vm4, %v845_v20, %v841_v37  ;;  %v854_v11 = vadd.f32 %v4517_v26, %v853_v4  ;;  %v995_v5 = vand.u32 2147483647, %v5622_v31  ;;  %v8330_v58 = vand.u32 2147483648, %v5346_v1 }
 0x114   : > { %v5677_v14 = vsel %vm656_vm5, %v5456_v59, %v655_v36  ;;  %v5680_v8 = vmul.f32 %v5553_v10, %v713_v0  ;;  %v847_v20 = vmul.f32 %v5666_v15, %v5125_v12  ;;  %v5685_v41 = vadd.f32 1e-05, %v780_v13 }
 0x115   : > { %v792_v45 = vsel %vm790_vm3, %v8330_v58, %v5484_v56  ;;  %v4519_v4 = vpop.eup %4518  ;;  %v858_v1 = vsel %vm857_vm13, %v4517_v26, %v854_v11  ;;  %v3893_v39 = vor.u32 %v4008_v47, %v3892_v30  ;;  %v3705_v37 = vor.u32 %v3959_v25, %v3702_v24 }
 0x116   : > { %v5689_v56 = vadd.f32 1e-05, %v792_v45  ;;  %v4521_v36 = vpop.eup %4520  ;;  %v5693_v10 = vsel %vm5624_vm7, %v862_v2, %v858_v1  ;;  %v970_v12 = vmul.f32 %v4519_v4, %v5620_v54  ;;  %vm5696_vm14 = vcmp.eq.f32.partialorder %v978_v50, 8.507059e+37 }
 0x117   : > { %v981_v13 = vor.u32 1.1754944e-38, %v980_v63  ;;  %v997_v26 = vand.u32 2147483648, %v5622_v31  ;;  %v864_v30 = vmul.f32 %v5693_v10, %v5176_v48  ;;  %v987_v47 = vmul.f32 %v4521_v36, %v5622_v31  ;;  %1775 = vmatpush.bf16.msrb.mxu2 %v3893_v39  ;;  %1824 = vmatpush.bf16.msrb.mxu3 %v3705_v37  ;;  %v3956_v63 = vld [vmem:[%s5101_s16 + $0x94] sm:$0xf]  ;;  %v3690_v48 = vld [vmem:[%s5101_s16 + $0x9c] sm:$0xf0] }
 0x118   : > { %4522 = vrcp.f32 %v5685_v41  ;;  %v3881_v53 = vor.u32 %v4005_v35, %v3880_v52  ;;  %v971_v2 = vsub.f32 1.0, %v970_v12  ;;  %vm974_vm15 = vweird.f32 %v5620_v54  ;;  %v3868_v39 = vld [vmem:[%s5101_s16 + $0x1f8] sm:$0xf]  ;;  %v4002_v37 = vld [vmem:[%s5101_s16 + $0x200] sm:$0xf0] }
 0x119   : > { %vm991_vm0 = vweird.f32 %v5622_v31  ;;  %vm5707_vm1 = vcmp.eq.f32.partialorder %v995_v5, 8.507059e+37  ;;  %v1113_v25 = vmul.f32 %v5629_v17, %v847_v20  ;;  %v1116_v24 = vmul.f32 %v5629_v17, %v864_v30 }
 0x11a   : > { %v988_v11 = vsub.f32 1.0, %v987_v47  ;;  %4524 = vrcp.f32 %v5689_v56  ;;  %v972_v58 = vmul.f32 %v4519_v4, %v971_v2  ;;  %vm975_vm2 = vweird.f32 %v4519_v4 }
 0x11b   : > { %v998_v45 = vor.u32 1.1754944e-38, %v997_v26  ;;  %v1046_v52 = vand.u32 2147483647, %v5685_v41  ;;  %v5717_v5 = vpack.c.bf16 %v1116_v24, %v1113_v25  ;;  %vm992_vm3 = vweird.f32 %v4521_v36  ;;  %1776 = vmatpush.bf16.msrb.mxu2 %v3881_v53  ;;  %vm976_vm5 = vmor %vm974_vm15, %vm975_vm2 }
 0x11c   : > { %v989_v35 = vmul.f32 %v4521_v36, %v988_v11  ;;  %v3693_v1 = vor.u32 %v3956_v63, %v3690_v48  ;;  %v973_v12 = vadd.f32 %v4519_v4, %v972_v58  ;;  %vm1042_vm4 = vweird.f32 %v5685_v41  ;;  %vm993_vm6 = vmor %vm991_vm0, %vm992_vm3 }
 0x11d   : > { %v8335_v20 = vand.u32 2147483648, %v5380_v51  ;;  %v8336_v26 = vand.u32 2147483648, %v5373_v18  ;;  %1685 = vmatmul.bf16.vlgmr.msra.gmra.mxu0 %v5717_v5  ;;  %v1048_v63 = vand.u32 2147483648, %v5685_v41  ;;  %v1063_v51 = vand.u32 2147483647, %v5689_v56 }
 0x11e   : > { %v5732_v2 = vpop.eup %4522  ;;  %v990_v53 = vadd.f32 %v4521_v36, %v989_v35  ;;  %1825 = vmatpush.bf16.msrb.mxu3 %v3693_v1  ;;  %v977_v48 = vsel %vm976_vm5, %v4519_v4, %v973_v12  ;;  %vm5747_vm7 = vcmp.eq.f32.partialorder %v1046_v52, 8.507059e+37  ;;  %vm1059_vm8 = vweird.f32 %v5689_v56  ;;  %v3678_v35 = vld [vmem:[%s5101_s16 + $0x84] sm:$0xf0]  ;;  %v3983_v1 = vld [vmem:[%s5101_s16 + $0x16c] sm:$0xf] }
 0x11f   : > { %v684_v30 = vsel %vm682_vm12, %v8335_v20, %v5561_v28  ;;  %v696_v47 = vsel %vm694_vm11, %v8336_v26, %v5549_v46  ;;  %v1038_v18 = vmul.f32 %v5732_v2, %v5685_v41  ;;  %v3869_v25 = vor.u32 %v4002_v37, %v3868_v39  ;;  %v3856_v37 = vld [vmem:[%s5101_s16 + $0x1e0] sm:$0xf]  ;;  %v3999_v26 = vld [vmem:[%s5101_s16 + $0x1e8] sm:$0xf0] }
 0x120   : > { %v5740_v28 = vadd.f32 1e-05, %v684_v30  ;;  %v5752_v54 = vadd.f32 1e-05, %v696_v47  ;;  %v5754_v4 = vpop.eup %4524  ;;  %v5758_v31 = vsel %vm5696_vm14, %v981_v13, %v977_v48  ;;  %v994_v24 = vsel %vm993_vm6, %v4521_v36, %v990_v53  ;;  %v3953_v13 = vld [vmem:[%s5101_s16 + $0x7c] sm:$0xf] }
 0x121   : > { %8339 = vst [vmem:[#allocation63_spill] sm:$0xff] %v5758_v31  ;;  %v1065_v11 = vand.u32 2147483648, %v5689_v56  ;;  %vm754_vm9 = vcmp.eq.f32.partialorder %v5399_v32, 0.0  ;;  %vm802_vm10 = vcmp.eq.f32.partialorder %v5401_v29, 0.0  ;;  %v983_v58 = vmul.f32 %v5758_v31, %v5117_v7  ;;  %1777 = vmatpush.bf16.msrb.mxu2 %v3869_v25  ;;  %v3666_v25 = vld [vmem:[%s5101_s16 + $0x6c] sm:$0xf0] }
 0x122   : > { %4526 = vrcp.f32 %v5740_v28  ;;  %v5768_v52 = vsel %vm5707_vm1, %v998_v45, %v994_v24  ;;  %v1039_v0 = vsub.f32 1.0, %v1038_v18  ;;  %v1055_v36 = vmul.f32 %v5754_v4, %v5689_v56  ;;  %v3798_v45 = vld [vmem:[%s5101_s16 + $0x174] sm:$0xf0]  ;;  %v3950_v18 = vld [vmem:[%s5101_s16 + $0x64] sm:$0xf] }
 0x123   : > { %8340 = vst [vmem:[#allocation64_spill] sm:$0xff] %v5768_v52  ;;  %vm766_vm11 = vcmp.eq.f32.partialorder %v5418_v42, 0.0  ;;  %v1000_v39 = vmul.f32 %v5768_v52, %v5159_v33  ;;  %vm1043_vm12 = vweird.f32 %v5732_v2  ;;  %v1049_v7 = vor.u32 1.1754944e-38, %v1048_v63 }
 0x124   : > { %vm5779_vm13 = vcmp.eq.f32.partialorder %v1063_v51, 8.507059e+37  ;;  %v1040_v12 = vmul.f32 %v5732_v2, %v1039_v0  ;;  %v1056_v20 = vsub.f32 1.0, %v1055_v36  ;;  %v910_v30 = vand.u32 2147483647, %v5740_v28  ;;  %vm1044_vm1 = vmor %vm1042_vm4, %vm1043_vm12 }
 0x125   : > { %4528 = vrcp.f32 %v5752_v54  ;;  %v1137_v33 = vmul.f32 %v5629_v17, %v983_v58  ;;  %v1140_v47 = vmul.f32 %v5629_v17, %v1000_v39  ;;  %v1066_v53 = vor.u32 1.1754944e-38, %v1065_v11  ;;  %v3980_v39 = vld [vmem:[%s5101_s16 + $0x154] sm:$0xf] }
 0x126   : > { %v912_v63 = vand.u32 2147483648, %v5740_v28  ;;  %v1041_v51 = vadd.f32 %v5732_v2, %v1040_v12  ;;  %v1057_v48 = vmul.f32 %v5754_v4, %v1056_v20  ;;  %vm1060_vm14 = vweird.f32 %v5754_v4  ;;  %v3786_v12 = vld [vmem:[%s5101_s16 + $0x15c] sm:$0xf0] }
 0x127   : > { %vm906_vm15 = vweird.f32 %v5740_v28  ;;  %vm814_vm0 = vcmp.eq.f32.partialorder %v5424_v19, 0.0  ;;  %v5799_v58 = vpack.c.bf16 %v1140_v47, %v1137_v33  ;;  %v3681_v11 = vor.u32 %v3953_v13, %v3678_v35  ;;  %vm1061_vm3 = vmor %vm1059_vm8, %vm1060_vm14 }
 0x128   : > { %v4527_v24 = vpop.eup %4526  ;;  %v3801_v0 = vor.u32 %v3983_v1, %v3798_v45  ;;  %v3857_v36 = vor.u32 %v3999_v26, %v3856_v37  ;;  %v1045_v20 = vsel %vm1044_vm1, %v5732_v2, %v1041_v51  ;;  %v1058_v31 = vadd.f32 %v5754_v4, %v1057_v48 }
 0x129   : > { %v902_v52 = vmul.f32 %v4527_v24, %v5740_v28  ;;  %vm5810_vm2 = vcmp.eq.f32.partialorder %v910_v30, 8.507059e+37  ;;  %1705 = vmatmul.bf16.vlgmr.msra.gmra.mxu2 %v5799_v58  ;;  %v5817_v41 = vsel %vm5747_vm7, %v1049_v7, %v1045_v20  ;;  %v913_v2 = vor.u32 1.1754944e-38, %v912_v63  ;;  %1826 = vmatpush.bf16.msrb.mxu3 %v3681_v11 }
 0x12a   : > { %v927_v13 = vand.u32 2147483647, %v5752_v54  ;;  %v3669_v35 = vor.u32 %v3950_v18, %v3666_v25  ;;  %v1051_v45 = vmul.f32 %v5817_v41, %v5110_v3  ;;  %v1062_v46 = vsel %vm1061_vm3, %v5754_v4, %v1058_v31  ;;  %1873 = vmatpush.bf16.msrb.mxu0 %v3801_v0  ;;  %1778 = vmatpush.bf16.msrb.mxu2 %v3857_v36 }
 0x12b   : > { %v4529_v1 = vpop.eup %4528  ;;  %v903_v7 = vsub.f32 1.0, %v902_v52  ;;  %v3789_v37 = vor.u32 %v3980_v39, %v3786_v12  ;;  %v5832_v56 = vsel %vm5779_vm13, %v1066_v53, %v1062_v46  ;;  %v929_v26 = vand.u32 2147483648, %v5752_v54  ;;  %v3996_v46 = vld [vmem:[%s5101_s16 + $0x1d0] sm:$0xf0] }
 0x12c   : > { %v919_v30 = vmul.f32 %v4529_v1, %v5752_v54  ;;  %v8346_v47 = vand.u32 2147483648, %v5399_v32  ;;  %v1068_v4 = vmul.f32 %v5832_v56, %v5150_v27  ;;  %vm907_vm4 = vweird.f32 %v4527_v24 }
 0x12d   : > { %v904_v31 = vmul.f32 %v4527_v24, %v903_v7  ;;  %v8347_v52 = vand.u32 2147483648, %v5418_v42  ;;  %1827 = vmatpush.bf16.msrb.mxu3 %v3669_v35  ;;  %v8348_v32 = vand.u32 2147483648, %v5401_v29  ;;  %vm923_vm5 = vweird.f32 %v5752_v54  ;;  %vm908_vm6 = vmor %vm906_vm15, %vm907_vm4 }
 0x12e   : > { %v756_v3 = vsel %vm754_vm9, %v8346_v47, %v5575_v38  ;;  %v920_v53 = vsub.f32 1.0, %v919_v30  ;;  %v1149_v38 = vmul.f32 %v5629_v17, %v1051_v45  ;;  %v1152_v42 = vmul.f32 %v5629_v17, %v1068_v4  ;;  %1874 = vmatpush.bf16.msrb.mxu0 %v3789_v37 }
 0x12f   : > { %v768_v50 = vsel %vm766_vm11, %v8347_v52, %v5587_v49  ;;  %v5849_v63 = vadd.f32 1e-05, %v756_v3  ;;  %v804_v27 = vsel %vm802_vm10, %v8348_v32, %v5582_v60  ;;  %v905_v49 = vadd.f32 %v4527_v24, %v904_v31  ;;  %v3947_v3 = vld [vmem:[%s5101_s16 + $0x4c] sm:$0xf]  ;;  %v3977_v32 = vld [vmem:[%s5101_s16 + $0x13c] sm:$0xf] }
 0x130   : > { %v5851_v51 = vadd.f32 1e-05, %v768_v50  ;;  %v921_v48 = vmul.f32 %v4529_v1, %v920_v53  ;;  %vm924_vm7 = vweird.f32 %v4529_v1  ;;  %v5864_v18 = vadd.f32 1e-05, %v804_v27  ;;  %v3654_v53 = vld [vmem:[%s5101_s16 + $0x54] sm:$0xf0] }
 0x131   : > { %4530 = vrcp.f32 %v5849_v63  ;;  %v5866_v29 = vpack.c.bf16 %v1152_v42, %v1149_v38  ;;  %v909_v60 = vsel %vm908_vm6, %v4527_v24, %v905_v49  ;;  %v8350_v25 = vand.u32 2147483648, %v5424_v19  ;;  %vm925_vm9 = vmor %vm923_vm5, %vm924_vm7  ;;  %v3774_v49 = vld [vmem:[%s5101_s16 + $0x144] sm:$0xf0] }
 0x132   : > { %4532 = vrcp.f32 %v5851_v51  ;;  %v5881_v28 = vsel %vm5810_vm2, %v913_v2, %v909_v60  ;;  %v922_v0 = vadd.f32 %v4529_v1, %v921_v48  ;;  %vm928_vm8 = vcmp.eq.f32.partialorder %v927_v13, 8.507059e+37  ;;  %v3796_v13 = vld [vmem:[%s5101_s16 + $0x168] sm:$0xf] }
 0x133   : > { %8349 = vst [vmem:[#allocation65_spill] sm:$0xff] %v5866_v29  ;;  %v816_v11 = vsel %vm814_vm0, %v8350_v25, %v5606_v40  ;;  %v930_v36 = vor.u32 1.1754944e-38, %v929_v26  ;;  %1715 = vmatmul.bf16.vlgmr.msra.gmra.mxu3 %v5866_v29  ;;  %v915_v24 = vmul.f32 %v5881_v28, %v5206_v6  ;;  %v1012_v19 = vand.u32 2147483647, %v5849_v63 }
 0x134   : > { %v1014_v40 = vand.u32 2147483648, %v5849_v63  ;;  %v1029_v39 = vand.u32 2147483647, %v5851_v51  ;;  %v926_v12 = vsel %vm925_vm9, %v4529_v1, %v922_v0  ;;  %v1031_v20 = vand.u32 2147483648, %v5851_v51 }
 0x135   : > { %v5892_v33 = vadd.f32 1e-05, %v816_v11  ;;  %4534 = vrcp.f32 %v5864_v18  ;;  %v5897_v6 = vmul.f32 %v5654_v22, %v5468_v43  ;;  %v5901_v54 = vmul.f32 %v5680_v8, %v5506_v61  ;;  %v3984_v22 = vld [vmem:[%s5101_s16 + $0x170] sm:$0xf0]  ;;  %v3844_v8 = vld [vmem:[%s5101_s16 + $0x1c8] sm:$0xf] }
 0x136   : > { %v5903_v2 = vsel %vm928_vm8, %v930_v36, %v926_v12  ;;  %vm1008_vm10 = vweird.f32 %v5849_v63  ;;  %v1125_v45 = vmul.f32 %v5629_v17, %v915_v24  ;;  %vm1025_vm11 = vweird.f32 %v5851_v51  ;;  %v3784_v36 = vld [vmem:[%s5101_s16 + $0x150] sm:$0xf]  ;;  %v3981_v24 = vld [vmem:[%s5101_s16 + $0x158] sm:$0xf0] }
 0x137   : > { %v5908_v35 = vpop.eup %4530  ;;  %v932_v1 = vmul.f32 %v5903_v2, %v5190_v57  ;;  %4536 = vrcp.f32 %v5892_v33  ;;  %vm670_vm12 = vcmp.eq.f32.partialorder %v5454_v16, 0.0  ;;  %vm658_vm13 = vcmp.eq.f32.partialorder %v5456_v59, 0.0 }
 0x138   : > { %v5918_v7 = vpop.eup %4532  ;;  %v1004_v57 = vmul.f32 %v5908_v35, %v5849_v63  ;;  %vm5924_vm14 = vcmp.eq.f32.partialorder %v1012_v19, 8.507059e+37  ;;  %v5928_v30 = vor.u32 1.1754944e-38, %v1014_v40  ;;  %v1080_v26 = vand.u32 2147483647, %v5864_v18 }
 0x139   : > { %v1082_v47 = vand.u32 2147483648, %v5864_v18  ;;  %v1128_v4 = vmul.f32 %v5629_v17, %v932_v1  ;;  %vm1009_vm15 = vweird.f32 %v5908_v35  ;;  %v1021_v31 = vmul.f32 %v5918_v7, %v5851_v51 }
 0x13a   : > { %vm5937_vm0 = vcmp.eq.f32.partialorder %v1029_v39, 8.507059e+37  ;;  %v5941_v50 = vor.u32 1.1754944e-38, %v1031_v20  ;;  %v1005_v27 = vsub.f32 1.0, %v1004_v57  ;;  %vm1026_vm1 = vweird.f32 %v5918_v7  ;;  %v3832_v20 = vld [vmem:[%s5101_s16 + $0x1b0] sm:$0xf]  ;;  %vm5998_vm7 = vmor %vm1008_vm10, %vm1009_vm15 }
 0x13b   : > { %vm1076_vm2 = vweird.f32 %v5864_v18  ;;  %v1097_v38 = vand.u32 2147483647, %v5892_v33  ;;  %v1099_v42 = vand.u32 2147483648, %v5892_v33  ;;  %v5950_v48 = vpop.eup %4534  ;;  %v5952_v60 = vpack.c.bf16 %v1128_v4, %v1125_v45  ;;  %v3642_v57 = vld [vmem:[%s5101_s16 + $0x3c] sm:$0xf0]  ;;  %vm1027_vm10 = vmor %vm1025_vm11, %vm1026_vm1 }
 0x13c   : > { %v1022_v25 = vsub.f32 1.0, %v1021_v31  ;;  %v3797_v11 = vor.u32 %v3984_v22, %v3796_v13  ;;  %v3845_v0 = vor.u32 %v3996_v46, %v3844_v8  ;;  %v1006_v19 = vmul.f32 %v5908_v35, %v1005_v27  ;;  %v3993_v13 = vld [vmem:[%s5101_s16 + $0x1b8] sm:$0xf0]  ;;  %v3944_v46 = vld [vmem:[%s5101_s16 + $0x34] sm:$0xf] }
 0x13d   : > { %v1072_v40 = vmul.f32 %v5950_v48, %v5864_v18  ;;  %vm5966_vm3 = vcmp.eq.f32.partialorder %v1080_v26, 8.507059e+37  ;;  %v5970_v12 = vor.u32 1.1754944e-38, %v1082_v47  ;;  %v5974_v1 = vpop.eup %4536  ;;  %1695 = vmatmul.bf16.vlgmr.msra.gmra.mxu1 %v5952_v60  ;;  %vm1077_vm4 = vweird.f32 %v5950_v48  ;;  %v3974_v26 = vld [vmem:[%s5101_s16 + $0x124] sm:$0xf]  ;;  %v3760_v39 = vld [vmem:[%s5101_s16 + $0x120] sm:$0xf] }
 0x13e   : > { %v1023_v45 = vmul.f32 %v5918_v7, %v1022_v25  ;;  %1779 = vmatpush.bf16.msrb.mxu2 %v3845_v0  ;;  %v3657_v22 = vor.u32 %v3947_v3, %v3654_v53  ;;  %v3777_v8 = vor.u32 %v3977_v32, %v3774_v49  ;;  %v1007_v47 = vadd.f32 %v5908_v35, %v1006_v19  ;;  %v3762_v25 = vld [vmem:[%s5101_s16 + $0x12c] sm:$0xf0]  ;;  %v3772_v19 = vld [vmem:[%s5101_s16 + $0x138] sm:$0xf]  ;;  %v3968_v27 = vld [vmem:[%s5101_s16 + $0xf4] sm:$0xf] }
 0x13f   : > { %v1073_v4 = vsub.f32 1.0, %v1072_v40  ;;  %v1089_v31 = vmul.f32 %v5974_v1, %v5892_v33  ;;  %vm5985_vm5 = vcmp.eq.f32.partialorder %v1097_v38, 8.507059e+37  ;;  %v5989_v29 = vor.u32 1.1754944e-38, %v1099_v42  ;;  %1726 = vmatpush.bf16.msrb.mxu1 %v3797_v11  ;;  %v2187_v3 = vld [vmem:[%s5961_s3 + $0x10] sm:$0xff]  ;;  %v3978_v40 = vld [vmem:[%s5101_s16 + $0x140] sm:$0xf0] }
 0x140   : > { %vm704_vm6 = vcmp.eq.f32.partialorder %v5468_v43, inf  ;;  %v1024_v32 = vadd.f32 %v5918_v7, %v1023_v45  ;;  %vm1094_vm8 = vweird.f32 %v5974_v1  ;;  %1828 = vmatpush.bf16.msrb.mxu3 %v3657_v22  ;;  %1875 = vmatpush.bf16.msrb.mxu0 %v3777_v8  ;;  %v3785_v38 = vor.u32 %v3981_v24, %v3784_v36  ;;  %v3820_v8 = vld [vmem:[%s5101_s16 + $0x198] sm:$0xf] }
 0x141   : > { %v3833_v42 = vor.u32 %v3993_v13, %v3832_v20  ;;  %vm716_vm9 = vcmp.eq.f32.partialorder %v5506_v61, inf  ;;  %v1011_v49 = vsel %vm5998_vm7, %v5908_v35, %v1007_v47  ;;  %v1074_v63 = vmul.f32 %v5950_v48, %v1073_v4  ;;  %2238 = vrot.lane.b32.xlu0 %v2187_v3, %s4815_s5  ;;  %v3750_v47 = vld [vmem:[%s5101_s16 + $0x114] sm:$0xf0] }
 0x142   : > { %v1090_v11 = vsub.f32 1.0, %v1089_v31  ;;  %v3645_v0 = vor.u32 %v3944_v46, %v3642_v57  ;;  %v6019_v36 = vsel %vm5924_vm14, %v5928_v30, %v1011_v49  ;;  %v1028_v35 = vsel %vm1027_vm10, %v5918_v7, %v1024_v32  ;;  %v3630_v46 = vld [vmem:[%s5101_s16 + $0x24] sm:$0xf0]  ;;  %v3987_v32 = vld [vmem:[%s5101_s16 + $0x188] sm:$0xf0] }
 0x143   : > { %1780 = vmatpush.bf16.msrb.mxu2 %v3833_v42  ;;  %v3765_v24 = vor.u32 %v3974_v26, %v3762_v25  ;;  %v8362_v51 = vand.u32 2147483648, %v5456_v59  ;;  %v1017_v13 = vmul.f32 %v6019_v36, %v5220_v21  ;;  %v6032_v45 = vsel %vm5937_vm0, %v5941_v50, %v1028_v35  ;;  %1727 = vmatpush.bf16.msrb.mxu1 %v3785_v38  ;;  %v3808_v25 = vld [vmem:[%s5101_s16 + $0x180] sm:$0xf]  ;;  %v3618_v38 = vld [vmem:[%s5101_s16 + $0xc] sm:$0xf0] }
 0x144   : > { %v1075_v37 = vadd.f32 %v5950_v48, %v1074_v63  ;;  %v1091_v7 = vmul.f32 %v5974_v1, %v1090_v11  ;;  %vm706_vm11 = vcmp.eq.f32.partialorder %v5468_v43, 0.0  ;;  %v1034_v59 = vmul.f32 %v6032_v45, %v5242_v44  ;;  %1829 = vmatpush.bf16.msrb.mxu3 %v3645_v0  ;;  %v3738_v49 = vld [vmem:[%s5101_s16 + $0xfc] sm:$0xf0]  ;;  %v2190_v63 = vld [vmem:[%s5961_s3 + $0x28] sm:$0xff] }
 0x145   : > { %v660_v20 = vsel %vm658_vm13, %v8362_v51, %v5677_v14  ;;  %vm6043_vm13 = vmor %vm1076_vm2, %vm1077_vm4  ;;  %1876 = vmatpush.bf16.msrb.mxu0 %v3765_v24  ;;  %v8365_v14 = vand.u32 2147483648, %v5454_v16  ;;  %v3773_v44 = vor.u32 %v3978_v40, %v3772_v19  ;;  %vm1093_vm14 = vweird.f32 %v5892_v33  ;;  %v3990_v16 = vld [vmem:[%s5101_s16 + $0x1a0] sm:$0xf0]  ;;  %v3971_v33 = vld [vmem:[%s5101_s16 + $0x10c] sm:$0xf] }
 0x146   : > { %v6052_v52 = vadd.f32 1e-05, %v660_v20  ;;  %v1079_v18 = vsel %vm6043_vm13, %v5950_v48, %v1075_v37  ;;  %v1092_v50 = vadd.f32 %v5974_v1, %v1091_v7  ;;  %v1143_v57 = vmul.f32 %v5629_v17, %v1017_v13  ;;  %v3748_v51 = vld [vmem:[%s5101_s16 + $0x108] sm:$0xf]  ;;  %v3972_v20 = vld [vmem:[%s5101_s16 + $0x110] sm:$0xf0] }
 0x147   : > { %v672_v30 = vsel %vm670_vm12, %v8365_v14, %v5651_v9  ;;  %v3941_v9 = vld [vmem:[%s5101_s16 + $0x1c] sm:$0xf]  ;;  %v1146_v26 = vmul.f32 %v5629_v17, %v1034_v59  ;;  %v6070_v48 = vsel %vm5966_vm3, %v5970_v12, %v1079_v18  ;;  %vm1095_vm12 = vmor %vm1093_vm14, %vm1094_vm8  ;;  %1728 = vmatpush.bf16.msrb.mxu1 %v3773_v44  ;;  %v3975_v12 = vld [vmem:[%s5101_s16 + $0x128] sm:$0xf0]  ;;  %vm718_vm15 = vcmp.eq.f32.partialorder %v5506_v61, 0.0 }
 0x148   : > { %v6059_v22 = vadd.f32 1e-05, %v672_v30  ;;  %4538 = vrcp.f32 %v6052_v52  ;;  %v1085_v4 = vmul.f32 %v6070_v48, %v5230_v34  ;;  %v1096_v31 = vsel %vm1095_vm12, %v5974_v1, %v1092_v50  ;;  %v3938_v34 = vld [vmem:[%s5101_s16 + $0x4] sm:$0xf] }
 0x149   : > { %v6083_v3 = vpack.c.bf16 %v1146_v26, %v1143_v57  ;;  %v6088_v53 = vsel %vm5985_vm5, %v5989_v29, %v1096_v31  ;;  %v705_v1 = vsel %vm704_vm6, %v5468_v43, %v5897_v6  ;;  %v717_v11 = vsel %vm716_vm9, %v5506_v61, %v5901_v54  ;;  %2244 = vrot.lane.b32.xlu0 %v2190_v63, %s4815_s5  ;;  %v3726_v31 = vld [vmem:[%s5101_s16 + $0xe4] sm:$0xf0] }
 0x14a   : > { %4540 = vrcp.f32 %v6059_v22  ;;  %v1102_v42 = vmul.f32 %v6088_v53, %v5253_v55  ;;  %v1155_v29 = vmul.f32 %v5629_v17, %v1085_v4  ;;  %v719_v0 = vand.u32 2147483648, %v5506_v61  ;;  %v2193_v61 = vld [vmem:[%s5961_s3 + $0x40] sm:$0xff] }
 0x14b   : > { %1710 = vmatmul.bf16.gmra.mxu2 %v6083_v3  ;;  %v3821_v6 = vor.u32 %v3990_v16, %v3820_v8  ;;  %v3633_v19 = vor.u32 %v3941_v9, %v3630_v46  ;;  %v876_v40 = vand.u32 2147483647, %v6052_v52  ;;  %v3753_v35 = vor.u32 %v3971_v33, %v3750_v47  ;;  %v2185_v47 = vld [vmem:[%s5961_s3] sm:$0xff] }
 0x14c   : > { %v1158_v55 = vmul.f32 %v5629_v17, %v1102_v42  ;;  %v3761_v24 = vor.u32 %v3975_v12, %v3760_v39  ;;  %v878_v54 = vand.u32 2147483648, %v6052_v52  ;;  %v3809_v37 = vor.u32 %v3987_v32, %v3808_v25  ;;  %v3965_v4 = vld [vmem:[%s5101_s16 + $0xdc] sm:$0xf]  ;;  %2234 = vrot.lane.b32.xlu1 %v2185_v47, %s4815_s5  ;;  %v3712_v47 = vld [vmem:[%s5101_s16 + $0xc0] sm:$0xf] }
 0x14d   : > { %1781 = vmatpush.bf16.msrb.mxu2 %v3821_v6  ;;  %1830 = vmatpush.bf16.msrb.mxu3 %v3633_v19  ;;  %v3621_v7 = vor.u32 %v3938_v34, %v3618_v38  ;;  %v3741_v59 = vor.u32 %v3968_v27, %v3738_v49  ;;  %v893_v30 = vand.u32 2147483647, %v6059_v22  ;;  %v8366_v44 = vand.u32 2147483648, %v5468_v43  ;;  %v3736_v34 = vld [vmem:[%s5101_s16 + $0xf0] sm:$0xf] }
 0x14e   : > { %v6116_v13 = vpop.eup %4538  ;;  %v6119_v21 = vpack.c.bf16 %v1158_v55, %v1155_v29  ;;  %1877 = vmatpush.bf16.msrb.mxu0 %v3753_v35  ;;  %1729 = vmatpush.bf16.msrb.mxu1 %v3761_v24  ;;  %v895_v8 = vand.u32 2147483648, %v6059_v22  ;;  %v720_v16 = vsel %vm718_vm15, %v719_v0, %v717_v11  ;;  %v3749_v46 = vor.u32 %v3972_v20, %v3748_v51  ;;  %v3969_v38 = vld [vmem:[%s5101_s16 + $0xf8] sm:$0xf0]  ;;  %v8371_v49 = vld [vmem:[#allocation38_spill] sm:$0xff]  ;;  %v3962_v11 = vld [vmem:[%s5101_s16 + $0xc4] sm:$0xf] }
 0x14f   : > { %v868_v14 = vmul.f32 %v6116_v13, %v6052_v52  ;;  %v708_v18 = vsel %vm706_vm11, %v8366_v44, %v705_v1  ;;  %v6138_v43 = vadd.f32 1e-05, %v720_v16  ;;  %v6141_v33 = vperm.slane %v5611_v62, 2  ;;  %v3714_v0 = vld [vmem:[%s5101_s16 + $0xcc] sm:$0xf0] }
 0x150   : > { %v6128_v50 = vpop.eup %4540  ;;  %v6133_v9 = vadd.f32 1e-05, %v708_v18  ;;  %1720 = vmatmul.bf16.gmra.mxu3 %v6119_v21  ;;  %vm872_vm0 = vweird.f32 %v6052_v52  ;;  %vm873_vm1 = vweird.f32 %v6116_v13  ;;  %v6151_v39 = vperm.slane %v5611_v62, 1  ;;  %v3966_v35 = vld [vmem:[%s5101_s16 + $0xe0] sm:$0xf0] }
 0x151   : > { %v869_v57 = vsub.f32 1.0, %v868_v14  ;;  %v885_v26 = vmul.f32 %v6128_v50, %v6059_v22  ;;  %1782 = vmatpush.bf16.msrb.mxu2 %v3809_v37  ;;  %1831 = vmatpush.bf16.msrb.mxu3 %v3621_v7  ;;  %v849_v32 = vmul.f32 %v5666_v15, %v5144_v23  ;;  %vm6159_vm2 = vcmp.eq.f32.partialorder %v876_v40, 8.507059e+37  ;;  %vm874_vm5 = vmor %vm872_vm0, %vm873_vm1  ;;  %v3724_v40 = vld [vmem:[%s5101_s16 + $0xd8] sm:$0xf]  ;;  %v8372_v7 = vld [vmem:[#allocation32_spill] sm:$0xff] }
 0x152   : > { %4542 = vrcp.f32 %v6133_v9  ;;  %1878 = vmatpush.bf16.msrb.mxu0 %v3741_v59  ;;  %1730 = vmatpush.bf16.msrb.mxu1 %v3749_v46  ;;  %v879_v62 = vor.u32 1.1754944e-38, %v878_v54  ;;  %vm6163_vm3 = vcmp.eq.f32.partialorder %v893_v30, 8.507059e+37  ;;  %v896_v29 = vor.u32 1.1754944e-38, %v895_v8  ;;  %v8373_v30 = vld [vmem:[#allocation53_spill] sm:$0xff] }
 0x153   : > { %v870_v12 = vmul.f32 %v6116_v13, %v869_v57  ;;  %v886_v25 = vsub.f32 1.0, %v885_v26  ;;  %4544 = vrcp.f32 %v6138_v43  ;;  %2250 = vrot.lane.b32.xlu0 %v2193_v61, %s4815_s5  ;;  %vm890_vm4 = vweird.f32 %v6128_v50  ;;  %v8374_v61 = vld [vmem:[#allocation51_spill] sm:$0xff]  ;;  %v4007_v42 = vld [vmem:[%s5101_s16 + $0x22c] sm:$0xf] }
 0x154   : > { %v866_v63 = vmul.f32 %v5693_v10, %v8371_v49  ;;  %vm889_vm6 = vweird.f32 %v6059_v22  ;;  %v944_v6 = vand.u32 2147483647, %v6133_v9  ;;  %v3729_v19 = vor.u32 %v3965_v4, %v3726_v31 }
 0x155   : > { %v871_v23 = vadd.f32 %v6116_v13, %v870_v12  ;;  %v887_v27 = vmul.f32 %v6128_v50, %v886_v25  ;;  %v3737_v55 = vor.u32 %v3969_v38, %v3736_v34  ;;  %v1115_v20 = vmul.f32 %v6141_v33, %v849_v32  ;;  %vm891_vm7 = vmor %vm889_vm6, %vm890_vm4  ;;  %v8375_v12 = vld [vmem:[#allocation37_spill] sm:$0xff]  ;;  %v2189_v34 = vld [vmem:[%s5961_s3 + $0x20] sm:$0xff] }
 0x156   : > { %v1118_v54 = vmul.f32 %v6141_v33, %v866_v63  ;;  %v946_v22 = vand.u32 2147483648, %v6133_v9  ;;  %1879 = vmatpush.bf16.msrb.mxu0 %v3729_v19  ;;  %v848_v59 = vmul.f32 %v5666_v15, %v8372_v7  ;;  %v3725_v16 = vor.u32 %v3966_v35, %v3724_v40  ;;  %v3963_v32 = vld [vmem:[%s5101_s16 + $0xc8] sm:$0xf0]  ;;  %v2196_v38 = vld [vmem:[%s5961_s3 + $0x58] sm:$0xff]  ;;  %v3708_v63 = vld [vmem:[%s5101_s16 + $0xb0] sm:$0xf]  ;;  %2242 = vrot.lane.b32.xlu1 %v2189_v34, %s4815_s5 }
 0x157   : > { %v875_v24 = vsel %vm874_vm5, %v6116_v13, %v871_v23  ;;  %v888_v51 = vadd.f32 %v6128_v50, %v887_v27  ;;  %1731 = vmatpush.bf16.msrb.mxu1 %v3737_v55  ;;  %v3717_v13 = vor.u32 %v3962_v11, %v3714_v0  ;;  %v963_v57 = vand.u32 2147483648, %v6138_v43  ;;  %v2186_v23 = vld [vmem:[%s5961_s3 + $0x8] sm:$0xff]  ;;  %v3961_v11 = vld [vmem:[%s5101_s16 + $0xb8] sm:$0xf0] }
 0x158   : > { %v6188_v37 = vpop.eup %4542  ;;  %v6192_v52 = vsel %vm6159_vm2, %v879_v62, %v875_v24  ;;  %v6213_v26 = vpack.c.bf16 %v1118_v54, %v1115_v20  ;;  %v865_v25 = vmul.f32 %v5693_v10, %v8375_v12  ;;  %vm940_vm8 = vweird.f32 %v6133_v9  ;;  %2236 = vrot.lane.b32.xlu2 %v2186_v23, %s4815_s5  ;;  %v8380_v12 = vld [vmem:[#allocation41_spill] sm:$0xff]  ;;  %v8381_v34 = vld [vmem:[#allocation39_spill] sm:$0xff] }
 0x159   : > { %v6199_v14 = vpop.eup %4544  ;;  %v881_v44 = vmul.f32 %v6192_v52, %v8373_v30  ;;  %v892_v18 = vsel %vm891_vm7, %v6128_v50, %v888_v51  ;;  %v936_v8 = vmul.f32 %v6188_v37, %v6133_v9  ;;  %vm957_vm9 = vweird.f32 %v6138_v43  ;;  %v8376_v9 = vld [vmem:[#allocation58_spill] sm:$0xff] }
 0x15a   : > { %v6208_v46 = vsel %vm6163_vm3, %v896_v29, %v892_v18  ;;  %v953_v15 = vmul.f32 %v6199_v14, %v6138_v43  ;;  %1880 = vmatpush.bf16.msrb.mxu0 %v3717_v13  ;;  %v1114_v62 = vmul.f32 %v6151_v39, %v848_v59  ;;  %v3894_v29 = vld [vmem:[%s5101_s16 + $0x234] sm:$0xf0]  ;;  %vm941_vm10 = vweird.f32 %v6188_v37  ;;  %v3985_v18 = vld [vmem:[%s5101_s16 + $0x178] sm:$0xf0] }
 0x15b   : > { %v898_v50 = vmul.f32 %v6208_v46, %v8374_v61  ;;  %v1119_v4 = vmul.f32 %v5629_v17, %v881_v44  ;;  %v937_v31 = vsub.f32 1.0, %v936_v8  ;;  %1783 = vmatmul.bf16.vlgmr.msrb.gmra.mxu2 %v6213_v26  ;;  %1732 = vmatpush.bf16.msrb.mxu1 %v3725_v16  ;;  %v1117_v49 = vmul.f32 %v6151_v39, %v865_v25  ;;  %vm942_vm13 = vmor %vm940_vm8, %vm941_vm10  ;;  %v3804_v44 = vld [vmem:[%s5101_s16 + $0x170] sm:$0xf] }
 0x15c   : > { %v954_v1 = vsub.f32 1.0, %v953_v15  ;;  %vm958_vm11 = vweird.f32 %v6199_v14  ;;  %v961_v19 = vand.u32 2147483647, %v6138_v43  ;;  %v3713_v55 = vor.u32 %v3963_v32, %v3712_v47  ;;  %2256 = vrot.lane.b32.xlu0 %v2196_v38, %s4815_s5  ;;  %v8378_v43 = vld [vmem:[#allocation55_spill] sm:$0xff]  ;;  %v2199_v61 = vld [vmem:[%s5961_s3 + $0x70] sm:$0xff] }
 0x15d   : > { %v1122_v10 = vmul.f32 %v5629_v17, %v898_v50  ;;  %v938_v27 = vmul.f32 %v6188_v37, %v937_v31  ;;  %v6245_v24 = vpack.c.bf16 %v1117_v49, %v1114_v62  ;;  %v3897_v51 = vor.u32 %v4007_v42, %v3894_v29  ;;  %vm959_vm12 = vmor %vm957_vm9, %vm958_vm11  ;;  %v2192_v47 = vld [vmem:[%s5961_s3 + $0x38] sm:$0xff]  ;;  %v8379_v50 = vld [vmem:[#allocation60_spill] sm:$0xff] }
 0x15e   : > { %v955_v0 = vmul.f32 %v6199_v14, %v954_v1  ;;  %vm945_vm14 = vcmp.eq.f32.partialorder %v944_v6, 8.507059e+37  ;;  %v947_v20 = vor.u32 1.1754944e-38, %v946_v22  ;;  %v3709_v13 = vor.u32 %v3961_v11, %v3708_v63  ;;  %v8377_v22 = vld [vmem:[#allocation57_spill] sm:$0xff]  ;;  %v2188_v31 = vld [vmem:[%s5961_s3 + $0x18] sm:$0xff]  ;;  %2248 = vrot.lane.b32.xlu1 %v2192_v47, %s4815_s5  ;;  %v3882_v49 = vld [vmem:[%s5101_s16 + $0x21c] sm:$0xf0] }
 0x15f   : > { %v6242_v40 = vpack.c.bf16 %v1122_v10, %v1119_v4  ;;  %v939_v35 = vadd.f32 %v6188_v37, %v938_v27  ;;  %v964_v59 = vor.u32 1.1754944e-38, %v963_v57  ;;  %v883_v6 = vmul.f32 %v6192_v52, %v8376_v9  ;;  %1733 = vmatpush.bf16.msrb.mxu1 %v3713_v55  ;;  %v4004_v27 = vld [vmem:[%s5101_s16 + $0x214] sm:$0xf]  ;;  %v3900_v63 = vld [vmem:[%s5101_s16 + $0x230] sm:$0xf]  ;;  %v2169_v55 = vld [vmem:[%s6298_s4] sm:$0xff] }
 0x160   : > { %v956_v54 = vadd.f32 %v6199_v14, %v955_v0  ;;  %1832 = vmatmul.bf16.vlgmr.msrb.gmra.mxu3 %v5717_v5  ;;  %v900_v30 = vmul.f32 %v6208_v46, %v8377_v22  ;;  %vm962_vm15 = vcmp.eq.f32.partialorder %v961_v19, 8.507059e+37  ;;  %1971 = vmatpush.bf16.msra.mxu2 %v3709_v13  ;;  %v3805_v57 = vor.u32 %v3985_v18, %v3804_v44  ;;  %v4009_v0 = vld [vmem:[%s5101_s16 + $0x238] sm:$0xf0]  ;;  %v2195_v19 = vld [vmem:[%s5961_s3 + $0x50] sm:$0xff]  ;;  %v3696_v13 = vld [vmem:[%s5101_s16 + $0x98] sm:$0xf] }
 0x161   : > { %1690 = vmatmul.bf16.gmra.mxu0 %v6242_v40  ;;  %v943_v7 = vsel %vm942_vm13, %v6188_v37, %v939_v35  ;;  %v1121_v25 = vmul.f32 %v6141_v33, %v883_v6  ;;  %v933_v38 = vmul.f32 %v5903_v2, %v8381_v34  ;;  %2240 = vrot.lane.b32.xlu2 %v2188_v31, %s4815_s5  ;;  %v8383_v35 = vld [vmem:[#allocation44_spill] sm:$0xff]  ;;  %v8385_v22 = vld [vmem:[#allocation49_spill] sm:$0xff]  ;;  %vm2618_vm0 = vcmask 523264  }
 0x162   : > { %v6266_v37 = vsel %vm945_vm14, %v947_v20, %v943_v7  ;;  %v960_v8 = vsel %vm959_vm12, %v6199_v14, %v956_v54  ;;  %v916_v14 = vmul.f32 %v5881_v28, %v8380_v12  ;;  %v1124_v32 = vmul.f32 %v6141_v33, %v900_v30  ;;  %2020 = vmatpush.bf16.msra.mxu3 %v3805_v57  ;;  %v2191_v54 = vld [vmem:[%s5961_s3 + $0x30] sm:$0xff]  ;;  %v3958_v7 = vld [vmem:[%s5101_s16 + $0xa0] sm:$0xf0] }
 0x163   : > { %v949_v16 = vmul.f32 %v6266_v37, %v8378_v43  ;;  %v6271_v15 = vsel %vm962_vm15, %v964_v59, %v960_v8  ;;  %1922 = vmatpush.bf16.msra.mxu1 %v3897_v51  ;;  %v1129_v29 = vmul.f32 %v6151_v39, %v933_v38  ;;  %v3885_v11 = vor.u32 %v4004_v27, %v3882_v49  ;;  %v8384_v59 = vld [vmem:[#allocation42_spill] sm:$0xff]  ;;  %v8386_v18 = vld [vmem:[#allocation40_spill] sm:$0xff]  ;;  %v8387_v43 = vld [vmem:[#allocation43_spill] sm:$0xff] }
 0x164   : > { %v966_v4 = vmul.f32 %v6271_v15, %v8379_v50  ;;  %2262 = vrot.lane.b32.xlu0 %v2199_v61, %s4815_s5  ;;  %v1126_v42 = vmul.f32 %v6151_v39, %v916_v14  ;;  %v6303_v10 = vpack.c.bf16 %v1124_v32, %v1121_v25  ;;  %v1019_v51 = vmul.f32 %v6019_v36, %v8383_v35  ;;  %v8388_v57 = vld [vmem:[#allocation46_spill] sm:$0xff]  ;;  %v8389_v61 = vld [vmem:[#allocation29_spill] sm:$0xff]  ;;  %v8391_v12 = vld [vmem:[#allocation28_spill] sm:$0xff] }
 0x165   : > { %v1131_v1 = vmul.f32 %v5629_v17, %v949_v16  ;;  %v3901_v20 = vor.u32 %v4009_v0, %v3900_v63  ;;  %v917_v9 = vmul.f32 %v5881_v28, %v8384_v59  ;;  %v3697_v6 = vor.u32 %v3958_v7, %v3696_v13  ;;  %v8390_v50 = vld [vmem:[#allocation34_spill] sm:$0xff]  ;;  %v8392_v14 = vld [vmem:[#allocation33_spill] sm:$0xff]  ;;  %v3792_v32 = vld [vmem:[%s5101_s16 + $0x158] sm:$0xf] }
 0x166   : > { %v1134_v62 = vmul.f32 %v5629_v17, %v966_v4  ;;  %v6300_v17 = vpack.c.bf16 %v1129_v29, %v1126_v42  ;;  %v1036_v30 = vmul.f32 %v6032_v45, %v8385_v22  ;;  %v1145_v44 = vmul.f32 %v6141_v33, %v1019_v51  ;;  %2254 = vrot.lane.b32.xlu1 %v2195_v19, %s4815_s5  ;;  %v3982_v34 = vld [vmem:[%s5101_s16 + $0x160] sm:$0xf0]  ;;  %v8393_v63 = vld [vmem:[#allocation47_spill] sm:$0xff]  ;;  %v8394_v0 = vld [vmem:[#allocation50_spill] sm:$0xff] }
 0x167   : > { %1923 = vmatpush.bf16.msra.mxu1 %v3885_v11  ;;  %v934_v8 = vmul.f32 %v5903_v2, %v8386_v18  ;;  %2069 = vmatpush.bf16.msra.mxu0 %v3901_v20  ;;  %v1018_v16 = vmul.f32 %v6019_v36, %v8387_v43  ;;  %v1035_v28 = vmul.f32 %v6032_v45, %v8388_v57  ;;  %v2198_v27 = vld [vmem:[%s5961_s3 + $0x68] sm:$0xff]  ;;  %v4001_v57 = vld [vmem:[%s5101_s16 + $0x1fc] sm:$0xf] }
 0x168   : > { %v6291_v23 = vpack.c.bf16 %v1134_v62, %v1131_v1  ;;  %v1148_v47 = vmul.f32 %v6141_v33, %v1036_v30  ;;  %v1053_v2 = vmul.f32 %v5817_v41, %v8389_v61  ;;  %v1070_v4 = vmul.f32 %v5832_v56, %v8390_v50  ;;  %1972 = vmatpush.bf16.msra.mxu2 %v3697_v6  ;;  %v2194_v51 = vld [vmem:[%s5961_s3 + $0x48] sm:$0xff]  ;;  %v2171_v50 = vld [vmem:[%s6298_s4 + $0x10] sm:$0xff] }
 0x169   : > { %2246 = vrot.lane.b32.xlu2 %v2191_v54, %s4815_s5  ;;  %v1144_v31 = vmul.f32 %v6151_v39, %v1018_v16  ;;  %v1147_v36 = vmul.f32 %v6151_v39, %v1035_v28  ;;  %v1052_v45 = vmul.f32 %v5817_v41, %v8391_v12  ;;  %v1069_v25 = vmul.f32 %v5832_v56, %v8392_v14  ;;  %v8396_v54 = vld [vmem:[#allocation48_spill] sm:$0xff]  ;;  %v3870_v28 = vld [vmem:[%s5101_s16 + $0x204] sm:$0xf0]  ;;  %v3955_v12 = vld [vmem:[%s5101_s16 + $0x88] sm:$0xf0] }
 0x16a   : > { %1700 = vmatmul.bf16.gmra.mxu1 %v6291_v23  ;;  %v6346_v38 = vpack.c.bf16 %v1148_v47, %v1145_v44  ;;  %v1151_v1 = vmul.f32 %v6141_v33, %v1053_v2  ;;  %v1154_v62 = vmul.f32 %v6141_v33, %v1070_v4  ;;  %v3793_v42 = vor.u32 %v3982_v34, %v3792_v32  ;;  %v8397_v44 = vld [vmem:[#allocation54_spill] sm:$0xff]  ;;  %v8398_v18 = vld [vmem:[#allocation52_spill] sm:$0xff]  ;;  %v3888_v47 = vld [vmem:[%s5101_s16 + $0x218] sm:$0xf] }
 0x16b   : > { %1788 = vmatmul.bf16.gmra.mxu2 %v6303_v10  ;;  %v6350_v29 = vpack.c.bf16 %v1147_v36, %v1144_v31  ;;  %v1150_v41 = vmul.f32 %v6151_v39, %v1052_v45  ;;  %v1153_v56 = vmul.f32 %v6151_v39, %v1069_v25  ;;  %v1087_v11 = vmul.f32 %v6070_v48, %v8393_v63  ;;  %v4006_v2 = vld [vmem:[%s5101_s16 + $0x220] sm:$0xf0]  ;;  %v2197_v31 = vld [vmem:[%s5961_s3 + $0x60] sm:$0xff]  ;;  %v3979_v32 = vld [vmem:[%s5101_s16 + $0x148] sm:$0xf0] }
 0x16c   : > { %2410 = vrot.lane.b32.xlu0 %v2169_v55, %s4815_s5  ;;  %v6355_v49 = vpack.c.bf16 %v1154_v62, %v1151_v1  ;;  %v1104_v19 = vmul.f32 %v6088_v53, %v8394_v0  ;;  %v8395_v55 = vld [vmem:[#allocation45_spill] sm:$0xff]  ;;  %2021 = vmatpush.bf16.msra.mxu3 %v3793_v42  ;;  %v1103_v13 = vmul.f32 %v6088_v53, %v8396_v54  ;;  %v3684_v36 = vld [vmem:[%s5101_s16 + $0x80] sm:$0xf]  ;;  %v2172_v34 = vld [vmem:[%s6298_s4 + $0x18] sm:$0xff] }
 0x16d   : > { %v1086_v35 = vmul.f32 %v6070_v48, %v8395_v55  ;;  %v6364_v20 = vpack.c.bf16 %v1153_v56, %v1150_v41  ;;  %v1157_v7 = vmul.f32 %v6141_v33, %v1087_v11  ;;  %v1127_v22 = vmul.f32 %v6141_v33, %v917_v9  ;;  %v3780_v25 = vld [vmem:[%s5101_s16 + $0x140] sm:$0xf]  ;;  %v8400_v1 = vld [vmem:[#allocation62_spill] sm:$0xff]  ;;  %v8401_v41 = vld [vmem:[#allocation59_spill] sm:$0xff] }
 0x16e   : > { %v1160_v59 = vmul.f32 %v6141_v33, %v1104_v19  ;;  %v1130_v48 = vmul.f32 %v6141_v33, %v934_v8  ;;  %2260 = vrot.lane.b32.xlu1 %v2198_v27, %s4815_s5  ;;  %v1159_v30 = vmul.f32 %v6151_v39, %v1103_v13  ;;  %v882_v53 = vmul.f32 %v6192_v52, %v8397_v44  ;;  %v2200_v27 = vld [vmem:[%s5961_s3 + $0x78] sm:$0xff]  ;;  %v3998_v19 = vld [vmem:[%s5101_s16 + $0x1e4] sm:$0xf]  ;;  %v3858_v55 = vld [vmem:[%s5101_s16 + $0x1ec] sm:$0xf0] }
 0x16f   : > { %v1156_v6 = vmul.f32 %v6151_v39, %v1086_v35  ;;  %v899_v43 = vmul.f32 %v6208_v46, %v8398_v18  ;;  %v3873_v61 = vor.u32 %v4001_v57, %v3870_v28  ;;  %v3889_v4 = vor.u32 %v4006_v2, %v3888_v47  ;;  %v3876_v35 = vld [vmem:[%s5101_s16 + $0x200] sm:$0xf]  ;;  %v4003_v54 = vld [vmem:[%s5101_s16 + $0x208] sm:$0xf0]  ;;  %v3672_v13 = vld [vmem:[%s5101_s16 + $0x68] sm:$0xf] }
 0x170   : > { %1837 = vmatmul.bf16.gmra.mxu3 %v6242_v40  ;;  %v6380_v16 = vpack.c.bf16 %v1160_v59, %v1157_v7  ;;  %v6385_v8 = vpack.c.bf16 %v1130_v48, %v1127_v22  ;;  %v1120_v52 = vmul.f32 %v6151_v39, %v882_v53  ;;  %v3685_v45 = vor.u32 %v3955_v12, %v3684_v36  ;;  %v2170_v59 = vld [vmem:[%s6298_s4 + $0x8] sm:$0xff]  ;;  %v8404_v28 = vld [vmem:[#allocation31_spill] sm:$0xff]  ;;  %v3995_v12 = vld [vmem:[%s5101_s16 + $0x1cc] sm:$0xf] }
 0x171   : > { %1881 = vmatmul.bf16.vlgmr.msrb.gmra.mxu0 %v6245_v24  ;;  %2252 = vrot.lane.b32.xlu2 %v2194_v51, %s4815_s5  ;;  %v6382_v9 = vpack.c.bf16 %v1159_v30, %v1156_v6  ;;  %v1123_v46 = vmul.f32 %v6151_v39, %v899_v43  ;;  %v968_v62 = vmul.f32 %v6271_v15, %v8400_v1  ;;  %v3952_v6 = vld [vmem:[%s5101_s16 + $0x70] sm:$0xf0]  ;;  %v3768_v48 = vld [vmem:[%s5101_s16 + $0x128] sm:$0xf]  ;;  %v8402_v53 = vld [vmem:[#allocation36_spill] sm:$0xff] }
 0x172   : > { %8399 = vst [vmem:[#allocation38_spill] sm:$0xff] %v6380_v16  ;;  %1924 = vmatpush.bf16.msra.mxu1 %v3873_v61  ;;  %2070 = vmatpush.bf16.msra.mxu0 %v3889_v4  ;;  %v3781_v42 = vor.u32 %v3979_v32, %v3780_v25  ;;  %v951_v56 = vmul.f32 %v6266_v37, %v8401_v41  ;;  %v3976_v30 = vld [vmem:[%s5101_s16 + $0x130] sm:$0xf0]  ;;  %v2174_v44 = vld [vmem:[%s6298_s4 + $0x28] sm:$0xff]  ;;  %v8405_v47 = vld [vmem:[#allocation63_spill] sm:$0xff] }
 0x173   : > { %v6399_v14 = vpack.c.bf16 %v1123_v46, %v1120_v52  ;;  %1973 = vmatpush.bf16.msra.mxu2 %v3685_v45  ;;  %v1136_v63 = vmul.f32 %v6141_v33, %v968_v62  ;;  %v3861_v51 = vor.u32 %v3998_v19, %v3858_v55  ;;  %v3877_v7 = vor.u32 %v4003_v54, %v3876_v35  ;;  %v8403_v18 = vld [vmem:[#allocation64_spill] sm:$0xff]  ;;  %v8406_v61 = vld [vmem:[#allocation61_spill] sm:$0xff]  ;;  %v3846_v45 = vld [vmem:[%s5101_s16 + $0x1d4] sm:$0xf0] }
 0x174   : > { %2416 = vrot.lane.b32.xlu0 %v2172_v34, %s4815_s5  ;;  %2022 = vmatpush.bf16.msra.mxu3 %v3781_v42  ;;  %v1133_v11 = vmul.f32 %v6141_v33, %v951_v56  ;;  %v3673_v22 = vor.u32 %v3952_v6, %v3672_v13  ;;  %v1002_v43 = vmul.f32 %v8403_v18, %v8402_v53  ;;  %v8407_v4 = vld [vmem:[#allocation56_spill] sm:$0xff]  ;;  %v3864_v25 = vld [vmem:[%s5101_s16 + $0x1e8] sm:$0xf]  ;;  %v4000_v1 = vld [vmem:[%s5101_s16 + $0x1f0] sm:$0xf0] }
 0x175   : > { %v3769_v57 = vor.u32 %v3976_v30, %v3768_v48  ;;  %v985_v52 = vmul.f32 %v8405_v47, %v8404_v28  ;;  %v967_v2 = vmul.f32 %v6271_v15, %v8406_v61  ;;  %v3849_v34 = vor.u32 %v3995_v12, %v3846_v45  ;;  %v2175_v15 = vld [vmem:[%s6298_s4 + $0x30] sm:$0xff]  ;;  %v8408_v55 = vld [vmem:[#allocation35_spill] sm:$0xff]  ;;  %v3992_v13 = vld [vmem:[%s5101_s16 + $0x1b4] sm:$0xf] }
 0x176   : > { %2414 = vrot.lane.b32.xlu1 %v2171_v50, %s4815_s5  ;;  %v6417_v0 = vpack.c.bf16 %v1136_v63, %v1133_v11  ;;  %1925 = vmatpush.bf16.msra.mxu1 %v3861_v51  ;;  %v1142_v46 = vmul.f32 %v6141_v33, %v1002_v43  ;;  %v3660_v62 = vld [vmem:[%s5101_s16 + $0x50] sm:$0xf]  ;;  %v3973_v63 = vld [vmem:[%s5101_s16 + $0x118] sm:$0xf0]  ;;  %v1001_v35 = vmul.f32 %v8403_v18, %v8408_v55  ;;  %v3946_v18 = vld [vmem:[%s5101_s16 + $0x40] sm:$0xf0] }
 0x177   : > { %2071 = vmatpush.bf16.msra.mxu0 %v3877_v7  ;;  %1974 = vmatpush.bf16.msra.mxu2 %v3673_v22  ;;  %v1139_v50 = vmul.f32 %v6141_v33, %v985_v52  ;;  %v1135_v32 = vmul.f32 %v6151_v39, %v967_v2  ;;  %v3865_v33 = vor.u32 %v4000_v1, %v3864_v25  ;;  %v2173_v11 = vld [vmem:[%s6298_s4 + $0x20] sm:$0xff]  ;;  %v8409_v51 = vld [vmem:[#allocation30_spill] sm:$0xff]  ;;  %v3970_v52 = vld [vmem:[%s5101_s16 + $0x100] sm:$0xf0] }
 0x178   : > { %2023 = vmatpush.bf16.msra.mxu3 %v3769_v57  ;;  %v984_v54 = vmul.f32 %v8405_v47, %v8409_v51  ;;  %v3834_v7 = vld [vmem:[%s5101_s16 + $0x1bc] sm:$0xf0]  ;;  %v1141_v6 = vmul.f32 %v6151_v39, %v1001_v35  ;;  %v3997_v48 = vld [vmem:[%s5101_s16 + $0x1d8] sm:$0xf0]  ;;  %v3744_v47 = vld [vmem:[%s5101_s16 + $0xf8] sm:$0xf] }
 0x179   : > { %2258 = vrot.lane.b32.xlu2 %v2197_v31, %s4815_s5  ;;  %v950_v31 = vmul.f32 %v6266_v37, %v8407_v4  ;;  %v6445_v36 = vpack.c.bf16 %v1142_v46, %v1139_v50  ;;  %v3949_v37 = vld [vmem:[%s5101_s16 + $0x58] sm:$0xf0]  ;;  %v3837_v22 = vor.u32 %v3992_v13, %v3834_v7  ;;  %v2178_v46 = vld [vmem:[%s6298_s4 + $0x48] sm:$0xff]  ;;  %v3745_v61 = vor.u32 %v3970_v52, %v3744_v47  ;;  %v3840_v50 = vld [vmem:[%s5101_s16 + $0x1b8] sm:$0xf] }
 0x17a   : > { %1734 = vmatmul.bf16.vlgmr.msrb.gmra.mxu1 %v6245_v24  ;;  %v3661_v41 = vor.u32 %v3949_v37, %v3660_v62  ;;  %v2177_v30 = vld [vmem:[%s6298_s4 + $0x40] sm:$0xff]  ;;  %v1138_v43 = vmul.f32 %v6151_v39, %v984_v54  ;;  %v3822_v2 = vld [vmem:[%s5101_s16 + $0x1a4] sm:$0xf0]  ;;  %v3994_v12 = vld [vmem:[%s5101_s16 + $0x1c0] sm:$0xf0] }
 0x17b   : > { %1793 = vmatmul.bf16.gmra.mxu2 %v6385_v8  ;;  %v1132_v42 = vmul.f32 %v6151_v39, %v950_v31  ;;  %1926 = vmatpush.bf16.msra.mxu1 %v3849_v34  ;;  %v3989_v39 = vld [vmem:[%s5101_s16 + $0x19c] sm:$0xf]  ;;  %v2176_v45 = vld [vmem:[%s6298_s4 + $0x38] sm:$0xff]  ;;  %v3841_v25 = vor.u32 %v3994_v12, %v3840_v50  ;;  %v3943_v34 = vld [vmem:[%s5101_s16 + $0x28] sm:$0xf0] }
 0x17c   : > { %2422 = vrot.lane.b32.xlu0 %v2175_v15, %s4815_s5  ;;  %2072 = vmatpush.bf16.msra.mxu0 %v3865_v33  ;;  %v6482_v28 = vpack.c.bf16 %v1141_v6, %v1138_v43  ;;  %v3825_v31 = vor.u32 %v3989_v39, %v3822_v2  ;;  %v8410_v62 = vld [vmem:[#allocation65_spill] sm:$0xff]  ;;  %v3732_v33 = vld [vmem:[%s5101_s16 + $0xe0] sm:$0xf]  ;;  %v3940_v55 = vld [vmem:[%s5101_s16 + $0x10] sm:$0xf0] }
 0x17d   : > { %v6458_v56 = vpack.c.bf16 %v1135_v32, %v1132_v42  ;;  %1975 = vmatpush.bf16.msra.mxu2 %v3661_v41  ;;  %v3636_v32 = vld [vmem:[%s5101_s16 + $0x20] sm:$0xf]  ;;  %v3967_v37 = vld [vmem:[%s5101_s16 + $0xe8] sm:$0xf0]  ;;  %v2180_v42 = vld [vmem:[%s6298_s4 + $0x58] sm:$0xff] }
 0x17e   : > { %2420 = vrot.lane.b32.xlu1 %v2174_v44, %s4815_s5  ;;  %v3648_v44 = vld [vmem:[%s5101_s16 + $0x38] sm:$0xf]  ;;  %v3637_v15 = vor.u32 %v3943_v34, %v3636_v32  ;;  %v3733_v41 = vor.u32 %v3967_v37, %v3732_v33  ;;  %v3720_v35 = vld [vmem:[%s5101_s16 + $0xc8] sm:$0xf]  ;;  %v3964_v54 = vld [vmem:[%s5101_s16 + $0xd0] sm:$0xf0] }
 0x17f   : > { %1927 = vmatpush.bf16.msra.mxu1 %v3837_v22  ;;  %v3649_v57 = vor.u32 %v3946_v18, %v3648_v44  ;;  %v3721_v7 = vor.u32 %v3964_v54, %v3720_v35  ;;  %v3810_v6 = vld [vmem:[%s5101_s16 + $0x18c] sm:$0xf0]  ;;  %v3828_v22 = vld [vmem:[%s5101_s16 + $0x1a0] sm:$0xf]  ;;  %v3816_v47 = vld [vmem:[%s5101_s16 + $0x188] sm:$0xf] }
 0x180   : > { %1842 = vmatmul.bf16.gmra.mxu3 %v5952_v60  ;;  %v2181_v44 = vld [vmem:[%s6298_s4 + $0x60] sm:$0xff]  ;;  %v3988_v52 = vld [vmem:[%s5101_s16 + $0x190] sm:$0xf0]  ;;  %v2182_v33 = vld [vmem:[%s6298_s4 + $0x68] sm:$0xff] }
 0x181   : > { %1886 = vmatmul.bf16.gmra.mxu0 %v6399_v14  ;;  %2264 = vrot.lane.b32.xlu2 %v2200_v27, %s4815_s5  ;;  %v3756_v27 = vld [vmem:[%s5101_s16 + $0x110] sm:$0xf]  ;;  %v1281_v37 = vld [vmem:[%s403_s21] sm:$0x7] }
 0x182   : > { %v3757_v19 = vor.u32 %v3973_v63, %v3756_v27  ;;  %1976 = vmatpush.bf16.msra.mxu2 %v3649_v57 }
 0x183   : > { %1928 = vmatpush.bf16.msra.mxu1 %v3825_v31 }
 0x184   : > { %2024 = vmatpush.bf16.msra.mxu3 %v3757_v19  ;;  %2428 = vrot.lane.b32.xlu0 %v2178_v46, %s4815_s5  ;;  %v3624_v19 = vld [vmem:[%s5101_s16 + $0x8] sm:$0xf]  ;;  %v2179_v46 = vld [vmem:[%s6298_s4 + $0x50] sm:$0xff] }
 0x185   : > { %v3625_v51 = vor.u32 %v3940_v55, %v3624_v19  ;;  %v6575_v55 = vunpack.c.l.bf16 %v1281_v37 }
 0x186   : > { %2426 = vrot.lane.b32.xlu1 %v2177_v30, %s4815_s5  ;;  %1977 = vmatpush.bf16.msra.mxu2 %v3637_v15  ;;  %v3991_v30 = vld [vmem:[%s5101_s16 + $0x1a8] sm:$0xf0] }
 0x187   : > { %v3829_v18 = vor.u32 %v3991_v30, %v3828_v22  ;;  %v2183_v15 = vld [vmem:[%s6298_s4 + $0x70] sm:$0xff]  ;;  %8417 = vst [vmem:[#allocation58_spill] sm:$0xff] %v6575_v55  ;;  %v1285_v35 = vperm.slane %v6575_v55, 2 }
 0x188   : > { %2025 = vmatpush.bf16.msra.mxu3 %v3745_v61  ;;  %v3817_v61 = vor.u32 %v3988_v52, %v3816_v47  ;;  %v1284_v47 = vperm.slane %v6575_v55, 0 }
 0x189   : > { %2412 = vrot.lane.b32.xlu2 %v2170_v59, %s4815_s5  ;;  %v3852_v59 = vld [vmem:[%s5101_s16 + $0x1d0] sm:$0xf] }
 0x18a   : > { %1739 = vmatmul.bf16.gmra.mxu1 %v6399_v14  ;;  %v3853_v53 = vor.u32 %v3997_v48, %v3852_v59  ;;  %v3986_v59 = vld [vmem:[%s5101_s16 + $0x184] sm:$0xf]  ;;  %1978 = vmatpush.bf16.msra.mxu2 %v3625_v51  ;;  %s396_s16 = sand.u32 1, %s4754_s22  }
 0x18b   : > { %1798 = vmatmul.bf16.gmra.mxu2 %v6417_v0  ;;  %v3813_v48 = vor.u32 %v3986_v59, %v3810_v6  ;;  %s4184_s18 = smul.u32 192, %s396_s16  ;;  %s3393_s7 = scalar_lea.sflag [#allocation4], %s396_s16 }
 0x18c   : > { %2073 = vmatpush.bf16.msra.mxu0 %v3853_v53  ;;  %2026 = vmatpush.bf16.msra.mxu3 %v3733_v41 }
 0x18d   : > { %1929 = vmatpush.bf16.msra.mxu1 %v3813_v48  ;;  %2434 = vrot.lane.b32.xlu0 %v2181_v44, %s4815_s5  ;;  %v6592_v48 = vperm.slane %v1285_v35, 0  ;;  %v6611_v35 = vperm.slane %v1284_v47, 0  ;;  %s7310_s19 = scalar_lea.vmem [#allocation8], %s4184_s18 }
 0x18e   : > { %2432 = vrot.lane.b32.xlu1 %v2180_v42, %s4815_s5 }
 0x190   : > { %1847 = vmatmul.bf16.gmra.mxu3 %v6291_v23  ;;  %2074 = vmatpush.bf16.msra.mxu0 %v3841_v25 }
 0x191   : > { %1891 = vmatmul.bf16.gmra.mxu0 %v6300_v17  ;;  %2418 = vrot.lane.b32.xlu2 %v2173_v11, %s4815_s5 }
 0x192   : > { %2027 = vmatpush.bf16.msra.mxu3 %v3721_v7  ;;  %v2184_v7 = vld [vmem:[%s6298_s4 + $0x78] sm:$0xff] }
 0x194   : > { %2075 = vmatpush.bf16.msra.mxu0 %v3829_v18 }
 0x195   : > { %2440 = vrot.lane.b32.xlu0 %v2184_v7, %s4815_s5 }
 0x196   : > { %2438 = vrot.lane.b32.xlu1 %v2183_v15, %s4815_s5 }
 0x198   : > { %2076 = vmatpush.bf16.msra.mxu0 %v3817_v61 }
 0x199   : > { %2424 = vrot.lane.b32.xlu2 %v2176_v45, %s4815_s5 }
 0x19a   : > { %1744 = vmatmul.bf16.gmra.mxu1 %v6300_v17  ;;  %v6528_v53 = vpop.f32.mrf.mxu0 }
 0x19b   : > { %1803 = vmatmul.bf16.gmra.mxu2 %v6445_v36  ;;  %v1687_v7 = vadd.f32 %v6528_v53, %v6611_v35 }
 0x1a0   : > { %1852 = vmatmul.bf16.gmra.mxu3 %v5799_v58 }
 0x1a1   : > { %1896 = vmatmul.bf16.gmra.mxu0 %v6458_v56  ;;  %2430 = vrot.lane.b32.xlu2 %v2179_v46, %s4815_s5 }
 0x1a2   : > { %v6550_v31 = vpop.f32.mrf.mxu0 }
 0x1a9   : > { %2436 = vrot.lane.b32.xlu2 %v2182_v33, %s4815_s5 }
 0x1aa   : > { %1749 = vmatmul.bf16.gmra.mxu1 %v6458_v56 }
 0x1ab   : > { %1808 = vmatmul.bf16.gmra.mxu2 %v6346_v38 }
 0x1ac   : > { %v6494_v4 = vpop.f32.mrf.mxu2 }
 0x1b0   : > { %1857 = vmatmul.bf16.gmra.mxu3 %v6083_v3 }
 0x1b1   : > { %1901 = vmatmul.bf16.gmra.mxu0 %v6482_v28 }
 0x1b2   : > { %v6512_v63 = vpop.permute.xlu2 %2236 }
 0x1b3   : > { %8411 = vst [vmem:[#allocation32_spill] sm:$0xff] %v6512_v63  ;;  %v6514_v11 = vpop.permute.xlu0 %2238 }
 0x1b4   : > { %v6510_v27 = vpop.f32.mrf.mxu2 }
 0x1b6   : > { %v6502_v1 = vpop.f32.mrf.mxu3 }
 0x1ba   : > { %1754 = vmatmul.bf16.gmra.mxu1 %v6482_v28  ;;  %v6548_v50 = vpop.f32.mrf.mxu1 }
 0x1bb   : > { %1813 = vmatmul.bf16.gmra.mxu2 %v6355_v49  ;;  %v6535_v57 = vpop.permute.xlu2 %2240  ;;  %v6542_v39 = vpop.permute.xlu0 %2244 }
 0x1bc   : > { %8413 = vst [vmem:[#allocation53_spill] sm:$0xff] %v6542_v39 }
 0x1be   : > { %v6521_v13 = vpop.f32.mrf.mxu3  ;;  %v6554_v45 = vpop.permute.xlu1 %2234 }
 0x1c0   : > { %1862 = vmatmul.bf16.gmra.mxu3 %v8410_v62 }
 0x1c1   : > { %1906 = vmatmul.bf16.gmra.mxu0 %v6350_v29 }
 0x1c2   : > { %v6573_v41 = vpop.f32.mrf.mxu1 }
 0x1c3   : > { %v6557_v25 = vpop.permute.xlu2 %2246 }
 0x1c5   : > { %v6562_v32 = vpop.permute.xlu0 %2250 }
 0x1ca   : > { %1759 = vmatmul.bf16.gmra.mxu1 %v6350_v29 }
 0x1cb   : > { %1818 = vmatmul.bf16.gmra.mxu2 %v6380_v16  ;;  %v6582_v54 = vpop.permute.xlu2 %2252 }
 0x1ce   : > { %v6533_v43 = vpop.f32.mrf.mxu2  ;;  %v6588_v6 = vpop.permute.xlu0 %2256 }
 0x1cf   : > { %8418 = vst [vmem:[#allocation57_spill] sm:$0xff] %v6588_v6 }
 0x1d0   : > { %1867 = vmatmul.bf16.gmra.mxu3 %v6119_v21 }
 0x1d1   : > { %1911 = vmatmul.bf16.gmra.mxu0 %v6364_v20 }
 0x1d3   : > { %v6546_v2 = vpop.f32.mrf.mxu3  ;;  %v6600_v46 = vpop.permute.xlu2 %2258 }
 0x1d4   : > { %8414 = vst [vmem:[#allocation51_spill] sm:$0xff] %v6546_v2  ;;  %v6620_v2 = vstv %s2119_s29 }
 0x1d5   : > { %8420 = vst [vmem:[#allocation60_spill] sm:$0xff] %v6600_v46 }
 0x1d6   : > { %v6552_v12 = vpop.f32.mrf.mxu2  ;;  %v6607_v37 = vpop.permute.xlu0 %2262 }
 0x1d7   : > { %8422 = vst [vmem:[#allocation39_spill] sm:$0xff] %v6607_v37 }
 0x1da   : > { %1764 = vmatmul.bf16.gmra.mxu1 %v6364_v20 }
 0x1db   : > { %v6564_v34 = vpop.f32.mrf.mxu3  ;;  %1979 = vmatmul.bf16.vlgmr.msra.gmra.mxu2 %v5717_v5  ;;  %v6579_v5 = vpop.permute.xlu1 %2242 }
 0x1dc   : > { %8416 = vst [vmem:[#allocation37_spill] sm:$0xff] %v6564_v34 }
 0x1de   : > { %v6571_v42 = vpop.f32.mrf.mxu0  ;;  %v1784_v19 = vpop.f32.mrf.mxu2 }
 0x1e0   : > { %2028 = vmatmul.bf16.vlgmr.msra.gmra.mxu3 %v6245_v24 }
 0x1e1   : > { %1916 = vmatmul.bf16.gmra.mxu0 %v6382_v9 }
 0x1e3   : > { %v1833_v51 = vpop.f32.mrf.mxu3  ;;  %v6596_v44 = vpop.permute.xlu1 %2248 }
 0x1e4   : > { %v1834_v30 = vadd.f32 %v1833_v51, %v6592_v48  ;;  %8419 = vst [vmem:[#allocation55_spill] sm:$0xff] %v6596_v44 }
 0x1e6   : > { %v6586_v59 = vpop.f32.mrf.mxu0  ;;  %v1786_v24 = vpop.f32.mrf.mxu2 }
 0x1e7   : > { %v6590_v22 = vpop.f32.mrf.mxu1 }
 0x1ea   : > { %1769 = vmatmul.bf16.gmra.mxu1 %v6382_v9 }
 0x1eb   : > { %v1835_v18 = vpop.f32.mrf.mxu3  ;;  %1984 = vmatmul.bf16.gmra.mxu2 %v6242_v40 }
 0x1ec   : > { %v1836_v40 = vadd.f32 %v1835_v18, %v6592_v48  ;;  %v6625_v18 = vpop.permute.xlu0 %2410 }
 0x1ee   : > { %v1882_v52 = vpop.f32.mrf.mxu0  ;;  %v1789_v33 = vpop.f32.mrf.mxu2 }
 0x1ef   : > { %v6602_v61 = vpop.f32.mrf.mxu1  ;;  %v6604_v15 = vadd.f32 %v1882_v52, %v1834_v30  ;;  %v6616_v30 = vpop.permute.xlu1 %2254 }
 0x1f0   : > { %2033 = vmatmul.bf16.gmra.mxu3 %v6399_v14  ;;  %v6622_v14 = vpop.permute.xlu2 %2264 }
 0x1f1   : > { %8421 = vst [vmem:[#allocation41_spill] sm:$0xff] %v6604_v15  ;;  %2077 = vmatmul.bf16.vlgmr.msra.gmra.mxu0 %v6213_v26 }
 0x1f2   : > { %8424 = vst [vmem:[#allocation42_spill] sm:$0xff] %v6622_v14 }
 0x1f3   : > { %v1838_v51 = vpop.f32.mrf.mxu3 }
 0x1f4   : > { %v1839_v16 = vadd.f32 %v1838_v51, %v6592_v48 }
 0x1f6   : > { %v1884_v55 = vpop.f32.mrf.mxu0  ;;  %v1791_v34 = vpop.f32.mrf.mxu2 }
 0x1f7   : > { %v1735_v52 = vpop.f32.mrf.mxu1  ;;  %v6618_v15 = vadd.f32 %v1884_v55, %v1836_v40  ;;  %v1689_v55 = vadd.f32 %v6550_v31, %v6611_v35 }
 0x1f8   : > { %v1736_v37 = vadd.f32 %v1735_v52, %v1687_v7 }
 0x1f9   : > { %8423 = vst [vmem:[#allocation44_spill] sm:$0xff] %v6618_v15  ;;  %v6647_v15 = vpop.permute.xlu2 %2412 }
 0x1fa   : > { %v1785_v47 = vadd.f32 %v1784_v19, %v1736_v37  ;;  %1930 = vmatmul.bf16.vlgmr.msra.gmra.mxu1 %v6213_v26  ;;  %8427 = vst [vmem:[#allocation43_spill] sm:$0xff] %v6647_v15 }
 0x1fb   : > { %v1840_v46 = vpop.f32.mrf.mxu3  ;;  %1989 = vmatmul.bf16.gmra.mxu2 %v5952_v60  ;;  %v6643_v60 = vpop.permute.xlu1 %2260 }
 0x1fc   : > { %v6629_v53 = vmul.f32 %v6620_v2, %v1785_v47  ;;  %8426 = vst [vmem:[#allocation40_spill] sm:$0xff] %v6643_v60  ;;  %v1841_v47 = vadd.f32 %v1840_v46, %v6592_v48 }
 0x1fe   : > { %v2458_v40 = vmul.f32 %v6625_v18, %v6629_v53  ;;  %v1887_v7 = vpop.f32.mrf.mxu0  ;;  %v2282_v26 = vmul.f32 %v6554_v45, %v6629_v53  ;;  %v1794_v51 = vpop.f32.mrf.mxu2 }
 0x1ff   : > { %v1737_v19 = vpop.f32.mrf.mxu1  ;;  %v6638_v37 = vadd.f32 %v1887_v7, %v1839_v16 }
 0x200   : > { %v1738_v52 = vadd.f32 %v1737_v19, %v1689_v55  ;;  %2490 = vrot.lane.b32.xlu2 %v2458_v40, %s4815_s5  ;;  %2314 = vrot.lane.b32.xlu1 %v2282_v26, %s4815_s5  ;;  %v1692_v55 = vadd.f32 %v6571_v42, %v6611_v35 }
 0x201   : > { %8425 = vst [vmem:[#allocation49_spill] sm:$0xff] %v6638_v37  ;;  %2082 = vmatmul.bf16.gmra.mxu0 %v6303_v10  ;;  %2038 = vmatmul.bf16.gmra.mxu3 %v6300_v17 }
 0x202   : > { %v1787_v31 = vadd.f32 %v1786_v24, %v1738_v52 }
 0x203   : > { %v1843_v7 = vpop.f32.mrf.mxu3  ;;  %v6663_v42 = vpop.permute.xlu1 %2414 }
 0x204   : > { %v6650_v16 = vmul.f32 %v6620_v2, %v1787_v31  ;;  %v1844_v37 = vadd.f32 %v1843_v7, %v6592_v48 }
 0x206   : > { %v2459_v40 = vmul.f32 %v6647_v15, %v6650_v16  ;;  %v1889_v26 = vpop.f32.mrf.mxu0  ;;  %v2283_v19 = vmul.f32 %v6512_v63, %v6650_v16  ;;  %v1796_v52 = vpop.f32.mrf.mxu2 }
 0x207   : > { %v1740_v17 = vpop.f32.mrf.mxu1  ;;  %v6658_v24 = vadd.f32 %v1889_v26, %v1841_v47  ;;  %v1694_v47 = vadd.f32 %v6586_v59, %v6611_v35  ;;  %v6682_v59 = vpop.permute.xlu0 %2416 }
 0x208   : > { %v1741_v46 = vadd.f32 %v1740_v17, %v1692_v55  ;;  %2316 = vrot.lane.b32.xlu0 %v2283_v19, %s4815_s5  ;;  %2492 = vrot.lane.b32.xlu1 %v2459_v40, %s4815_s5 }
 0x20a   : > { %v1790_v31 = vadd.f32 %v1789_v33, %v1741_v46  ;;  %1935 = vmatmul.bf16.gmra.mxu1 %v6303_v10 }
 0x20b   : > { %v1845_v63 = vpop.f32.mrf.mxu3  ;;  %1994 = vmatmul.bf16.gmra.mxu2 %v6291_v23 }
 0x20c   : > { %v6667_v15 = vmul.f32 %v6620_v2, %v1790_v31  ;;  %v1846_v19 = vadd.f32 %v1845_v63, %v6592_v48  ;;  %v1697_v31 = vadd.f32 %v6548_v50, %v6611_v35 }
 0x20e   : > { %v2460_v55 = vmul.f32 %v6663_v42, %v6667_v15  ;;  %v1892_v40 = vpop.f32.mrf.mxu0  ;;  %v2284_v10 = vmul.f32 %v6514_v11, %v6667_v15  ;;  %v1799_v17 = vpop.f32.mrf.mxu2 }
 0x20f   : > { %v1742_v33 = vpop.f32.mrf.mxu1  ;;  %v6676_v26 = vadd.f32 %v1892_v40, %v1844_v37 }
 0x210   : > { %v1743_v7 = vadd.f32 %v1742_v33, %v1694_v47  ;;  %2318 = vrot.lane.b32.xlu2 %v2284_v10, %s4815_s5  ;;  %2494 = vrot.lane.b32.xlu0 %v2460_v55, %s4815_s5  ;;  %v6700_v33 = vpop.permute.xlu2 %2418 }
 0x211   : > { %2087 = vmatmul.bf16.gmra.mxu0 %v6385_v8  ;;  %2043 = vmatmul.bf16.gmra.mxu3 %v6458_v56 }
 0x212   : > { %v1792_v23 = vadd.f32 %v1791_v34, %v1743_v7 }
 0x213   : > { %v1848_v37 = vpop.f32.mrf.mxu3 }
 0x214   : > { %v6686_v46 = vmul.f32 %v6620_v2, %v1792_v23  ;;  %v1849_v50 = vadd.f32 %v1848_v37, %v6592_v48 }
 0x216   : > { %v2461_v47 = vmul.f32 %v6682_v59, %v6686_v46  ;;  %v1894_v55 = vpop.f32.mrf.mxu0  ;;  %v2285_v56 = vmul.f32 %v6535_v57, %v6686_v46 }
 0x217   : > { %v1745_v34 = vpop.f32.mrf.mxu1  ;;  %v6694_v40 = vadd.f32 %v1894_v55, %v1846_v19  ;;  %v1801_v19 = vpop.f32.mrf.mxu2 }
 0x218   : > { %v1746_v10 = vadd.f32 %v1745_v34, %v1697_v31  ;;  %2496 = vrot.lane.b32.xlu2 %v2461_v47, %s4815_s5  ;;  %2320 = vrot.lane.b32.xlu1 %v2285_v56, %s4815_s5  ;;  %v1699_v31 = vadd.f32 %v6573_v41, %v6611_v35  ;;  %v6718_v41 = vpop.permute.xlu1 %2420 }
 0x21a   : > { %v1795_v63 = vadd.f32 %v1794_v51, %v1746_v10  ;;  %1940 = vmatmul.bf16.gmra.mxu1 %v6385_v8 }
 0x21b   : > { %v1850_v23 = vpop.f32.mrf.mxu3  ;;  %1999 = vmatmul.bf16.gmra.mxu2 %v5799_v58 }
 0x21c   : > { %v6703_v7 = vmul.f32 %v6620_v2, %v1795_v63  ;;  %v1851_v34 = vadd.f32 %v1850_v23, %v6592_v48 }
 0x21e   : > { %v2462_v47 = vmul.f32 %v6700_v33, %v6703_v7  ;;  %v1897_v51 = vpop.f32.mrf.mxu0  ;;  %v2286_v8 = vmul.f32 %v6579_v5, %v6703_v7 }
 0x21f   : > { %v1747_v37 = vpop.f32.mrf.mxu1  ;;  %v6712_v55 = vadd.f32 %v1897_v51, %v1849_v50  ;;  %v1702_v50 = vadd.f32 %v6590_v22, %v6611_v35  ;;  %v6735_v22 = vpop.permute.xlu0 %2422 }
 0x220   : > { %v1748_v56 = vadd.f32 %v1747_v37, %v1699_v31  ;;  %2322 = vrot.lane.b32.xlu0 %v2286_v8, %s4815_s5  ;;  %2498 = vrot.lane.b32.xlu1 %v2462_v47, %s4815_s5  ;;  %v1804_v8 = vpop.f32.mrf.mxu2 }
 0x221   : > { %2092 = vmatmul.bf16.gmra.mxu0 %v6417_v0  ;;  %2048 = vmatmul.bf16.gmra.mxu3 %v6482_v28 }
 0x222   : > { %v1797_v58 = vadd.f32 %v1796_v52, %v1748_v56 }
 0x223   : > { %v1853_v63 = vpop.f32.mrf.mxu3 }
 0x224   : > { %v6722_v10 = vmul.f32 %v6620_v2, %v1797_v58  ;;  %v1854_v56 = vadd.f32 %v1853_v63, %v6592_v48 }
 0x226   : > { %v2463_v31 = vmul.f32 %v6718_v41, %v6722_v10  ;;  %v1899_v47 = vpop.f32.mrf.mxu0  ;;  %v2287_v51 = vmul.f32 %v6542_v39, %v6722_v10 }
 0x227   : > { %v1750_v28 = vpop.f32.mrf.mxu1  ;;  %v6730_v52 = vadd.f32 %v1899_v47, %v1851_v34  ;;  %v1704_v34 = vadd.f32 %v6602_v61, %v6611_v35 }
 0x228   : > { %v1751_v37 = vadd.f32 %v1750_v28, %v1702_v50  ;;  %2324 = vrot.lane.b32.xlu2 %v2287_v51, %s4815_s5  ;;  %2500 = vrot.lane.b32.xlu0 %v2463_v31, %s4815_s5  ;;  %v6755_v28 = vpop.permute.xlu2 %2424 }
 0x22a   : > { %v1800_v23 = vadd.f32 %v1799_v17, %v1751_v37  ;;  %1945 = vmatmul.bf16.gmra.mxu1 %v6417_v0 }
 0x22b   : > { %v1855_v39 = vpop.f32.mrf.mxu3  ;;  %2004 = vmatmul.bf16.gmra.mxu2 %v6083_v3  ;;  %v1806_v3 = vpop.f32.mrf.mxu2 }
 0x22c   : > { %v6739_v58 = vmul.f32 %v6620_v2, %v1800_v23  ;;  %v1856_v51 = vadd.f32 %v1855_v39, %v6592_v48 }
 0x22e   : > { %v2464_v50 = vmul.f32 %v6735_v22, %v6739_v58  ;;  %v1902_v31 = vpop.f32.mrf.mxu0  ;;  %v2288_v0 = vmul.f32 %v6557_v25, %v6739_v58 }
 0x22f   : > { %v1752_v17 = vpop.f32.mrf.mxu1  ;;  %v6748_v47 = vadd.f32 %v1902_v31, %v1854_v56  ;;  %v1707_v56 = vadd.f32 %v6494_v4, %v6611_v35 }
 0x230   : > { %v1753_v63 = vadd.f32 %v1752_v17, %v1704_v34  ;;  %2502 = vrot.lane.b32.xlu2 %v2464_v50, %s4815_s5  ;;  %2326 = vrot.lane.b32.xlu1 %v2288_v0, %s4815_s5  ;;  %v6771_v17 = vpop.permute.xlu1 %2426 }
 0x231   : > { %2097 = vmatmul.bf16.gmra.mxu0 %v6445_v36  ;;  %2053 = vmatmul.bf16.gmra.mxu3 %v6350_v29 }
 0x232   : > { %v1802_v61 = vadd.f32 %v1801_v19, %v1753_v63 }
 0x233   : > { %v1858_v23 = vpop.f32.mrf.mxu3  ;;  %v1809_v4 = vpop.f32.mrf.mxu2 }
 0x234   : > { %v6758_v37 = vmul.f32 %v6620_v2, %v1802_v61  ;;  %v1859_v63 = vadd.f32 %v1858_v23, %v6592_v48 }
 0x236   : > { %v2465_v34 = vmul.f32 %v6755_v28, %v6758_v37  ;;  %v1904_v50 = vpop.f32.mrf.mxu0  ;;  %v2289_v31 = vmul.f32 %v6596_v44, %v6758_v37 }
 0x237   : > { %v1755_v29 = vpop.f32.mrf.mxu1  ;;  %v6766_v19 = vadd.f32 %v1904_v50, %v1856_v51  ;;  %v1709_v51 = vadd.f32 %v6510_v27, %v6611_v35  ;;  %v6790_v27 = vpop.permute.xlu0 %2428 }
 0x238   : > { %v1756_v39 = vadd.f32 %v1755_v29, %v1707_v56  ;;  %2328 = vrot.lane.b32.xlu0 %v2289_v31, %s4815_s5  ;;  %2504 = vrot.lane.b32.xlu1 %v2465_v34, %s4815_s5 }
 0x23a   : > { %v1805_v0 = vadd.f32 %v1804_v8, %v1756_v39  ;;  %1950 = vmatmul.bf16.gmra.mxu1 %v6445_v36 }
 0x23b   : > { %v1860_v44 = vpop.f32.mrf.mxu3  ;;  %2009 = vmatmul.bf16.gmra.mxu2 %v8410_v62 }
 0x23c   : > { %v6775_v61 = vmul.f32 %v6620_v2, %v1805_v0  ;;  %v1861_v31 = vadd.f32 %v1860_v44, %v6592_v48  ;;  %v1811_v0 = vpop.f32.mrf.mxu2 }
 0x23e   : > { %8428 = vst [vmem:[#allocation46_spill] sm:$0xff] %v6775_v61  ;;  %v2466_v56 = vmul.f32 %v6771_v17, %v6775_v61  ;;  %v1907_v8 = vpop.f32.mrf.mxu0  ;;  %v2290_v36 = vmul.f32 %v6562_v32, %v6775_v61 }
 0x23f   : > { %v1757_v34 = vpop.f32.mrf.mxu1  ;;  %v6784_v50 = vadd.f32 %v1907_v8, %v1859_v63  ;;  %v1712_v63 = vadd.f32 %v6533_v43, %v6611_v35 }
 0x240   : > { %v1758_v23 = vadd.f32 %v1757_v34, %v1709_v51  ;;  %2330 = vrot.lane.b32.xlu2 %v2290_v36, %s4815_s5  ;;  %2506 = vrot.lane.b32.xlu0 %v2466_v56, %s4815_s5 }
 0x241   : > { %2102 = vmatmul.bf16.gmra.mxu0 %v6346_v38  ;;  %2058 = vmatmul.bf16.gmra.mxu3 %v6364_v20 }
 0x242   : > { %v1807_v62 = vadd.f32 %v1806_v3, %v1758_v23 }
 0x243   : > { %v1863_v39 = vpop.f32.mrf.mxu3 }
 0x244   : > { %v6794_v29 = vmul.f32 %v6620_v2, %v1807_v62  ;;  %v1864_v43 = vadd.f32 %v1863_v39, %v6592_v48  ;;  %v6812_v62 = vpop.permute.xlu2 %2430 }
 0x246   : > { %8429 = vst [vmem:[#allocation29_spill] sm:$0xff] %v6794_v29  ;;  %v2467_v51 = vmul.f32 %v6790_v27, %v6794_v29  ;;  %v1909_v56 = vpop.f32.mrf.mxu0  ;;  %v2291_v20 = vmul.f32 %v6582_v54, %v6794_v29 }
 0x247   : > { %v1760_v3 = vpop.f32.mrf.mxu1  ;;  %v6802_v8 = vadd.f32 %v1909_v56, %v1861_v31  ;;  %v1714_v31 = vadd.f32 %v6552_v12, %v6611_v35  ;;  %v6826_v12 = vpop.permute.xlu1 %2432 }
 0x248   : > { %v1761_v36 = vadd.f32 %v1760_v3, %v1712_v63  ;;  %2508 = vrot.lane.b32.xlu2 %v2467_v51, %s4815_s5  ;;  %2332 = vrot.lane.b32.xlu1 %v2291_v20, %s4815_s5  ;;  %8431 = vst [vmem:[#allocation28_spill] sm:$0xff] %v6826_v12 }
 0x24a   : > { %v1810_v44 = vadd.f32 %v1809_v4, %v1761_v36  ;;  %1955 = vmatmul.bf16.gmra.mxu1 %v6346_v38  ;;  %v1814_v4 = vpop.f32.mrf.mxu2 }
 0x24b   : > { %v1865_v23 = vpop.f32.mrf.mxu3  ;;  %2014 = vmatmul.bf16.gmra.mxu2 %v6119_v21 }
 0x24c   : > { %v6809_v34 = vmul.f32 %v6620_v2, %v1810_v44  ;;  %v1866_v3 = vadd.f32 %v1865_v23, %v6592_v48  ;;  %v1717_v44 = vadd.f32 %v6502_v1, %v6611_v35  ;;  %v6843_v1 = vpop.permute.xlu0 %2434 }
 0x24d   : > { %8433 = vst [vmem:[#allocation47_spill] sm:$0xff] %v6843_v1 }
 0x24e   : > { %v2468_v63 = vmul.f32 %v6812_v62, %v6809_v34  ;;  %v1912_v51 = vpop.f32.mrf.mxu0  ;;  %v2292_v38 = vmul.f32 %v6616_v30, %v6809_v34 }
 0x24f   : > { %v1762_v39 = vpop.f32.mrf.mxu1  ;;  %v6820_v56 = vadd.f32 %v1912_v51, %v1864_v43 }
 0x250   : > { %v1763_v20 = vadd.f32 %v1762_v39, %v1714_v31  ;;  %2334 = vrot.lane.b32.xlu0 %v2292_v38, %s4815_s5  ;;  %2510 = vrot.lane.b32.xlu1 %v2468_v63, %s4815_s5 }
 0x251   : > { %8430 = vst [vmem:[#allocation34_spill] sm:$0xff] %v6820_v56  ;;  %2107 = vmatmul.bf16.gmra.mxu0 %v6355_v49  ;;  %2063 = vmatmul.bf16.gmra.mxu3 %v6382_v9 }
 0x252   : > { %v1812_v21 = vadd.f32 %v1811_v0, %v1763_v20  ;;  %v1816_v23 = vpop.f32.mrf.mxu2 }
 0x253   : > { %v1868_v51 = vpop.f32.mrf.mxu3 }
 0x254   : > { %v6830_v36 = vmul.f32 %v6620_v2, %v1812_v21  ;;  %v1869_v20 = vadd.f32 %v1868_v51, %v6592_v48 }
 0x256   : > { %v2469_v43 = vmul.f32 %v6826_v12, %v6830_v36  ;;  %v1914_v31 = vpop.f32.mrf.mxu0  ;;  %v2293_v63 = vmul.f32 %v6588_v6, %v6830_v36  ;;  %v6864_v6 = vpop.permute.xlu2 %2436 }
 0x257   : > { %v1765_v9 = vpop.f32.mrf.mxu1  ;;  %v6838_v0 = vadd.f32 %v1914_v31, %v1866_v3  ;;  %v1719_v3 = vadd.f32 %v6521_v13, %v6611_v35  ;;  %8439 = vst [vmem:[#allocation54_spill] sm:$0xff] %v6864_v6 }
 0x258   : > { %v1766_v38 = vadd.f32 %v1765_v9, %v1717_v44  ;;  %2336 = vrot.lane.b32.xlu2 %v2293_v63, %s4815_s5  ;;  %2512 = vrot.lane.b32.xlu0 %v2469_v43, %s4815_s5  ;;  %v8435_v43 = vld [vmem:[#allocation60_spill] sm:$0xff] }
 0x259   : > { %8432 = vst [vmem:[#allocation33_spill] sm:$0xff] %v6838_v0 }
 0x25a   : > { %v1815_v39 = vadd.f32 %v1814_v4, %v1766_v38  ;;  %1960 = vmatmul.bf16.gmra.mxu1 %v6355_v49  ;;  %v8437_v38 = vld [vmem:[#allocation38_spill] sm:$0xff]  ;;  %v1819_v13 = vpop.f32.mrf.mxu2 }
 0x25b   : > { %v1870_v51 = vpop.f32.mrf.mxu3 }
 0x25c   : > { %v6847_v21 = vmul.f32 %v6620_v2, %v1815_v39  ;;  %v1871_v0 = vadd.f32 %v1870_v51, %v6592_v48  ;;  %v6877_v51 = vpop.permute.xlu1 %2438 }
 0x25d   : > { %8442 = vst [vmem:[#allocation62_spill] sm:$0xff] %v6877_v51 }
 0x25e   : > { %8434 = vst [vmem:[#allocation50_spill] sm:$0xff] %v6847_v21  ;;  %v2470_v44 = vmul.f32 %v6843_v1, %v6847_v21  ;;  %v1917_v31 = vpop.f32.mrf.mxu0  ;;  %v2294_v63 = vmul.f32 %v8435_v43, %v6847_v21  ;;  %v6925_v21 = vld [vmem:[%s5961_s3] sm:$0xff] }
 0x25f   : > { %v1767_v4 = vpop.f32.mrf.mxu1  ;;  %v6855_v9 = vadd.f32 %v1917_v31, %v1869_v20  ;;  %v8440_v20 = vld [vmem:[#allocation51_spill] sm:$0xff]  ;;  %8454 = vst [vmem:[#allocation56_spill] sm:$0xff] %v6925_v21 }
 0x260   : > { %v1768_v49 = vadd.f32 %v1767_v4, %v1719_v3  ;;  %2514 = vrot.lane.b32.xlu2 %v2470_v44, %s4815_s5  ;;  %2338 = vrot.lane.b32.xlu1 %v2294_v63, %s4815_s5  ;;  %v1722_v31 = vadd.f32 %v8440_v20, %v6611_v35 }
 0x261   : > { %8436 = vst [vmem:[#allocation45_spill] sm:$0xff] %v6855_v9  ;;  %2112 = vmatmul.bf16.gmra.mxu0 %v8437_v38 }
 0x262   : > { %v1817_v39 = vadd.f32 %v1816_v23, %v1768_v49  ;;  %v1821_v20 = vpop.f32.mrf.mxu2 }
 0x264   : > { %v6862_v1 = vmul.f32 %v6620_v2, %v1817_v39 }
 0x266   : > { %8438 = vst [vmem:[#allocation48_spill] sm:$0xff] %v6862_v1  ;;  %v1919_v3 = vpop.f32.mrf.mxu0  ;;  %v2295_v44 = vmul.f32 %v6643_v60, %v6862_v1  ;;  %v2471_v63 = vmul.f32 %v6864_v6, %v6862_v1  ;;  %v8444_v60 = vld [vmem:[#allocation37_spill] sm:$0xff]  ;;  %v2378_v1 = vmul.f32 %v6925_v21, %v6629_v53 }
 0x267   : > { %v1770_v4 = vpop.f32.mrf.mxu1  ;;  %v6872_v23 = vadd.f32 %v1919_v3, %v1871_v0  ;;  %v1724_v6 = vadd.f32 %v8444_v60, %v6611_v35  ;;  %v6894_v35 = vpop.permute.xlu0 %2440 }
 0x268   : > { %v1771_v49 = vadd.f32 %v1770_v4, %v1722_v31  ;;  %2340 = vrot.lane.b32.xlu0 %v2295_v44, %s4815_s5  ;;  %2516 = vrot.lane.b32.xlu1 %v2471_v63, %s4815_s5  ;;  %v8445_v31 = vld [vmem:[#allocation39_spill] sm:$0xff]  ;;  %8448 = vst [vmem:[#allocation64_spill] sm:$0xff] %v6894_v35 }
 0x269   : > { %8441 = vst [vmem:[#allocation52_spill] sm:$0xff] %v6872_v23  ;;  %v6917_v23 = vld [vmem:[%s5961_s3 + $0x8] sm:$0xff] }
 0x26a   : > { %v1820_v48 = vadd.f32 %v1819_v13, %v1771_v49  ;;  %1965 = vmatmul.bf16.gmra.mxu1 %v8437_v38  ;;  %v8446_v13 = vld [vmem:[#allocation58_spill] sm:$0xff]  ;;  %8452 = vst [vmem:[#allocation61_spill] sm:$0xff] %v6917_v23 }
 0x26b   : > { %v1286_v4 = vperm.slane %v8446_v13, 4  ;;  %v2491_v13 = vpop.permute.xlu2 %2490 }
 0x26c   : > { %v6880_v39 = vmul.f32 %v6620_v2, %v1820_v48 }
 0x26e   : > { %8443 = vst [vmem:[#allocation59_spill] sm:$0xff] %v6880_v39  ;;  %v2472_v0 = vmul.f32 %v6877_v51, %v6880_v39  ;;  %v2296_v3 = vmul.f32 %v8445_v31, %v6880_v39 }
 0x26f   : > { %v1772_v44 = vpop.f32.mrf.mxu1 }
 0x270   : > { %v1773_v63 = vadd.f32 %v1772_v44, %v1724_v6  ;;  %2342 = vrot.lane.b32.xlu2 %v2296_v3, %s4815_s5  ;;  %2518 = vrot.lane.b32.xlu0 %v2472_v0, %s4815_s5  ;;  %v1980_v3 = vpop.f32.mrf.mxu2  ;;  %v6902_v0 = vperm.slane %v1286_v4, 0 }
 0x272   : > { %v1822_v38 = vadd.f32 %v1821_v20, %v1773_v63  ;;  %v6896_v60 = vpop.permute.xlu1 %2314  ;;  %v8450_v20 = vld [vmem:[#allocation41_spill] sm:$0xff] }
 0x273   : > { %8449 = vst [vmem:[#allocation31_spill] sm:$0xff] %v6896_v60  ;;  %v6932_v56 = vpop.permute.xlu2 %2318 }
 0x274   : > { %v6892_v49 = vmul.f32 %v6620_v2, %v1822_v38  ;;  %8456 = vst [vmem:[#allocation30_spill] sm:$0xff] %v6932_v56  ;;  %v7009_v56 = vld [vmem:[%s5961_s3 + $0x28] sm:$0xff] }
 0x276   : > { %8447 = vst [vmem:[#allocation36_spill] sm:$0xff] %v6892_v49  ;;  %v2473_v48 = vmul.f32 %v6894_v35, %v6892_v49  ;;  %v2297_v6 = vmul.f32 %v6622_v14, %v6892_v49  ;;  %v1981_v35 = vadd.f32 %v1980_v3, %v6902_v0  ;;  %v2029_v14 = vpop.f32.mrf.mxu3  ;;  %v2078_v3 = vpop.f32.mrf.mxu0 }
 0x277   : > { %v1931_v44 = vpop.f32.mrf.mxu1 }
 0x278   : > { %v1932_v63 = vadd.f32 %v1931_v44, %v8450_v20  ;;  %2520 = vrot.lane.b32.xlu2 %v2473_v48, %s4815_s5  ;;  %2344 = vrot.lane.b32.xlu1 %v2297_v6, %s4815_s5  ;;  %v2030_v48 = vadd.f32 %v2029_v14, %v1981_v35  ;;  %v2379_v6 = vmul.f32 %v6917_v23, %v6650_v16  ;;  %v1982_v9 = vpop.f32.mrf.mxu2 }
 0x279   : > { %v2538_v35 = vadd.f32 %v2491_v13, %v2378_v1 }
 0x27a   : > { %v6908_v38 = vmul.f32 %v6620_v2, %v1932_v63  ;;  %v2493_v44 = vpop.permute.xlu1 %2492  ;;  %v8453_v63 = vld [vmem:[#allocation44_spill] sm:$0xff]  ;;  %v2079_v12 = vadd.f32 %v2078_v3, %v2030_v48  ;;  %v6943_v1 = vpop.permute.xlu0 %2316 }
 0x27b   : > { %v2539_v43 = vadd.f32 %v2493_v44, %v2379_v6 }
 0x27c   : > { %8451 = vst [vmem:[#allocation63_spill] sm:$0xff] %v6908_v38  ;;  %v2702_v31 = vmul.f32 %v6554_v45, %v6908_v38  ;;  %v2814_v4 = vmul.f32 %v6625_v18, %v6908_v38  ;;  %v6939_v21 = vmul.f32 %v6620_v2, %v2079_v12  ;;  %v2497_v12 = vpop.permute.xlu2 %2496 }
 0x27e   : > { %v2031_v60 = vpop.f32.mrf.mxu3  ;;  %8458 = vst [vmem:[#allocation65_spill] sm:$0xff] %v6939_v21  ;;  %v2080_v13 = vpop.f32.mrf.mxu0  ;;  %v3167_v3 = vmul.f32 %v6625_v18, %v6939_v21 }
 0x27f   : > { %v1933_v20 = vpop.f32.mrf.mxu1 }
 0x280   : > { %v1934_v51 = vadd.f32 %v1933_v20, %v8453_v63  ;;  %2734 = vrot.lane.b32.xlu2 %v2702_v31, %s4815_s5  ;;  %2846 = vrot.lane.b32.xlu1 %v2814_v4, %s4815_s5  ;;  %v1983_v20 = vadd.f32 %v1982_v9, %v6902_v0  ;;  %v8457_v31 = vld [vmem:[#allocation43_spill] sm:$0xff]  ;;  %v4362_v63 = vpack.i.bf16 %v2539_v43, %v2538_v35 }
 0x282   : > { %v6930_v14 = vmul.f32 %v6620_v2, %v1934_v51  ;;  %v2032_v44 = vadd.f32 %v2031_v60, %v1983_v20  ;;  %v8459_v51 = vld [vmem:[#allocation49_spill] sm:$0xff]  ;;  %v1985_v20 = vpop.f32.mrf.mxu2 }
 0x284   : > { %8455 = vst [vmem:[#allocation35_spill] sm:$0xff] %v6930_v14  ;;  %v2815_v4 = vmul.f32 %v8457_v31, %v6930_v14  ;;  %v2081_v48 = vadd.f32 %v2080_v13, %v2032_v44  ;;  %v1986_v44 = vadd.f32 %v1985_v20, %v6902_v0  ;;  %v6966_v13 = vpop.permute.xlu2 %2324 }
 0x286   : > { %2848 = vrot.lane.b32.xlu0 %v2815_v4, %s4815_s5  ;;  %v6957_v35 = vmul.f32 %v6620_v2, %v2081_v48  ;;  %v3055_v48 = vmul.f32 %v6554_v45, %v6939_v21  ;;  %v6985_v45 = vld [vmem:[%s5961_s3 + $0x10] sm:$0xff] }
 0x287   : > { %v1936_v23 = vpop.f32.mrf.mxu1  ;;  %8465 = vst [vmem:[#allocation41_spill] sm:$0xff] %v6985_v45 }
 0x288   : > { %v1937_v6 = vadd.f32 %v1936_v23, %v8459_v51  ;;  %4363 = vrot.lane.b32.xlu1 %v4362_v63, %s4815_s5  ;;  %v8461_v23 = vld [vmem:[#allocation32_spill] sm:$0xff]  ;;  %8462 = vst [vmem:[#allocation51_spill] sm:$0xff] %v6957_v35  ;;  %v2495_v63 = vpop.permute.xlu0 %2494  ;;  %v3168_v51 = vmul.f32 %v8457_v31, %v6957_v35  ;;  %v2083_v31 = vpop.f32.mrf.mxu0 }
 0x289   : > { %v2703_v60 = vmul.f32 %v8461_v23, %v6930_v14 }
 0x28a   : > { %v6946_v9 = vmul.f32 %v6620_v2, %v1937_v6 }
 0x28c   : > { %8460 = vst [vmem:[#allocation38_spill] sm:$0xff] %v6946_v9  ;;  %v2816_v43 = vmul.f32 %v6663_v42, %v6946_v9  ;;  %v2704_v6 = vmul.f32 %v6514_v11, %v6946_v9 }
 0x28e   : > { %2850 = vrot.lane.b32.xlu2 %v2816_v43, %s4815_s5  ;;  %3199 = vrot.lane.b32.xlu0 %v3167_v3, %s4815_s5  ;;  %v2034_v43 = vpop.f32.mrf.mxu3 }
 0x28f   : > { %v1938_v4 = vpop.f32.mrf.mxu1  ;;  %v2035_v3 = vadd.f32 %v2034_v43, %v1986_v44  ;;  %v2380_v44 = vmul.f32 %v6985_v45, %v6667_v15  ;;  %v7001_v45 = vpop.permute.xlu2 %2502 }
 0x290   : > { %2736 = vrot.lane.b32.xlu1 %v2703_v60, %s4815_s5  ;;  %v1939_v18 = vadd.f32 %v1938_v4, %v6658_v24 }
 0x291   : > { %v2084_v20 = vadd.f32 %v2083_v31, %v2035_v3  ;;  %v6994_v3 = vld [vmem:[%s5961_s3 + $0x18] sm:$0xff]  ;;  %v2540_v9 = vadd.f32 %v2495_v63, %v2380_v44  ;;  %v2383_v63 = vmul.f32 %v7009_v56, %v6722_v10  ;;  %v7018_v44 = vld [vmem:[%s5961_s3 + $0x20] sm:$0xff] }
 0x292   : > { %v6973_v24 = vmul.f32 %v6620_v2, %v1939_v18  ;;  %v6976_v60 = vpop.permute.xlu0 %2322  ;;  %v1987_v18 = vpop.f32.mrf.mxu2  ;;  %8466 = vst [vmem:[#allocation44_spill] sm:$0xff] %v6994_v3 }
 0x293   : > { %v6999_v31 = vmul.f32 %v6620_v2, %v2084_v20  ;;  %8467 = vst [vmem:[#allocation43_spill] sm:$0xff] %v7018_v44 }
 0x294   : > { %8463 = vst [vmem:[#allocation37_spill] sm:$0xff] %v6973_v24  ;;  %v2705_v4 = vmul.f32 %v6535_v57, %v6973_v24 }
 0x295   : > { %v3057_v21 = vmul.f32 %v6514_v11, %v6999_v31  ;;  %v2382_v11 = vmul.f32 %v7018_v44, %v6703_v7 }
 0x296   : > { %3201 = vrot.lane.b32.xlu2 %v3168_v51, %s4815_s5  ;;  %2738 = vrot.lane.b32.xlu0 %v2704_v6, %s4815_s5  ;;  %v3056_v51 = vmul.f32 %v8461_v23, %v6957_v35  ;;  %v6982_v6 = vpop.permute.xlu1 %2320  ;;  %v2381_v23 = vmul.f32 %v6994_v3, %v6686_v46  ;;  %v1988_v35 = vadd.f32 %v1987_v18, %v6902_v0 }
 0x297   : > { %8464 = vst [vmem:[#allocation58_spill] sm:$0xff] %v6982_v6  ;;  %v1941_v43 = vpop.f32.mrf.mxu1  ;;  %v2036_v6 = vpop.f32.mrf.mxu3 }
 0x298   : > { %3087 = vrot.lane.b32.xlu1 %v3055_v48, %s4815_s5  ;;  %v2817_v48 = vmul.f32 %v6682_v59, %v6973_v24  ;;  %v1942_v24 = vadd.f32 %v1941_v43, %v6676_v26  ;;  %v2037_v20 = vadd.f32 %v2036_v6, %v1988_v35 }
 0x29a   : > { %v2501_v3 = vpop.permute.xlu0 %2500  ;;  %v1990_v26 = vpop.f32.mrf.mxu2  ;;  %v7023_v18 = vmul.f32 %v6620_v2, %v1942_v24 }
 0x29b   : > { %v7025_v43 = vpop.permute.xlu2 %2330 }
 0x29c   : > { %8468 = vst [vmem:[#allocation49_spill] sm:$0xff] %v7023_v18  ;;  %v2818_v44 = vmul.f32 %v6700_v33, %v7023_v18  ;;  %v2706_v24 = vmul.f32 %v6579_v5, %v7023_v18 }
 0x29d   : > { %8469 = vst [vmem:[#allocation32_spill] sm:$0xff] %v7025_v43 }
 0x29e   : > { %2740 = vrot.lane.b32.xlu2 %v2705_v4, %s4815_s5  ;;  %3089 = vrot.lane.b32.xlu0 %v3056_v51, %s4815_s5  ;;  %v2541_v4 = vadd.f32 %v2497_v12, %v2381_v23  ;;  %v2499_v12 = vpop.permute.xlu1 %2498 }
 0x29f   : > { %v1943_v23 = vpop.f32.mrf.mxu1 }
 0x2a0   : > { %2852 = vrot.lane.b32.xlu1 %v2817_v48, %s4815_s5  ;;  %v4367_v51 = vpack.i.bf16 %v2541_v4, %v2540_v9  ;;  %v3169_v9 = vmul.f32 %v6663_v42, %v6999_v31  ;;  %v2543_v48 = vadd.f32 %v2501_v3, %v2383_v63  ;;  %v2542_v4 = vadd.f32 %v2499_v12, %v2382_v11  ;;  %v2039_v3 = vpop.f32.mrf.mxu3 }
 0x2a1   : > { %v1991_v42 = vadd.f32 %v1990_v26, %v6902_v0 }
 0x2a2   : > { %v4372_v6 = vpack.i.bf16 %v2543_v48, %v2542_v4 }
 0x2a6   : > { %3091 = vrot.lane.b32.xlu2 %v3057_v21, %s4815_s5  ;;  %4368 = vrot.lane.b32.xlu0 %v4367_v51, %s4815_s5  ;;  %v2085_v21 = vpop.f32.mrf.mxu0  ;;  %v1944_v51 = vadd.f32 %v1943_v23, %v6694_v40  ;;  %v1992_v40 = vpop.f32.mrf.mxu2 }
 0x2a7   : > { %v2086_v35 = vadd.f32 %v2085_v21, %v2037_v20  ;;  %v7043_v20 = vpop.permute.xlu2 %2508  ;;  %v1946_v11 = vpop.f32.mrf.mxu1  ;;  %v1993_v4 = vadd.f32 %v1992_v40, %v6902_v0  ;;  %v8475_v40 = vld [vmem:[#allocation53_spill] sm:$0xff] }
 0x2a8   : > { %3203 = vrot.lane.b32.xlu1 %v3169_v9, %s4815_s5  ;;  %v2040_v9 = vadd.f32 %v2039_v3, %v1991_v42  ;;  %v7040_v12 = vmul.f32 %v6620_v2, %v1944_v51  ;;  %v1947_v42 = vadd.f32 %v1946_v11, %v6712_v55 }
 0x2a9   : > { %v7037_v63 = vmul.f32 %v6620_v2, %v2086_v35 }
 0x2aa   : > { %8471 = vst [vmem:[#allocation67_spill] sm:$0xff] %v7040_v12  ;;  %v2819_v21 = vmul.f32 %v6718_v41, %v7040_v12  ;;  %v7053_v35 = vpop.permute.xlu0 %2328  ;;  %v7064_v3 = vmul.f32 %v6620_v2, %v1947_v42 }
 0x2ab   : > { %8470 = vst [vmem:[#allocation66_spill] sm:$0xff] %v7037_v63  ;;  %v3170_v23 = vmul.f32 %v6682_v59, %v7037_v63 }
 0x2ac   : > { %8473 = vst [vmem:[#allocation69_spill] sm:$0xff] %v7064_v3 }
 0x2ae   : > { %4373 = vrot.lane.b32.xlu2 %v4372_v6, %s4815_s5  ;;  %2854 = vrot.lane.b32.xlu0 %v2818_v44, %s4815_s5  ;;  %v2088_v26 = vpop.f32.mrf.mxu0  ;;  %v7045_v44 = vpop.permute.xlu1 %2326  ;;  %v3058_v6 = vmul.f32 %v6535_v57, %v7037_v63 }
 0x2af   : > { %v2089_v48 = vadd.f32 %v2088_v26, %v2040_v9  ;;  %v2707_v26 = vmul.f32 %v8475_v40, %v7040_v12 }
 0x2b0   : > { %2742 = vrot.lane.b32.xlu1 %v2706_v24, %s4815_s5  ;;  %v2041_v24 = vpop.f32.mrf.mxu3 }
 0x2b1   : > { %v7060_v51 = vmul.f32 %v6620_v2, %v2089_v48  ;;  %v2042_v59 = vadd.f32 %v2041_v24, %v1993_v4  ;;  %v1948_v4 = vpop.f32.mrf.mxu1 }
 0x2b2   : > { %v7066_v55 = vpop.permute.xlu2 %2336  ;;  %v7076_v42 = vpop.permute.xlu0 %2506  ;;  %v1949_v24 = vadd.f32 %v1948_v4, %v6730_v52 }
 0x2b3   : > { %8472 = vst [vmem:[#allocation68_spill] sm:$0xff] %v7060_v51  ;;  %v3171_v9 = vmul.f32 %v6700_v33, %v7060_v51 }
 0x2b4   : > { %8474 = vst [vmem:[#allocation70_spill] sm:$0xff] %v7066_v55  ;;  %v7102_v55 = vmul.f32 %v6620_v2, %v1949_v24 }
 0x2b6   : > { %2856 = vrot.lane.b32.xlu2 %v2819_v21, %s4815_s5  ;;  %3205 = vrot.lane.b32.xlu0 %v3170_v23, %s4815_s5  ;;  %v2090_v11 = vpop.f32.mrf.mxu0  ;;  %v1995_v21 = vpop.f32.mrf.mxu2  ;;  %v2820_v23 = vmul.f32 %v6735_v22, %v7064_v3 }
 0x2b7   : > { %v2091_v57 = vadd.f32 %v2090_v11, %v2042_v59  ;;  %v2505_v48 = vpop.permute.xlu1 %2504 }
 0x2b8   : > { %3093 = vrot.lane.b32.xlu1 %v3058_v6, %s4815_s5  ;;  %v1996_v6 = vadd.f32 %v1995_v21, %v6902_v0  ;;  %v2044_v11 = vpop.f32.mrf.mxu3 }
 0x2b9   : > { %v7080_v33 = vmul.f32 %v6620_v2, %v2091_v57 }
 0x2ba   : > { %v7084_v59 = vpop.permute.xlu2 %2514  ;;  %v2045_v52 = vadd.f32 %v2044_v11, %v1996_v6  ;;  %v1951_v6 = vpop.f32.mrf.mxu1 }
 0x2bb   : > { %v3172_v57 = vmul.f32 %v6718_v41, %v7080_v33  ;;  %v1952_v24 = vadd.f32 %v1951_v6, %v6748_v47 }
 0x2bd   : > { %v7127_v47 = vmul.f32 %v6620_v2, %v1952_v24 }
 0x2be   : > { %3207 = vrot.lane.b32.xlu2 %v3171_v9, %s4815_s5  ;;  %2744 = vrot.lane.b32.xlu0 %v2707_v26, %s4815_s5  ;;  %v2708_v9 = vmul.f32 %v6557_v25, %v7064_v3  ;;  %v3059_v26 = vmul.f32 %v6579_v5, %v7060_v51  ;;  %v1997_v21 = vpop.f32.mrf.mxu2  ;;  %v2093_v41 = vpop.f32.mrf.mxu0 }
 0x2bf   : > { %v7090_v43 = vpop.permute.xlu1 %2332  ;;  %v1998_v3 = vadd.f32 %v1997_v21, %v6902_v0  ;;  %v2094_v12 = vadd.f32 %v2093_v41, %v2045_v52 }
 0x2c0   : > { %2858 = vrot.lane.b32.xlu1 %v2820_v23, %s4815_s5  ;;  %8476 = vst [vmem:[#allocation53_spill] sm:$0xff] %v7090_v43  ;;  %v7097_v23 = vld [vmem:[%s5961_s3 + $0x38] sm:$0xff] }
 0x2c1   : > { %v2385_v4 = vmul.f32 %v7097_v23, %v6758_v37 }
 0x2c2   : > { %v7104_v5 = vpop.permute.xlu0 %2334  ;;  %v1953_v24 = vpop.f32.mrf.mxu1 }
 0x2c3   : > { %8477 = vst [vmem:[#allocation71_spill] sm:$0xff] %v7104_v5  ;;  %v2545_v11 = vadd.f32 %v2505_v48, %v2385_v4  ;;  %v2821_v5 = vmul.f32 %v6755_v28, %v7102_v55  ;;  %v2046_v48 = vpop.f32.mrf.mxu3 }
 0x2c4   : > { %v2047_v52 = vadd.f32 %v2046_v48, %v1998_v3  ;;  %v8479_v3 = vld [vmem:[#allocation55_spill] sm:$0xff]  ;;  %v1954_v48 = vadd.f32 %v1953_v24, %v6766_v19  ;;  %v7172_v24 = vld [vmem:[%s5961_s3 + $0x70] sm:$0xff] }
 0x2c5   : > { %v2709_v41 = vmul.f32 %v8479_v3, %v7102_v55  ;;  %8484 = vst [vmem:[#allocation76_spill] sm:$0xff] %v7172_v24 }
 0x2c6   : > { %2746 = vrot.lane.b32.xlu2 %v2708_v9, %s4815_s5  ;;  %3095 = vrot.lane.b32.xlu0 %v3059_v26, %s4815_s5  ;;  %v7108_v9 = vld [vmem:[%s5961_s3 + $0x30] sm:$0xff]  ;;  %v2095_v4 = vpop.f32.mrf.mxu0 }
 0x2c7   : > { %v2384_v26 = vmul.f32 %v7108_v9, %v6739_v58  ;;  %v7129_v21 = vpop.permute.xlu1 %2510 }
 0x2c8   : > { %3209 = vrot.lane.b32.xlu1 %v3172_v57, %s4815_s5  ;;  %v3060_v57 = vmul.f32 %v8475_v40, %v7080_v33 }
 0x2c9   : > { %v2544_v43 = vadd.f32 %v7001_v45, %v2384_v26  ;;  %v7124_v45 = vmul.f32 %v6620_v2, %v2094_v12  ;;  %v2822_v26 = vmul.f32 %v6771_v17, %v7127_v47 }
 0x2ca   : > { %v7115_v18 = vpop.permute.xlu2 %2342  ;;  %v7132_v40 = vpop.permute.xlu0 %2512 }
 0x2cb   : > { %8478 = vst [vmem:[#allocation72_spill] sm:$0xff] %v7115_v18  ;;  %v4377_v51 = vpack.i.bf16 %v2545_v11, %v2544_v43  ;;  %v2096_v43 = vadd.f32 %v2095_v4, %v2047_v52  ;;  %v2000_v11 = vpop.f32.mrf.mxu2  ;;  %v2710_v4 = vmul.f32 %v6562_v32, %v7127_v47 }
 0x2ce   : > { %3097 = vrot.lane.b32.xlu2 %v3060_v57, %s4815_s5  ;;  %2860 = vrot.lane.b32.xlu0 %v2821_v5, %s4815_s5  ;;  %v3173_v5 = vmul.f32 %v6735_v22, %v7124_v45  ;;  %v2001_v57 = vadd.f32 %v2000_v11, %v6902_v0 }
 0x2d0   : > { %4378 = vrot.lane.b32.xlu1 %v4377_v51, %s4815_s5  ;;  %v7143_v51 = vmul.f32 %v6620_v2, %v2096_v43  ;;  %v3061_v43 = vmul.f32 %v6557_v25, %v7124_v45  ;;  %v2392_v25 = vmul.f32 %v7172_v24, %v6880_v39  ;;  %v7189_v39 = vld [vmem:[%s5961_s3 + $0x40] sm:$0xff] }
 0x2d2   : > { %v2521_v12 = vpop.permute.xlu2 %2520  ;;  %v7145_v6 = vpop.permute.xlu1 %2338  ;;  %v3174_v52 = vmul.f32 %v6755_v28, %v7143_v51  ;;  %v7167_v28 = vld [vmem:[%s5961_s3 + $0x78] sm:$0xff]  ;;  %v3062_v18 = vmul.f32 %v8479_v3, %v7143_v51 }
 0x2d3   : > { %8480 = vst [vmem:[#allocation55_spill] sm:$0xff] %v7145_v6  ;;  %v2393_v11 = vmul.f32 %v7167_v28, %v6892_v49  ;;  %v2002_v24 = vpop.f32.mrf.mxu2 }
 0x2d4   : > { %8483 = vst [vmem:[#allocation75_spill] sm:$0xff] %v7167_v28  ;;  %v2386_v28 = vmul.f32 %v7189_v39, %v6775_v61 }
 0x2d6   : > { %2862 = vrot.lane.b32.xlu2 %v2822_v26, %s4815_s5  ;;  %3211 = vrot.lane.b32.xlu0 %v3173_v5, %s4815_s5  ;;  %v2049_v26 = vpop.f32.mrf.mxu3 }
 0x2d7   : > { %v2050_v5 = vadd.f32 %v2049_v26, %v2001_v57 }
 0x2d8   : > { %2748 = vrot.lane.b32.xlu1 %v2709_v41, %s4815_s5  ;;  %v7161_v41 = vmul.f32 %v6620_v2, %v1954_v48  ;;  %v2098_v48 = vpop.f32.mrf.mxu0 }
 0x2da   : > { %v7148_v22 = vpop.permute.xlu0 %2340  ;;  %v7163_v19 = vpop.permute.xlu2 %2734 }
 0x2db   : > { %8481 = vst [vmem:[#allocation73_spill] sm:$0xff] %v7148_v22  ;;  %v2003_v22 = vadd.f32 %v2002_v24, %v6902_v0 }
 0x2dc   : > { %8482 = vst [vmem:[#allocation74_spill] sm:$0xff] %v7163_v19  ;;  %v2711_v19 = vmul.f32 %v6582_v54, %v7161_v41 }
 0x2de   : > { %3213 = vrot.lane.b32.xlu2 %v3174_v52, %s4815_s5  ;;  %2750 = vrot.lane.b32.xlu0 %v2710_v4, %s4815_s5  ;;  %v7176_v52 = vpop.permute.xlu1 %2516  ;;  %v7178_v4 = vadd.f32 %v2521_v12, %v2393_v11  ;;  %v2823_v12 = vmul.f32 %v6790_v27, %v7161_v41  ;;  %v7198_v11 = vld [vmem:[%s5961_s3 + $0x48] sm:$0xff] }
 0x2df   : > { %8485 = vst [vmem:[#allocation77_spill] sm:$0xff] %v7198_v11  ;;  %v2387_v3 = vmul.f32 %v7198_v11, %v6794_v29  ;;  %v2051_v29 = vpop.f32.mrf.mxu3 }
 0x2e0   : > { %3099 = vrot.lane.b32.xlu1 %v3061_v43, %s4815_s5  ;;  %v2099_v43 = vadd.f32 %v2098_v48, %v2050_v5  ;;  %v1956_v5 = vpop.f32.mrf.mxu1  ;;  %v2052_v24 = vadd.f32 %v2051_v29, %v2003_v22 }
 0x2e1   : > { %v1957_v6 = vadd.f32 %v1956_v5, %v6784_v50  ;;  %v7226_v50 = vld [vmem:[%s5961_s3 + $0x50] sm:$0xff] }
 0x2e2   : > { %v2519_v57 = vpop.permute.xlu0 %2518  ;;  %8489 = vst [vmem:[#allocation81_spill] sm:$0xff] %v7226_v50 }
 0x2e3   : > { %v7180_v26 = vadd.f32 %v2519_v57, %v2392_v25  ;;  %v7203_v25 = vmul.f32 %v6620_v2, %v2099_v43  ;;  %v2546_v57 = vadd.f32 %v7076_v42, %v2386_v28  ;;  %v7217_v42 = vld [vmem:[%s5961_s3 + $0x58] sm:$0xff]  ;;  %v7231_v5 = vmul.f32 %v6620_v2, %v1957_v6 }
 0x2e4   : > { %8488 = vst [vmem:[#allocation80_spill] sm:$0xff] %v7217_v42  ;;  %v2389_v28 = vmul.f32 %v7217_v42, %v6830_v36 }
 0x2e5   : > { %8486 = vst [vmem:[#allocation78_spill] sm:$0xff] %v7203_v25  ;;  %v3063_v43 = vmul.f32 %v6562_v32, %v7203_v25  ;;  %v2388_v32 = vmul.f32 %v7226_v50, %v6809_v34 }
 0x2e6   : > { %2752 = vrot.lane.b32.xlu2 %v2711_v19, %s4815_s5  ;;  %3101 = vrot.lane.b32.xlu0 %v3062_v18, %s4815_s5  ;;  %v2547_v18 = vadd.f32 %v7043_v20, %v2387_v3  ;;  %v3175_v20 = vmul.f32 %v6771_v17, %v7203_v25  ;;  %8490 = vst [vmem:[#allocation82_spill] sm:$0xff] %v7231_v5  ;;  %v2100_v17 = vpop.f32.mrf.mxu0 }
 0x2e7   : > { %v2549_v3 = vadd.f32 %v7132_v40, %v2389_v28  ;;  %v2824_v40 = vmul.f32 %v6812_v62, %v7231_v5  ;;  %v2712_v28 = vmul.f32 %v6616_v30, %v7231_v5 }
 0x2e8   : > { %2864 = vrot.lane.b32.xlu1 %v2823_v12, %s4815_s5  ;;  %v7207_v19 = vpop.permute.xlu2 %2850  ;;  %v4382_v49 = vpack.i.bf16 %v2547_v18, %v2546_v57  ;;  %v2005_v12 = vpop.f32.mrf.mxu2 }
 0x2e9   : > { %v1958_v29 = vpop.f32.mrf.mxu1  ;;  %v2006_v18 = vadd.f32 %v2005_v12, %v6902_v0  ;;  %v2054_v12 = vpop.f32.mrf.mxu3 }
 0x2ea   : > { %v7210_v48 = vpop.permute.xlu1 %2344  ;;  %v1959_v6 = vadd.f32 %v1958_v29, %v6802_v8 }
 0x2eb   : > { %8487 = vst [vmem:[#allocation79_spill] sm:$0xff] %v7210_v48 }
 0x2ee   : > { %3103 = vrot.lane.b32.xlu2 %v3063_v43, %s4815_s5  ;;  %4383 = vrot.lane.b32.xlu0 %v4382_v49, %s4815_s5  ;;  %v2548_v49 = vadd.f32 %v7129_v21, %v2388_v32  ;;  %v2101_v43 = vadd.f32 %v2100_v17, %v2052_v24  ;;  %v7253_v24 = vld [vmem:[%s6298_s4 + $0x8] sm:$0xff] }
 0x2ef   : > { %8492 = vst [vmem:[#allocation84_spill] sm:$0xff] %v7253_v24  ;;  %v2203_v8 = vmul.f32 %v7253_v24, %v6650_v16  ;;  %v8493_v32 = vld [vmem:[#allocation56_spill] sm:$0xff]  ;;  %v2636_v24 = vstv %s2635_s15 }
 0x2f0   : > { %3215 = vrot.lane.b32.xlu1 %v3175_v20, %s4815_s5  ;;  %v7235_v57 = vpop.permute.xlu2 %3201  ;;  %v4387_v48 = vpack.i.bf16 %v2549_v3, %v2548_v49  ;;  %v7248_v20 = vld [vmem:[%s6298_s4] sm:$0xff]  ;;  %v8494_v3 = vld [vmem:[#allocation61_spill] sm:$0xff]  ;;  %v7262_v29 = vmul.f32 %v6620_v2, %v2101_v43  ;;  %v2055_v49 = vadd.f32 %v2054_v12, %v2006_v18  ;;  %v2007_v43 = vpop.f32.mrf.mxu2  ;;  %vm7280_vm1 = vcmp.eq.s32.totalorder %v2636_v24, 1 }
 0x2f1   : > { %8491 = vst [vmem:[#allocation83_spill] sm:$0xff] %v7248_v20  ;;  %v2202_v21 = vmul.f32 %v7248_v20, %v6629_v53  ;;  %v2799_v17 = vmul.f32 %v8494_v3, %v6930_v14  ;;  %v2363_v14 = vsub.f32 %v2203_v8, %v6943_v1  ;;  %v1961_v12 = vpop.f32.mrf.mxu1  ;;  %v2008_v8 = vadd.f32 %v2007_v43, %v6902_v0 }
 0x2f2   : > { %v2847_v22 = vpop.permute.xlu1 %2846  ;;  %v3064_v24 = vmul.f32 %v6582_v54, %v7262_v29 }
 0x2f6   : > { %4388 = vrot.lane.b32.xlu2 %v4387_v48, %s4815_s5  ;;  %2866 = vrot.lane.b32.xlu0 %v2824_v40, %s4815_s5  ;;  %v2798_v48 = vmul.f32 %v8493_v32, %v6908_v38  ;;  %v7265_v40 = vmul.f32 %v6620_v2, %v1959_v6  ;;  %v8497_v38 = vld [vmem:[#allocation31_spill] sm:$0xff]  ;;  %v2103_v6 = vpop.f32.mrf.mxu0 }
 0x2f7   : > { %v2362_v25 = vsub.f32 %v2202_v21, %v8497_v38  ;;  %v8500_v38 = vld [vmem:[#allocation28_spill] sm:$0xff]  ;;  %v3176_v21 = vmul.f32 %v6790_v27, %v7262_v29 }
 0x2f8   : > { %8495 = vst [vmem:[#allocation56_spill] sm:$0xff] %v7265_v40  ;;  %v2849_v20 = vpop.permute.xlu0 %2848  ;;  %2754 = vrot.lane.b32.xlu1 %v2712_v28, %s4815_s5  ;;  %v7268_v42 = vpop.permute.xlu2 %2740  ;;  %v7270_v50 = vadd.f32 %v2847_v22, %v2798_v48  ;;  %v2104_v48 = vadd.f32 %v2103_v6, %v2055_v49  ;;  %v2825_v1 = vmul.f32 %v8500_v38, %v7265_v40  ;;  %v8501_v28 = vld [vmem:[#allocation34_spill] sm:$0xff] }
 0x2f9   : > { %8496 = vst [vmem:[#allocation61_spill] sm:$0xff] %v7268_v42  ;;  %v7272_v5 = vadd.f32 %v2849_v20, %v2799_v17  ;;  %v1962_v11 = vadd.f32 %v1961_v12, %v8501_v28  ;;  %v8506_v12 = vld [vmem:[#allocation57_spill] sm:$0xff] }
 0x2fa   : > { %v4364_v18 = vpop.permute.xlu1 %4363  ;;  %v2713_v28 = vmul.f32 %v8506_v12, %v7265_v40 }
 0x2fb   : > { %v4366_v22 = vunpack.i.h.bf16 %v4364_v18  ;;  %v4365_v20 = vunpack.i.l.bf16 %v4364_v18 }
 0x2fd   : > { %v2620_v17 = vsel %vm2618_vm0, %v2363_v14, %v4366_v22  ;;  %v2619_v61 = vsel %vm2618_vm0, %v2362_v25, %v4365_v20  ;;  %v7303_v14 = vmul.f32 %v6620_v2, %v2104_v48  ;;  %v2010_v20 = vpop.f32.mrf.mxu2 }
 0x2fe   : > { %v2639_v49 = vsel %vm7280_vm1, %v6650_v16, %v2620_v17  ;;  %v2638_v18 = vsel %vm7280_vm1, %v6629_v53, %v2619_v61  ;;  %2868 = vrot.lane.b32.xlu2 %v2825_v1, %s4815_s5  ;;  %3217 = vrot.lane.b32.xlu0 %v3176_v21, %s4815_s5  ;;  %v2056_v16 = vpop.f32.mrf.mxu3  ;;  %v7314_v61 = vmul.f32 %v6620_v2, %v1962_v11  ;;  %v2105_v22 = vpop.f32.mrf.mxu0  ;;  %v8507_v1 = vld [vmem:[#allocation47_spill] sm:$0xff]  ;;  %v7327_v11 = vld [vmem:[%s6298_s4 + $0x28] sm:$0xff] }
 0x2ff   : > { %v4013_v27 = vpack.c.bf16 %v2639_v49, %v2638_v18  ;;  %8502 = vst [vmem:[#allocation31_spill] sm:$0xff] %v7303_v14  ;;  %v2057_v53 = vadd.f32 %v2056_v16, %v2008_v8  ;;  %v3177_v6 = vmul.f32 %v6812_v62, %v7303_v14  ;;  %v2207_v8 = vmul.f32 %v7327_v11, %v6722_v10  ;;  %v7332_v17 = vld [vmem:[%s6298_s4 + $0x20] sm:$0xff] }
 0x300   : > { %v7305_v25 = vpop.permute.xlu0 %3199  ;;  %3105 = vrot.lane.b32.xlu1 %v3064_v24, %s4815_s5  ;;  %v7308_v54 = vpop.permute.xlu2 %3091  ;;  %8504 = vst [vmem:[#allocation34_spill] sm:$0xff] %v7314_v61  ;;  %v2826_v21 = vmul.f32 %v8507_v1, %v7314_v61  ;;  %v2206_v62 = vmul.f32 %v7332_v17, %v6703_v7 }
 0x301   : > { %8503 = vst [vmem:[#allocation28_spill] sm:$0xff] %v7308_v54  ;;  %v2106_v48 = vadd.f32 %v2105_v22, %v2057_v53  ;;  %v1963_v24 = vpop.f32.mrf.mxu1 }
 0x302   : > { %4014 = vst [vmem:[%s7310_s19] sm:$0xff] %v4013_v27   ;;  %v7316_v43 = vpop.permute.xlu1 %2736  ;;  %v2367_v27 = vsub.f32 %v2207_v8, %v6966_v13  ;;  %v2366_v16 = vsub.f32 %v2206_v62, %v6976_v60  ;;  %v3065_v13 = vmul.f32 %v6616_v30, %v7303_v14  ;;  %v8513_v60 = vld [vmem:[#allocation33_spill] sm:$0xff] }
 0x303   : > { %8505 = vst [vmem:[#allocation85_spill] sm:$0xff] %v7316_v43  ;;  %v1964_v62 = vadd.f32 %v1963_v24, %v8513_v60 }
 0x304   : > { %8508 = vst [vmem:[#allocation57_spill] sm:$0xff] %v7327_v11 }
 0x305   : > { %8509 = vst [vmem:[#allocation47_spill] sm:$0xff] %v7332_v17  ;;  %v2011_v17 = vadd.f32 %v2010_v20, %v6902_v0  ;;  %v8514_v20 = vld [vmem:[#allocation60_spill] sm:$0xff] }
 0x306   : > { %3219 = vrot.lane.b32.xlu2 %v3177_v6, %s4815_s5  ;;  %2756 = vrot.lane.b32.xlu0 %v2713_v28, %s4815_s5  ;;  %v7342_v28 = vmul.f32 %v6620_v2, %v2106_v48  ;;  %v2059_v8 = vpop.f32.mrf.mxu3  ;;  %v2108_v24 = vpop.f32.mrf.mxu0 }
 0x308   : > { %v7336_v49 = vpop.permute.xlu0 %2738  ;;  %2870 = vrot.lane.b32.xlu1 %v2826_v21, %s4815_s5  ;;  %v4374_v18 = vpop.permute.xlu2 %4373  ;;  %8511 = vst [vmem:[#allocation87_spill] sm:$0xff] %v7342_v28  ;;  %v3178_v30 = vmul.f32 %v8500_v38, %v7342_v28  ;;  %v7379_v38 = vld [vmem:[%s5961_s3 + $0x60] sm:$0xff] }
 0x309   : > { %8510 = vst [vmem:[#allocation86_spill] sm:$0xff] %v7336_v49  ;;  %v4376_v53 = vunpack.i.h.bf16 %v4374_v18  ;;  %v4375_v6 = vunpack.i.l.bf16 %v4374_v18  ;;  %v3066_v49 = vmul.f32 %v8506_v12, %v7342_v28 }
 0x30a   : > { %v7344_v22 = vpop.permute.xlu1 %3087 }
 0x30b   : > { %8512 = vst [vmem:[#allocation88_spill] sm:$0xff] %v7344_v22  ;;  %v2624_v11 = vsel %vm2618_vm0, %v2367_v27, %v4376_v53  ;;  %v2623_v21 = vsel %vm2618_vm0, %v2366_v16, %v4375_v6  ;;  %v2714_v27 = vmul.f32 %v8514_v20, %v7314_v61  ;;  %v2012_v16 = vpop.f32.mrf.mxu2  ;;  %v8515_v6 = vld [vmem:[#allocation48_spill] sm:$0xff] }
 0x30c   : > { %v2643_v48 = vsel %vm7280_vm1, %v6722_v10, %v2624_v11  ;;  %v2642_v18 = vsel %vm7280_vm1, %v6703_v7, %v2623_v21  ;;  %v2060_v10 = vadd.f32 %v2059_v8, %v2011_v17  ;;  %v7366_v11 = vld [vmem:[%s5961_s3 + $0x68] sm:$0xff]  ;;  %v7371_v21 = vmul.f32 %v6620_v2, %v1964_v62  ;;  %v1966_v8 = vpop.f32.mrf.mxu1 }
 0x30d   : > { %v4023_v53 = vpack.c.bf16 %v2643_v48, %v2642_v18  ;;  %v2391_v7 = vmul.f32 %v7366_v11, %v8515_v6  ;;  %v8518_v48 = vld [vmem:[#allocation50_spill] sm:$0xff] }
 0x30e   : > { %2758 = vrot.lane.b32.xlu2 %v2714_v27, %s4815_s5  ;;  %3107 = vrot.lane.b32.xlu0 %v3065_v13, %s4815_s5  ;;  %8516 = vst [vmem:[#allocation33_spill] sm:$0xff] %v7371_v21  ;;  %v2390_v17 = vmul.f32 %v7379_v38, %v8518_v48  ;;  %v2109_v54 = vadd.f32 %v2108_v24, %v2060_v10  ;;  %v2061_v14 = vpop.f32.mrf.mxu3  ;;  %v7401_v24 = vld [vmem:[%s6298_s4 + $0x18] sm:$0xff] }
 0x30f   : > { %4131 = vst [vmem:[%s7310_s19 + $0x10] sm:$0xff] %v4023_v53   ;;  %v2551_v18 = vadd.f32 %v7176_v52, %v2391_v7  ;;  %v2013_v53 = vadd.f32 %v2012_v16, %v6902_v0  ;;  %v7396_v52 = vld [vmem:[%s6298_s4 + $0x10] sm:$0xff]  ;;  %v2205_v16 = vmul.f32 %v7401_v24, %v6686_v46 }
 0x310   : > { %v7373_v60 = vpop.permute.xlu0 %3089  ;;  %3221 = vrot.lane.b32.xlu1 %v3178_v30, %s4815_s5  ;;  %v7376_v13 = vpop.permute.xlu2 %2856  ;;  %v2550_v62 = vadd.f32 %v7084_v59, %v2390_v17  ;;  %v8519_v30 = vld [vmem:[#allocation45_spill] sm:$0xff]  ;;  %8521 = vst [vmem:[#allocation50_spill] sm:$0xff] %v7396_v52  ;;  %v2204_v59 = vmul.f32 %v7396_v52, %v6667_v15  ;;  %v7406_v10 = vmul.f32 %v6620_v2, %v2109_v54  ;;  %v8524_v17 = vld [vmem:[#allocation30_spill] sm:$0xff] }
 0x311   : > { %8517 = vst [vmem:[#allocation60_spill] sm:$0xff] %v7373_v60  ;;  %v1967_v43 = vadd.f32 %v1966_v8, %v8519_v30  ;;  %v8520_v60 = vld [vmem:[#allocation54_spill] sm:$0xff]  ;;  %v2062_v12 = vadd.f32 %v2061_v14, %v2013_v53 }
 0x312   : > { %v7384_v27 = vpop.permute.xlu1 %2852  ;;  %v2827_v22 = vmul.f32 %v8520_v60, %v7371_v21  ;;  %v4392_v6 = vpack.i.bf16 %v2551_v18, %v2550_v62  ;;  %8522 = vst [vmem:[#allocation45_spill] sm:$0xff] %v7401_v24  ;;  %v2364_v8 = vsub.f32 %v2204_v59, %v8524_v17  ;;  %v8525_v18 = vld [vmem:[#allocation58_spill] sm:$0xff]  ;;  %v2110_v24 = vpop.f32.mrf.mxu0 }
 0x313   : > { %8523 = vst [vmem:[#allocation54_spill] sm:$0xff] %v7406_v10  ;;  %v7409_v7 = vmul.f32 %v6620_v2, %v1967_v43  ;;  %v2365_v62 = vsub.f32 %v2205_v16, %v8525_v18  ;;  %v2111_v54 = vadd.f32 %v2110_v24, %v2062_v12  ;;  %v8526_v16 = vld [vmem:[#allocation62_spill] sm:$0xff] }
 0x315   : > { %v2828_v17 = vmul.f32 %v8526_v16, %v7409_v7 }
 0x316   : > { %3109 = vrot.lane.b32.xlu2 %v3066_v49, %s4815_s5  ;;  %2872 = vrot.lane.b32.xlu0 %v2827_v22, %s4815_s5 }
 0x318   : > { %v4369_v49 = vpop.permute.xlu0 %4368  ;;  %4393 = vrot.lane.b32.xlu1 %v4392_v6, %s4815_s5  ;;  %v7412_v22 = vpop.permute.xlu2 %3207 }
 0x319   : > { %v4371_v30 = vunpack.i.h.bf16 %v4369_v49  ;;  %v4370_v52 = vunpack.i.l.bf16 %v4369_v49  ;;  %v3179_v49 = vmul.f32 %v8507_v1, %v7406_v10  ;;  %v1968_v1 = vpop.f32.mrf.mxu1 }
 0x31a   : > { %v7416_v14 = vpop.permute.xlu1 %3203 }
 0x31b   : > { %v2622_v53 = vsel %vm2618_vm0, %v2365_v62, %v4371_v30  ;;  %v2621_v43 = vsel %vm2618_vm0, %v2364_v8, %v4370_v52  ;;  %v8527_v52 = vld [vmem:[#allocation40_spill] sm:$0xff]  ;;  %v2015_v8 = vpop.f32.mrf.mxu2 }
 0x31c   : > { %v2641_v6 = vsel %vm7280_vm1, %v6686_v46, %v2622_v53  ;;  %v2640_v59 = vsel %vm7280_vm1, %v6667_v15, %v2621_v43  ;;  %v2715_v24 = vmul.f32 %v8527_v52, %v7371_v21  ;;  %v7436_v46 = vmul.f32 %v6620_v2, %v2111_v54  ;;  %v8531_v53 = vld [vmem:[#allocation52_spill] sm:$0xff]  ;;  %v8532_v54 = vld [vmem:[#allocation39_spill] sm:$0xff] }
 0x31d   : > { %v4018_v18 = vpack.c.bf16 %v2641_v6, %v2640_v59  ;;  %v2016_v30 = vadd.f32 %v2015_v8, %v6902_v0  ;;  %v1969_v43 = vadd.f32 %v1968_v1, %v8531_v53  ;;  %v2716_v59 = vmul.f32 %v8532_v54, %v7409_v7  ;;  %v2113_v53 = vpop.f32.mrf.mxu0 }
 0x31e   : > { %2874 = vrot.lane.b32.xlu2 %v2828_v17, %s4815_s5  ;;  %3223 = vrot.lane.b32.xlu0 %v3179_v49, %s4815_s5  ;;  %8528 = vst [vmem:[#allocation30_spill] sm:$0xff] %v7436_v46  ;;  %v3180_v6 = vmul.f32 %v8520_v60, %v7436_v46  ;;  %v3067_v17 = vmul.f32 %v8514_v20, %v7406_v10  ;;  %v2064_v49 = vpop.f32.mrf.mxu3 }
 0x31f   : > { %4130 = vst [vmem:[%s7310_s19 + $0x8] sm:$0xff] %v4018_v18   ;;  %v2065_v18 = vadd.f32 %v2064_v49, %v2016_v30  ;;  %v3068_v20 = vmul.f32 %v8527_v52, %v7436_v46 }
 0x320   : > { %v7438_v12 = vpop.permute.xlu0 %2854  ;;  %2760 = vrot.lane.b32.xlu1 %v2715_v24, %s4815_s5  ;;  %v7441_v15 = vpop.permute.xlu2 %2746  ;;  %v7456_v24 = vmul.f32 %v6620_v2, %v1969_v43  ;;  %v8536_v43 = vld [vmem:[#allocation64_spill] sm:$0xff] }
 0x321   : > { %8529 = vst [vmem:[#allocation58_spill] sm:$0xff] %v7441_v15 }
 0x322   : > { %v7443_v62 = vpop.permute.xlu1 %2742 }
 0x323   : > { %8530 = vst [vmem:[#allocation62_spill] sm:$0xff] %v7443_v62  ;;  %v2017_v15 = vpop.f32.mrf.mxu2 }
 0x324   : > { %v2018_v30 = vadd.f32 %v2017_v15, %v6902_v0 }
 0x325   : > { %v2115_v15 = vpop.f32.mrf.mxu0 }
 0x326   : > { %3225 = vrot.lane.b32.xlu2 %v3180_v6, %s4815_s5  ;;  %2762 = vrot.lane.b32.xlu0 %v2716_v59, %s4815_s5  ;;  %v2114_v6 = vadd.f32 %v2113_v53, %v2065_v18  ;;  %v8535_v59 = vld [vmem:[#allocation42_spill] sm:$0xff]  ;;  %v2066_v53 = vpop.f32.mrf.mxu3 }
 0x327   : > { %v2717_v62 = vmul.f32 %v8535_v59, %v7456_v24  ;;  %v2067_v52 = vadd.f32 %v2066_v53, %v2018_v30 }
 0x328   : > { %v3206_v8 = vpop.permute.xlu0 %3205  ;;  %3111 = vrot.lane.b32.xlu1 %v3067_v17, %s4815_s5  ;;  %v7459_v1 = vpop.permute.xlu2 %3097  ;;  %v2829_v17 = vmul.f32 %v8536_v43, %v7456_v24  ;;  %v7473_v49 = vmul.f32 %v6620_v2, %v2114_v6  ;;  %v8540_v6 = vpack.i.bf16 %v7178_v4, %v7180_v26 }
 0x329   : > { %8533 = vst [vmem:[#allocation40_spill] sm:$0xff] %v7459_v1 }
 0x32a   : > { %v7461_v60 = vpop.permute.xlu1 %3093  ;;  %8537 = vst [vmem:[#allocation39_spill] sm:$0xff] %v7473_v49  ;;  %v3069_v0 = vmul.f32 %v8532_v54, %v7473_v49  ;;  %v3181_v30 = vmul.f32 %v8526_v16, %v7473_v49  ;;  %v8543_v16 = vld [vmem:[#allocation37_spill] sm:$0xff] }
 0x32b   : > { %8534 = vst [vmem:[#allocation52_spill] sm:$0xff] %v7461_v60 }
 0x32e   : > { %2764 = vrot.lane.b32.xlu2 %v2717_v62, %s4815_s5  ;;  %3113 = vrot.lane.b32.xlu0 %v3068_v20, %s4815_s5  ;;  %v2116_v62 = vadd.f32 %v2115_v15, %v2067_v52  ;;  %v8539_v20 = vld [vmem:[#allocation65_spill] sm:$0xff]  ;;  %v8544_v15 = vld [vmem:[#allocation44_spill] sm:$0xff] }
 0x32f   : > { %v3151_v46 = vmul.f32 %v8493_v32, %v8539_v20 }
 0x330   : > { %v7475_v1 = vpop.permute.xlu0 %2744  ;;  %2876 = vrot.lane.b32.xlu1 %v2829_v17, %s4815_s5  ;;  %v7478_v18 = vpop.permute.xlu2 %2862  ;;  %v8541_v17 = vld [vmem:[#allocation51_spill] sm:$0xff]  ;;  %v7500_v52 = vmul.f32 %v6620_v2, %v2116_v62  ;;  %v8546_v2 = vld [vmem:[#allocation38_spill] sm:$0xff] }
 0x331   : > { %8538 = vst [vmem:[#allocation42_spill] sm:$0xff] %v7475_v1  ;;  %v3152_v53 = vmul.f32 %v8494_v3, %v8541_v17  ;;  %v3247_v54 = vadd.f32 %v7305_v25, %v3151_v46  ;;  %v8545_v3 = vpack.i.bf16 %v7272_v5, %v7270_v50  ;;  %v8547_v46 = vld [vmem:[#allocation41_spill] sm:$0xff] }
 0x332   : > { %v7480_v60 = vpop.permute.xlu1 %2858  ;;  %v3070_v25 = vmul.f32 %v8535_v59, %v7500_v52  ;;  %v2800_v62 = vmul.f32 %v8547_v46, %v8546_v2  ;;  %v7521_v50 = vld [vmem:[%s6298_s4 + $0x30] sm:$0xff]  ;;  %v3182_v10 = vmul.f32 %v8536_v43, %v7500_v52  ;;  %v3157_v43 = vmul.f32 %v7108_v9, %v7124_v45 }
 0x333   : > { %v3248_v4 = vadd.f32 %v7235_v57, %v3152_v53  ;;  %v2208_v5 = vmul.f32 %v7521_v50, %v6739_v58 }
 0x336   : > { %3115 = vrot.lane.b32.xlu2 %v3069_v0, %s4815_s5  ;;  %4398 = vrot.lane.b32.xlu0 %v8540_v6, %s4815_s5  ;;  %v4407_v0 = vpack.i.bf16 %v3248_v4, %v3247_v54  ;;  %v2801_v6 = vmul.f32 %v8544_v15, %v8543_v16  ;;  %v7526_v4 = vld [vmem:[%s6298_s4 + $0x38] sm:$0xff] }
 0x337   : > { %v2209_v59 = vmul.f32 %v7526_v4, %v6758_v37 }
 0x338   : > { %v7496_v1 = vpop.permute.xlu0 %3095  ;;  %3227 = vrot.lane.b32.xlu1 %v3181_v30, %s4815_s5  ;;  %v3214_v32 = vpop.permute.xlu2 %3213  ;;  %v2897_v57 = vadd.f32 %v7384_v27, %v2801_v6  ;;  %v3154_v30 = vmul.f32 %v8544_v15, %v7037_v63  ;;  %v2896_v27 = vadd.f32 %v7207_v19, %v2800_v62  ;;  %v3156_v19 = vmul.f32 %v7009_v56, %v7080_v33 }
 0x339   : > { %8542 = vst [vmem:[#allocation64_spill] sm:$0xff] %v7496_v1 }
 0x33a   : > { %v3210_v26 = vpop.permute.xlu1 %3209  ;;  %v3250_v15 = vadd.f32 %v3206_v8, %v3154_v30  ;;  %v4412_v63 = vpack.i.bf16 %v2897_v57, %v2896_v27  ;;  %v8550_v57 = vld [vmem:[#allocation43_spill] sm:$0xff] }
 0x33b   : > { %v8552_v27 = vld [vmem:[#allocation67_spill] sm:$0xff] }
 0x33e   : > { %4403 = vrot.lane.b32.xlu0 %v8545_v3, %s4815_s5  ;;  %4408 = vrot.lane.b32.xlu2 %v4407_v0, %s4815_s5  ;;  %v3153_v0 = vmul.f32 %v8547_v46, %v6999_v31  ;;  %v2368_v3 = vsub.f32 %v2208_v5, %v7045_v44  ;;  %v3252_v5 = vadd.f32 %v3210_v26, %v3156_v19 }
 0x340   : > { %v2861_v53 = vpop.permute.xlu0 %2860  ;;  %3117 = vrot.lane.b32.xlu1 %v3070_v25, %s4815_s5  ;;  %v7518_v54 = vpop.permute.xlu2 %2752  ;;  %v2369_v25 = vsub.f32 %v2209_v59, %v7053_v35  ;;  %v3249_v49 = vadd.f32 %v7416_v14, %v3153_v0  ;;  %v3158_v14 = vmul.f32 %v7097_v23, %v7143_v51  ;;  %v2803_v0 = vmul.f32 %v7009_v56, %v8552_v27 }
 0x341   : > { %8548 = vst [vmem:[#allocation65_spill] sm:$0xff] %v7518_v54 }
 0x342   : > { %v4379_v6 = vpop.permute.xlu1 %4378  ;;  %v4417_v46 = vpack.i.bf16 %v3250_v15, %v3249_v49  ;;  %v8549_v49 = vld [vmem:[#allocation68_spill] sm:$0xff] }
 0x343   : > { %v4381_v1 = vunpack.i.h.bf16 %v4379_v6  ;;  %v4380_v54 = vunpack.i.l.bf16 %v4379_v6  ;;  %v3155_v30 = vmul.f32 %v8550_v57, %v8549_v49 }
 0x345   : > { %v2626_v62 = vsel %vm2618_vm0, %v2369_v25, %v4381_v1  ;;  %v2625_v8 = vsel %vm2618_vm0, %v2368_v3, %v4380_v54  ;;  %v8551_v54 = vld [vmem:[#allocation49_spill] sm:$0xff]  ;;  %v3251_v15 = vadd.f32 %v7412_v22, %v3155_v30  ;;  %v2899_v25 = vadd.f32 %v7376_v13, %v2803_v0 }
 0x346   : > { %v2645_v44 = vsel %vm7280_vm1, %v6758_v37, %v2626_v62  ;;  %v2644_v35 = vsel %vm7280_vm1, %v6739_v58, %v2625_v8  ;;  %3229 = vrot.lane.b32.xlu0 %v3182_v10, %s4815_s5  ;;  %4413 = vrot.lane.b32.xlu2 %v4412_v63, %s4815_s5  ;;  %v2802_v37 = vmul.f32 %v8550_v57, %v8551_v54  ;;  %v7574_v8 = vld [vmem:[%s6298_s4 + $0x58] sm:$0xff]  ;;  %v7579_v22 = vld [vmem:[%s6298_s4 + $0x50] sm:$0xff] }
 0x347   : > { %v4028_v1 = vpack.c.bf16 %v2645_v44, %v2644_v35  ;;  %v3254_v63 = vadd.f32 %v3214_v32, %v3158_v14  ;;  %v4427_v19 = vpack.i.bf16 %v3252_v5, %v3251_v15  ;;  %v2805_v32 = vmul.f32 %v7097_v23, %v7102_v55  ;;  %8553 = vst [vmem:[#allocation51_spill] sm:$0xff] %v7574_v8  ;;  %v8554_v13 = vld [vmem:[#allocation69_spill] sm:$0xff]  ;;  %v8555_v14 = vld [vmem:[#allocation70_spill] sm:$0xff] }
 0x348   : > { %v3212_v59 = vpop.permute.xlu0 %3211  ;;  %4418 = vrot.lane.b32.xlu1 %v4417_v46, %s4815_s5  ;;  %v7559_v58 = vpop.permute.xlu2 %3103  ;;  %v2898_v6 = vadd.f32 %v7438_v12, %v2802_v37  ;;  %v2213_v56 = vmul.f32 %v7574_v8, %v6830_v36  ;;  %v2212_v12 = vmul.f32 %v7579_v22, %v6809_v34  ;;  %v2804_v46 = vmul.f32 %v7108_v9, %v8554_v13 }
 0x349   : > { %4132 = vst [vmem:[%s7310_s19 + $0x18] sm:$0xff] %v4028_v1   ;;  %v3253_v10 = vadd.f32 %v3212_v59, %v3157_v43  ;;  %v2901_v44 = vadd.f32 %v2861_v53, %v2805_v32  ;;  %v8556_v43 = vld [vmem:[#allocation71_spill] sm:$0xff] }
 0x34a   : > { %v7566_v3 = vpop.permute.xlu1 %2748  ;;  %v4422_v62 = vpack.i.bf16 %v2899_v25, %v2898_v6  ;;  %v2373_v1 = vsub.f32 %v2213_v56, %v8555_v14  ;;  %v2372_v57 = vsub.f32 %v2212_v12, %v8556_v43  ;;  %v2900_v5 = vadd.f32 %v7480_v60, %v2804_v46  ;;  %v8557_v25 = vld [vmem:[#allocation77_spill] sm:$0xff]  ;;  %v7611_v12 = vld [vmem:[%s6298_s4 + $0x40] sm:$0xff] }
 0x34b   : > { %v4437_v26 = vpack.i.bf16 %v3254_v63, %v3253_v10 }
 0x34c   : > { %v4432_v53 = vpack.i.bf16 %v2901_v44, %v2900_v5  ;;  %v7616_v44 = vld [vmem:[%s6298_s4 + $0x48] sm:$0xff] }
 0x34e   : > { %4428 = vrot.lane.b32.xlu0 %v4427_v19, %s4815_s5  ;;  %4438 = vrot.lane.b32.xlu2 %v4437_v26, %s4815_s5  ;;  %v2806_v26 = vmul.f32 %v7189_v39, %v7127_v47  ;;  %v2807_v19 = vmul.f32 %v8557_v25, %v7161_v41 }
 0x350   : > { %v7585_v35 = vpop.permute.xlu0 %2750  ;;  %4423 = vrot.lane.b32.xlu1 %v4422_v62, %s4815_s5  ;;  %v4389_v23 = vpop.permute.xlu2 %4388 }
 0x351   : > { %v4391_v30 = vunpack.i.h.bf16 %v4389_v23  ;;  %v4390_v37 = vunpack.i.l.bf16 %v4389_v23  ;;  %v8559_v23 = vld [vmem:[#allocation29_spill] sm:$0xff] }
 0x352   : > { %v7591_v59 = vpop.permute.xlu1 %3099  ;;  %v2211_v14 = vmul.f32 %v7616_v44, %v8559_v23 }
 0x353   : > { %v2630_v63 = vsel %vm2618_vm0, %v2373_v1, %v4391_v30  ;;  %v2629_v9 = vsel %vm2618_vm0, %v2372_v57, %v4390_v37  ;;  %v8560_v57 = vld [vmem:[#allocation32_spill] sm:$0xff]  ;;  %v8561_v30 = vld [vmem:[#allocation53_spill] sm:$0xff] }
 0x354   : > { %v2649_v10 = vsel %vm7280_vm1, %v6830_v36, %v2630_v63  ;;  %v2648_v0 = vsel %vm7280_vm1, %v6809_v34, %v2629_v9  ;;  %v2902_v36 = vadd.f32 %v7478_v18, %v2806_v26  ;;  %v8558_v34 = vld [vmem:[#allocation46_spill] sm:$0xff]  ;;  %v2371_v37 = vsub.f32 %v2211_v14, %v8561_v30 }
 0x355   : > { %v4038_v15 = vpack.c.bf16 %v2649_v10, %v2648_v0  ;;  %v2210_v46 = vmul.f32 %v7611_v12, %v8558_v34  ;;  %v8566_v30 = vld [vmem:[#allocation82_spill] sm:$0xff] }
 0x356   : > { %4433 = vrot.lane.b32.xlu0 %v4432_v53, %s4815_s5 }
 0x357   : > { %4134 = vst [vmem:[%s7310_s19 + $0x28] sm:$0xff] %v4038_v15   ;;  %v2370_v18 = vsub.f32 %v2210_v46, %v8560_v57  ;;  %v3160_v46 = vmul.f32 %v8557_v25, %v7262_v29 }
 0x358   : > { %v7603_v60 = vpop.permute.xlu0 %3101  ;;  %v2869_v6 = vpop.permute.xlu2 %2868 }
 0x35a   : > { %v2865_v62 = vpop.permute.xlu1 %2864 }
 0x35b   : > { %v2903_v32 = vadd.f32 %v2865_v62, %v2807_v19 }
 0x35d   : > { %v4442_v56 = vpack.i.bf16 %v2903_v32, %v2902_v36  ;;  %v8564_v32 = vld [vmem:[#allocation78_spill] sm:$0xff] }
 0x35f   : > { %4443 = vrot.lane.b32.xlu2 %v4442_v56, %s4815_s5  ;;  %v3159_v56 = vmul.f32 %v7189_v39, %v8564_v32 }
 0x360   : > { %v4384_v1 = vpop.permute.xlu0 %4383  ;;  %v7621_v43 = vpop.permute.xlu2 %3219 }
 0x361   : > { %v4386_v5 = vunpack.i.h.bf16 %v4384_v1  ;;  %v4385_v63 = vunpack.i.l.bf16 %v4384_v1 }
 0x362   : > { %v3216_v9 = vpop.permute.xlu1 %3215 }
 0x363   : > { %v2628_v53 = vsel %vm2618_vm0, %v2371_v37, %v4386_v5  ;;  %v2627_v10 = vsel %vm2618_vm0, %v2370_v18, %v4385_v63  ;;  %v8567_v37 = vld [vmem:[#allocation81_spill] sm:$0xff]  ;;  %v8568_v63 = vld [vmem:[#allocation80_spill] sm:$0xff] }
 0x364   : > { %v2647_v0 = vsel %vm7280_vm1, %v8559_v23, %v2628_v53  ;;  %v2646_v15 = vsel %vm7280_vm1, %v8558_v34, %v2627_v10  ;;  %v3255_v23 = vadd.f32 %v3216_v9, %v3159_v56  ;;  %v2808_v5 = vmul.f32 %v8567_v37, %v8566_v30 }
 0x365   : > { %v4033_v26 = vpack.c.bf16 %v2647_v0, %v2646_v15  ;;  %v2809_v39 = vmul.f32 %v8568_v63, %v7265_v40 }
 0x367   : > { %4133 = vst [vmem:[%s7310_s19 + $0x20] sm:$0xff] %v4033_v26   ;;  %v2905_v9 = vadd.f32 %v2869_v6, %v2809_v39  ;;  %v8573_v39 = vld [vmem:[#allocation48_spill] sm:$0xff] }
 0x368   : > { %v2867_v19 = vpop.permute.xlu0 %2866  ;;  %v7634_v62 = vpop.permute.xlu2 %2758 }
 0x369   : > { %8562 = vst [vmem:[#allocation37_spill] sm:$0xff] %v7634_v62  ;;  %v2904_v53 = vadd.f32 %v2867_v19, %v2808_v5  ;;  %v2811_v19 = vmul.f32 %v7366_v11, %v7371_v21  ;;  %v7672_v5 = vld [vmem:[%s6298_s4 + $0x68] sm:$0xff] }
 0x36a   : > { %v7636_v36 = vpop.permute.xlu1 %2754 }
 0x36b   : > { %8563 = vst [vmem:[#allocation44_spill] sm:$0xff] %v7636_v36  ;;  %v4452_v15 = vpack.i.bf16 %v2905_v9, %v2904_v53  ;;  %v2215_v53 = vmul.f32 %v7672_v5, %v8573_v39 }
 0x370   : > { %v3218_v14 = vpop.permute.xlu0 %3217  ;;  %v7642_v1 = vpop.permute.xlu2 %3109 }
 0x371   : > { %8565 = vst [vmem:[#allocation38_spill] sm:$0xff] %v7642_v1  ;;  %v3256_v57 = vadd.f32 %v3218_v14, %v3160_v46  ;;  %v2810_v14 = vmul.f32 %v7379_v38, %v7314_v61  ;;  %v8575_v61 = vld [vmem:[#allocation73_spill] sm:$0xff] }
 0x372   : > { %v7644_v18 = vpop.permute.xlu1 %3105  ;;  %v2375_v21 = vsub.f32 %v2215_v53, %v8575_v61 }
 0x373   : > { %v4447_v34 = vpack.i.bf16 %v3256_v57, %v3255_v23  ;;  %v7665_v23 = vld [vmem:[%s6298_s4 + $0x60] sm:$0xff] }
 0x374   : > { %8571 = vst [vmem:[#allocation43_spill] sm:$0xff] %v7665_v23  ;;  %v2214_v6 = vmul.f32 %v7665_v23, %v8518_v48  ;;  %v3162_v23 = vmul.f32 %v8568_v63, %v7342_v28 }
 0x375   : > { %4448 = vrot.lane.b32.xlu1 %v4447_v34, %s4815_s5 }
 0x378   : > { %v7651_v25 = vpop.permute.xlu0 %2756  ;;  %v7653_v10 = vpop.permute.xlu2 %2874 }
 0x379   : > { %8569 = vst [vmem:[#allocation41_spill] sm:$0xff] %v7651_v25 }
 0x37a   : > { %v2871_v0 = vpop.permute.xlu1 %2870 }
 0x37b   : > { %v2906_v9 = vadd.f32 %v2871_v0, %v2810_v14 }
 0x37d   : > { %4453 = vrot.lane.b32.xlu1 %v4452_v15, %s4815_s5 }
 0x380   : > { %v7656_v26 = vpop.permute.xlu0 %3107  ;;  %v7658_v56 = vpop.permute.xlu2 %3225 }
 0x381   : > { %8570 = vst [vmem:[#allocation68_spill] sm:$0xff] %v7656_v26  ;;  %v8574_v26 = vld [vmem:[#allocation55_spill] sm:$0xff] }
 0x382   : > { %v3222_v46 = vpop.permute.xlu1 %3221  ;;  %v2374_v1 = vsub.f32 %v2214_v6, %v8574_v26  ;;  %v8576_v26 = vld [vmem:[#allocation31_spill] sm:$0xff] }
 0x383   : > { %v3258_v14 = vadd.f32 %v3222_v46, %v3162_v23  ;;  %v8582_v23 = vld [vmem:[#allocation88_spill] sm:$0xff] }
 0x388   : > { %v2873_v57 = vpop.permute.xlu0 %2872  ;;  %v7669_v34 = vpop.permute.xlu2 %2764 }
 0x389   : > { %8572 = vst [vmem:[#allocation49_spill] sm:$0xff] %v7669_v34  ;;  %v2907_v15 = vadd.f32 %v2873_v57, %v2811_v19 }
 0x38a   : > { %v4394_v62 = vpop.permute.xlu1 %4393 }
 0x38b   : > { %v4457_v25 = vpack.i.bf16 %v2907_v15, %v2906_v9  ;;  %v4396_v36 = vunpack.i.h.bf16 %v4394_v62  ;;  %v4395_v8 = vunpack.i.l.bf16 %v4394_v62  ;;  %v3161_v62 = vmul.f32 %v8567_v37, %v8576_v26 }
 0x38d   : > { %v2632_v34 = vsel %vm2618_vm0, %v2375_v21, %v4396_v36  ;;  %v2631_v40 = vsel %vm2618_vm0, %v2374_v1, %v4395_v8  ;;  %4458 = vrot.lane.b32.xlu0 %v4457_v25, %s4815_s5  ;;  %v3257_v21 = vadd.f32 %v7621_v43, %v3161_v62  ;;  %v8579_v1 = vld [vmem:[#allocation83_spill] sm:$0xff] }
 0x38e   : > { %v2651_v0 = vsel %vm7280_vm1, %v8573_v39, %v2632_v34  ;;  %v2650_v61 = vsel %vm7280_vm1, %v8518_v48, %v2631_v40  ;;  %v3039_v25 = vmul.f32 %v8579_v1, %v8539_v20  ;;  %v8580_v40 = vld [vmem:[#allocation84_spill] sm:$0xff] }
 0x38f   : > { %v4043_v19 = vpack.c.bf16 %v2651_v0, %v2650_v61  ;;  %v4467_v36 = vpack.i.bf16 %v3258_v14, %v3257_v21  ;;  %v3040_v48 = vmul.f32 %v8580_v40, %v8541_v17  ;;  %v8583_v34 = vld [vmem:[#allocation60_spill] sm:$0xff] }
 0x390   : > { %v3224_v63 = vpop.permute.xlu0 %3223  ;;  %v7691_v6 = vpop.permute.xlu2 %3115  ;;  %v3135_v57 = vsub.f32 %v3039_v25, %v8582_v23  ;;  %v8588_v23 = vld [vmem:[#allocation76_spill] sm:$0xff] }
 0x391   : > { %8577 = vst [vmem:[#allocation67_spill] sm:$0xff] %v7691_v6  ;;  %v3136_v43 = vsub.f32 %v3040_v48, %v8583_v34  ;;  %v8587_v48 = vld [vmem:[#allocation61_spill] sm:$0xff] }
 0x392   : > { %4135 = vst [vmem:[%s7310_s19 + $0x30] sm:$0xff] %v4043_v19   ;;  %v7695_v8 = vpop.permute.xlu1 %2760  ;;  %v8585_v19 = vld [vmem:[#allocation45_spill] sm:$0xff] }
 0x393   : > { %8578 = vst [vmem:[#allocation69_spill] sm:$0xff] %v7695_v8  ;;  %v2689_v21 = vmul.f32 %v8585_v19, %v8543_v16 }
 0x395   : > { %4468 = vrot.lane.b32.xlu0 %v4467_v36, %s4815_s5  ;;  %v8586_v36 = vld [vmem:[#allocation50_spill] sm:$0xff] }
 0x396   : > { %v2688_v25 = vmul.f32 %v8586_v36, %v8546_v2 }
 0x398   : > { %v7702_v37 = vpop.permute.xlu0 %2762  ;;  %v4409_v46 = vpop.permute.xlu2 %4408 }
 0x399   : > { %8581 = vst [vmem:[#allocation70_spill] sm:$0xff] %v7702_v37  ;;  %v4411_v39 = vunpack.i.h.bf16 %v4409_v46  ;;  %v4410_v53 = vunpack.i.l.bf16 %v4409_v46  ;;  %v2785_v46 = vsub.f32 %v2689_v21, %v8587_v48 }
 0x39a   : > { %v7706_v9 = vpop.permute.xlu1 %3111 }
 0x39b   : > { %8584 = vst [vmem:[#allocation71_spill] sm:$0xff] %v7706_v9  ;;  %v3328_v15 = vsel %vm2618_vm0, %v3136_v43, %v4411_v39  ;;  %v3327_v0 = vsel %vm2618_vm0, %v3135_v57, %v4410_v53  ;;  %v2812_v57 = vmul.f32 %v8588_v23, %v7409_v7  ;;  %v8590_v43 = vld [vmem:[#allocation86_spill] sm:$0xff] }
 0x39c   : > { %v3344_v61 = vsel %vm7280_vm1, %v8541_v17, %v3328_v15  ;;  %v3343_v62 = vsel %vm7280_vm1, %v8539_v20, %v3327_v0  ;;  %v2784_v20 = vsub.f32 %v2688_v25, %v8590_v43  ;;  %v8591_v15 = vld [vmem:[#allocation75_spill] sm:$0xff] }
 0x39d   : > { %v4093_v14 = vpack.c.bf16 %v3344_v61, %v3343_v62  ;;  %v2813_v0 = vmul.f32 %v8591_v15, %v7456_v24  ;;  %v2908_v62 = vadd.f32 %v7653_v10, %v2812_v57  ;;  %v8593_v43 = vld [vmem:[#allocation59_spill] sm:$0xff] }
 0x39e   : > { %v7744_v10 = vld [vmem:[%s6298_s4 + $0x78] sm:$0xff] }
 0x39f   : > { %4145 = vst [vmem:[%s7310_s19 + $0x80] sm:$0xff] %v4093_v14  }
 0x3a0   : > { %v7724_v17 = vpop.permute.xlu0 %3113  ;;  %v4414_v34 = vpop.permute.xlu2 %4413 }
 0x3a1   : > { %8589 = vst [vmem:[#allocation77_spill] sm:$0xff] %v7724_v17  ;;  %v4416_v39 = vunpack.i.h.bf16 %v4414_v34  ;;  %v4415_v53 = vunpack.i.l.bf16 %v4414_v34  ;;  %v7739_v34 = vld [vmem:[%s6298_s4 + $0x70] sm:$0xff] }
 0x3a2   : > { %v2877_v61 = vpop.permute.xlu1 %2876  ;;  %8592 = vst [vmem:[#allocation46_spill] sm:$0xff] %v7739_v34  ;;  %v2216_v17 = vmul.f32 %v7739_v34, %v8593_v43 }
 0x3a3   : > { %v2977_v14 = vsel %vm2618_vm0, %v2785_v46, %v4416_v39  ;;  %v2976_v21 = vsel %vm2618_vm0, %v2784_v20, %v4415_v53  ;;  %v2909_v48 = vadd.f32 %v2877_v61, %v2813_v0  ;;  %v8594_v46 = vld [vmem:[#allocation36_spill] sm:$0xff]  ;;  %v3045_v53 = vmul.f32 %v7521_v50, %v7124_v45  ;;  %v8595_v0 = vld [vmem:[#allocation54_spill] sm:$0xff] }
 0x3a4   : > { %v2993_v6 = vsel %vm7280_vm1, %v8543_v16, %v2977_v14  ;;  %v2992_v25 = vsel %vm7280_vm1, %v8546_v2, %v2976_v21  ;;  %v2217_v57 = vmul.f32 %v7744_v10, %v8594_v46  ;;  %v3046_v16 = vmul.f32 %v7526_v4, %v7143_v51  ;;  %v8596_v61 = vld [vmem:[#allocation72_spill] sm:$0xff]  ;;  %v8597_v21 = vld [vmem:[#allocation79_spill] sm:$0xff] }
 0x3a5   : > { %v4058_v20 = vpack.c.bf16 %v2993_v6, %v2992_v25  ;;  %v4462_v39 = vpack.i.bf16 %v2909_v48, %v2908_v62  ;;  %v3163_v2 = vmul.f32 %v7379_v38, %v8595_v0  ;;  %v2376_v14 = vsub.f32 %v2216_v17, %v8596_v61  ;;  %v8598_v62 = vld [vmem:[#allocation30_spill] sm:$0xff] }
 0x3a6   : > { %v2377_v9 = vsub.f32 %v2217_v57, %v8597_v21  ;;  %v3141_v26 = vsub.f32 %v3045_v53, %v7591_v59  ;;  %v3142_v6 = vsub.f32 %v3046_v16, %v7603_v60  ;;  %v3164_v48 = vmul.f32 %v7366_v11, %v8598_v62  ;;  %v8600_v53 = vld [vmem:[#allocation35_spill] sm:$0xff] }
 0x3a7   : > { %4138 = vst [vmem:[%s7310_s19 + $0x48] sm:$0xff] %v4058_v20   ;;  %4463 = vrot.lane.b32.xlu2 %v4462_v39, %s4815_s5  ;;  %v3259_v25 = vadd.f32 %v3224_v63, %v3163_v2 }
 0x3a8   : > { %v4399_v28 = vpop.permute.xlu0 %4398  ;;  %v4439_v37 = vpop.permute.xlu2 %4438  ;;  %v3260_v17 = vadd.f32 %v7658_v56, %v3164_v48 }
 0x3a9   : > { %v4401_v8 = vunpack.i.h.bf16 %v4399_v28  ;;  %v4400_v34 = vunpack.i.l.bf16 %v4399_v28  ;;  %v4441_v38 = vunpack.i.h.bf16 %v4439_v37  ;;  %v4440_v0 = vunpack.i.l.bf16 %v4439_v37 }
 0x3aa   : > { %v3228_v57 = vpop.permute.xlu1 %3227  ;;  %v4472_v37 = vpack.i.bf16 %v3260_v17, %v3259_v25  ;;  %v3041_v25 = vmul.f32 %v8586_v36, %v6999_v31 }
 0x3ab   : > { %v2634_v20 = vsel %vm2618_vm0, %v2377_v9, %v4401_v8  ;;  %v2633_v59 = vsel %vm2618_vm0, %v2376_v14, %v4400_v34  ;;  %v3334_v60 = vsel %vm2618_vm0, %v3142_v6, %v4441_v38  ;;  %v3333_v11 = vsel %vm2618_vm0, %v3141_v26, %v4440_v0  ;;  %v8599_v26 = vld [vmem:[#allocation63_spill] sm:$0xff]  ;;  %v8602_v0 = vld [vmem:[#allocation85_spill] sm:$0xff] }
 0x3ac   : > { %v2653_v63 = vsel %vm7280_vm1, %v8594_v46, %v2634_v20  ;;  %v2652_v28 = vsel %vm7280_vm1, %v8593_v43, %v2633_v59  ;;  %v3350_v56 = vsel %vm7280_vm1, %v7143_v51, %v3334_v60  ;;  %v3349_v8 = vsel %vm7280_vm1, %v7124_v45, %v3333_v11  ;;  %v8601_v51 = vld [vmem:[#allocation74_spill] sm:$0xff]  ;;  %v8603_v38 = vld [vmem:[#allocation39_spill] sm:$0xff] }
 0x3ad   : > { %v4048_v9 = vpack.c.bf16 %v2653_v63, %v2652_v28  ;;  %v4108_v34 = vpack.c.bf16 %v3350_v56, %v3349_v8  ;;  %v2686_v39 = vmul.f32 %v8579_v1, %v8599_v26  ;;  %v2687_v46 = vmul.f32 %v8580_v40, %v8600_v53  ;;  %v8604_v63 = vld [vmem:[#allocation28_spill] sm:$0xff]  ;;  %v8605_v56 = vld [vmem:[#allocation66_spill] sm:$0xff] }
 0x3ae   : > { %v3165_v17 = vmul.f32 %v8588_v23, %v8603_v38  ;;  %v3166_v20 = vmul.f32 %v8591_v15, %v7500_v52  ;;  %v2695_v59 = vmul.f32 %v7616_v44, %v7161_v41  ;;  %v2694_v60 = vmul.f32 %v7611_v12, %v7127_v47  ;;  %v8606_v23 = vld [vmem:[#allocation65_spill] sm:$0xff] }
 0x3af   : > { %4136 = vst [vmem:[%s7310_s19 + $0x38] sm:$0xff] %v4048_v9   ;;  %4473 = vrot.lane.b32.xlu2 %v4472_v37, %s4815_s5  ;;  %v2782_v16 = vsub.f32 %v2686_v39, %v8601_v51  ;;  %v2783_v2 = vsub.f32 %v2687_v46, %v8602_v0  ;;  %v3137_v28 = vsub.f32 %v3041_v25, %v8604_v63  ;;  %v8607_v46 = vld [vmem:[#allocation52_spill] sm:$0xff] }
 0x3b0   : > { %4148 = vst [vmem:[%s7310_s19 + $0x98] sm:$0xff] %v4108_v34   ;;  %v4404_v43 = vpop.permute.xlu0 %4403  ;;  %v3042_v8 = vmul.f32 %v8585_v19, %v8605_v56  ;;  %v3261_v36 = vadd.f32 %v3228_v57, %v3165_v17  ;;  %v2791_v34 = vsub.f32 %v2695_v59, %v8606_v23  ;;  %v8611_v63 = vld [vmem:[#allocation64_spill] sm:$0xff] }
 0x3b1   : > { %v4406_v45 = vunpack.i.h.bf16 %v4404_v43  ;;  %v4405_v61 = vunpack.i.l.bf16 %v4404_v43 }
 0x3b2   : > { %v7788_v14 = vpop.permute.xlu1 %3117  ;;  %v3138_v43 = vsub.f32 %v3042_v8, %v8607_v46  ;;  %v8612_v8 = vld [vmem:[#allocation62_spill] sm:$0xff] }
 0x3b3   : > { %v2975_v21 = vsel %vm2618_vm0, %v2783_v2, %v4406_v45  ;;  %v2974_v1 = vsel %vm2618_vm0, %v2782_v16, %v4405_v61 }
 0x3b4   : > { %v2991_v40 = vsel %vm7280_vm1, %v8600_v53, %v2975_v21  ;;  %v2990_v6 = vsel %vm7280_vm1, %v8599_v26, %v2974_v1  ;;  %v2790_v26 = vsub.f32 %v2694_v60, %v7585_v35  ;;  %v8610_v60 = vld [vmem:[#allocation40_spill] sm:$0xff] }
 0x3b5   : > { %v4053_v48 = vpack.c.bf16 %v2991_v40, %v2990_v6  ;;  %v8608_v40 = vld [vmem:[#allocation57_spill] sm:$0xff] }
 0x3b6   : > { %v3044_v6 = vmul.f32 %v8608_v40, %v7080_v33 }
 0x3b7   : > { %4137 = vst [vmem:[%s7310_s19 + $0x40] sm:$0xff] %v4053_v48  }
 0x3b8   : > { %v3230_v11 = vpop.permute.xlu0 %3229 }
 0x3b9   : > { %v3262_v37 = vadd.f32 %v3230_v11, %v3166_v20  ;;  %v4444_v9 = vpop.permute.xlu2 %4443  ;;  %v2691_v20 = vmul.f32 %v8608_v40, %v8552_v27  ;;  %v3140_v11 = vsub.f32 %v3044_v6, %v8610_v60  ;;  %v3048_v40 = vmul.f32 %v7616_v44, %v7262_v29 }
 0x3ba   : > { %v4446_v15 = vunpack.i.h.bf16 %v4444_v9  ;;  %v4445_v39 = vunpack.i.l.bf16 %v4444_v9  ;;  %v4419_v53 = vpop.permute.xlu1 %4418 }
 0x3bb   : > { %v4477_v51 = vpack.i.bf16 %v3262_v37, %v3261_v36  ;;  %v4421_v16 = vunpack.i.h.bf16 %v4419_v53  ;;  %v4420_v0 = vunpack.i.l.bf16 %v4419_v53  ;;  %v8613_v37 = vld [vmem:[#allocation42_spill] sm:$0xff] }
 0x3bc   : > { %v2983_v2 = vsel %vm2618_vm0, %v2791_v34, %v4446_v15  ;;  %v2982_v19 = vsel %vm2618_vm0, %v2790_v26, %v4445_v39  ;;  %v2787_v9 = vsub.f32 %v2691_v20, %v8613_v37 }
 0x3bd   : > { %v2999_v57 = vsel %vm7280_vm1, %v7161_v41, %v2983_v2  ;;  %v2998_v35 = vsel %vm7280_vm1, %v7127_v47, %v2982_v19  ;;  %v3330_v45 = vsel %vm2618_vm0, %v3138_v43, %v4421_v16  ;;  %v3329_v61 = vsel %vm2618_vm0, %v3137_v28, %v4420_v0  ;;  %4478 = vrot.lane.b32.xlu1 %v4477_v51, %s4815_s5  ;;  %v8609_v47 = vld [vmem:[#allocation47_spill] sm:$0xff] }
 0x3be   : > { %v4073_v21 = vpack.c.bf16 %v2999_v57, %v2998_v35  ;;  %v3346_v1 = vsel %vm7280_vm1, %v8605_v56, %v3330_v45  ;;  %v3345_v41 = vsel %vm7280_vm1, %v6999_v31, %v3329_v61  ;;  %v3043_v48 = vmul.f32 %v8609_v47, %v8549_v49  ;;  %v8614_v35 = vld [vmem:[#allocation58_spill] sm:$0xff] }
 0x3bf   : > { %v4098_v25 = vpack.c.bf16 %v3346_v1, %v3345_v41  ;;  %v2690_v17 = vmul.f32 %v8609_v47, %v8551_v54 }
 0x3c0   : > { %4141 = vst [vmem:[%s7310_s19 + $0x60] sm:$0xff] %v4073_v21   ;;  %v4429_v59 = vpop.permute.xlu0 %4428  ;;  %v3139_v28 = vsub.f32 %v3043_v48, %v8611_v63  ;;  %v3144_v48 = vsub.f32 %v3048_v40, %v7644_v18  ;;  %v8615_v18 = vld [vmem:[#allocation56_spill] sm:$0xff] }
 0x3c1   : > { %4146 = vst [vmem:[%s7310_s19 + $0x88] sm:$0xff] %v4098_v25   ;;  %v4431_v31 = vunpack.i.h.bf16 %v4429_v59  ;;  %v4430_v56 = vunpack.i.l.bf16 %v4429_v59  ;;  %v2786_v36 = vsub.f32 %v2690_v17, %v8612_v8  ;;  %v8616_v59 = vld [vmem:[#allocation51_spill] sm:$0xff]  ;;  %v8617_v63 = vld [vmem:[#allocation44_spill] sm:$0xff] }
 0x3c2   : > { %v4424_v23 = vpop.permute.xlu1 %4423  ;;  %v2697_v60 = vmul.f32 %v8616_v59, %v8615_v18 }
 0x3c3   : > { %v3331_v34 = vsel %vm2618_vm0, %v3139_v28, %v4430_v56  ;;  %v3332_v26 = vsel %vm2618_vm0, %v3140_v11, %v4431_v31  ;;  %v4426_v15 = vunpack.i.h.bf16 %v4424_v23  ;;  %v4425_v39 = vunpack.i.l.bf16 %v4424_v23  ;;  %v8618_v31 = vld [vmem:[#allocation41_spill] sm:$0xff] }
 0x3c4   : > { %v3347_v53 = vsel %vm7280_vm1, %v8549_v49, %v3331_v34  ;;  %v3348_v46 = vsel %vm7280_vm1, %v7080_v33, %v3332_v26  ;;  %v2692_v49 = vmul.f32 %v7521_v50, %v8554_v13  ;;  %v2693_v33 = vmul.f32 %v7526_v4, %v7102_v55  ;;  %v8619_v34 = vld [vmem:[#allocation34_spill] sm:$0xff]  ;;  %v8620_v26 = vld [vmem:[#allocation43_spill] sm:$0xff] }
 0x3c5   : > { %v4103_v43 = vpack.c.bf16 %v3348_v46, %v3347_v53  ;;  %v2979_v51 = vsel %vm2618_vm0, %v2787_v9, %v4426_v15  ;;  %v2978_v16 = vsel %vm2618_vm0, %v2786_v36, %v4425_v39  ;;  %v2793_v56 = vsub.f32 %v2697_v60, %v8618_v31  ;;  %v8621_v39 = vld [vmem:[#allocation33_spill] sm:$0xff] }
 0x3c6   : > { %v2995_v0 = vsel %vm7280_vm1, %v8552_v27, %v2979_v51  ;;  %v2994_v2 = vsel %vm7280_vm1, %v8551_v54, %v2978_v16  ;;  %v2788_v45 = vsub.f32 %v2692_v49, %v8614_v35  ;;  %v2789_v61 = vsub.f32 %v2693_v33, %v7566_v3  ;;  %v8624_v49 = vld [vmem:[#allocation69_spill] sm:$0xff] }
 0x3c7   : > { %4147 = vst [vmem:[%s7310_s19 + $0x90] sm:$0xff] %v4103_v43   ;;  %v4063_v19 = vpack.c.bf16 %v2995_v0, %v2994_v2  ;;  %v3047_v3 = vmul.f32 %v7611_v12, %v8564_v32  ;;  %v2698_v15 = vmul.f32 %v8620_v26, %v8619_v34  ;;  %v2699_v53 = vmul.f32 %v7672_v5, %v8621_v39  ;;  %v8622_v43 = vld [vmem:[#allocation46_spill] sm:$0xff]  ;;  %v8623_v0 = vld [vmem:[#allocation37_spill] sm:$0xff] }
 0x3c8   : > { %v4434_v57 = vpop.permute.xlu0 %4433  ;;  %v2701_v46 = vmul.f32 %v7744_v10, %v7456_v24  ;;  %v2700_v51 = vmul.f32 %v8622_v43, %v7409_v7 }
 0x3c9   : > { %4139 = vst [vmem:[%s7310_s19 + $0x50] sm:$0xff] %v4063_v19   ;;  %v4436_v27 = vunpack.i.h.bf16 %v4434_v57  ;;  %v4435_v21 = vunpack.i.l.bf16 %v4434_v57  ;;  %v3143_v47 = vsub.f32 %v3047_v3, %v7559_v58  ;;  %v2696_v58 = vmul.f32 %v7579_v22, %v8566_v30  ;;  %v8625_v57 = vld [vmem:[#allocation49_spill] sm:$0xff] }
 0x3ca   : > { %v2794_v2 = vsub.f32 %v2698_v15, %v8623_v0  ;;  %v2795_v33 = vsub.f32 %v2699_v53, %v8624_v49  ;;  %v2797_v35 = vsub.f32 %v2701_v46, %v8625_v57  ;;  %v3053_v46 = vmul.f32 %v8622_v43, %v8603_v38  ;;  %v8634_v0 = vld [vmem:[#allocation67_spill] sm:$0xff] }
 0x3cb   : > { %v2981_v1 = vsel %vm2618_vm0, %v2789_v61, %v4436_v27  ;;  %v2980_v54 = vsel %vm2618_vm0, %v2788_v45, %v4435_v21  ;;  %v2792_v28 = vsub.f32 %v2696_v58, %v8617_v63  ;;  %v8626_v45 = vld [vmem:[#allocation70_spill] sm:$0xff]  ;;  %v3052_v58 = vmul.f32 %v7672_v5, %v8598_v62 }
 0x3cc   : > { %v2997_v50 = vsel %vm7280_vm1, %v7102_v55, %v2981_v1  ;;  %v2996_v4 = vsel %vm7280_vm1, %v8554_v13, %v2980_v54  ;;  %v2796_v61 = vsub.f32 %v2700_v51, %v8626_v45  ;;  %v3054_v51 = vmul.f32 %v7744_v10, %v7500_v52 }
 0x3cd   : > { %v4068_v41 = vpack.c.bf16 %v2997_v50, %v2996_v4 }
 0x3cf   : > { %4140 = vst [vmem:[%s7310_s19 + $0x58] sm:$0xff] %v4068_v41  }
 0x3e7   : > { %v4449_v6 = vpop.permute.xlu1 %4448 }
 0x3e8   : > { %v4451_v25 = vunpack.i.h.bf16 %v4449_v6  ;;  %v4450_v55 = vunpack.i.l.bf16 %v4449_v6 }
 0x3ea   : > { %v3336_v17 = vsel %vm2618_vm0, %v3144_v48, %v4451_v25  ;;  %v3335_v13 = vsel %vm2618_vm0, %v3143_v47, %v4450_v55  ;;  %v8627_v25 = vld [vmem:[#allocation87_spill] sm:$0xff] }
 0x3eb   : > { %v3352_v20 = vsel %vm7280_vm1, %v7262_v29, %v3336_v17  ;;  %v3351_v12 = vsel %vm7280_vm1, %v8564_v32, %v3335_v13  ;;  %v3050_v55 = vmul.f32 %v8616_v59, %v8627_v25  ;;  %v8628_v17 = vld [vmem:[#allocation31_spill] sm:$0xff] }
 0x3ec   : > { %v4113_v44 = vpack.c.bf16 %v3352_v20, %v3351_v12  ;;  %v3049_v13 = vmul.f32 %v7579_v22, %v8628_v17  ;;  %v8629_v12 = vld [vmem:[#allocation54_spill] sm:$0xff]  ;;  %v8633_v22 = vld [vmem:[#allocation77_spill] sm:$0xff] }
 0x3ee   : > { %4149 = vst [vmem:[%s7310_s19 + $0xa0] sm:$0xff] %v4113_v44   ;;  %v3051_v44 = vmul.f32 %v8620_v26, %v8629_v12 }
 0x3ef   : > { %v4454_v11 = vpop.permute.xlu1 %4453 }
 0x3f0   : > { %v4456_v8 = vunpack.i.h.bf16 %v4454_v11  ;;  %v4455_v29 = vunpack.i.l.bf16 %v4454_v11  ;;  %v8631_v11 = vld [vmem:[#allocation68_spill] sm:$0xff] }
 0x3f1   : > { %v3145_v63 = vsub.f32 %v3049_v13, %v8631_v11 }
 0x3f2   : > { %v2985_v36 = vsel %vm2618_vm0, %v2793_v56, %v4456_v8  ;;  %v2984_v37 = vsel %vm2618_vm0, %v2792_v28, %v4455_v29  ;;  %v8632_v28 = vld [vmem:[#allocation71_spill] sm:$0xff]  ;;  %v3148_v56 = vsub.f32 %v3052_v58, %v8633_v22 }
 0x3f3   : > { %v3001_v32 = vsel %vm7280_vm1, %v8615_v18, %v2985_v36  ;;  %v3000_v9 = vsel %vm7280_vm1, %v8566_v30, %v2984_v37  ;;  %v3147_v31 = vsub.f32 %v3051_v44, %v8632_v28 }
 0x3f4   : > { %v4078_v23 = vpack.c.bf16 %v3001_v32, %v3000_v9 }
 0x3f6   : > { %4142 = vst [vmem:[%s7310_s19 + $0x68] sm:$0xff] %v4078_v23  }
 0x3ff   : > { %v4459_v16 = vpop.permute.xlu0 %4458 }
 0x400   : > { %v4461_v30 = vunpack.i.h.bf16 %v4459_v16  ;;  %v4460_v19 = vunpack.i.l.bf16 %v4459_v16 }
 0x401   : > { %v4464_v27 = vpop.permute.xlu2 %4463 }
 0x402   : > { %v2987_v21 = vsel %vm2618_vm0, %v2795_v33, %v4461_v30  ;;  %v2986_v1 = vsel %vm2618_vm0, %v2794_v2, %v4460_v19  ;;  %v4466_v54 = vunpack.i.h.bf16 %v4464_v27  ;;  %v4465_v50 = vunpack.i.l.bf16 %v4464_v27 }
 0x403   : > { %v3003_v4 = vsel %vm7280_vm1, %v8621_v39, %v2987_v21  ;;  %v3002_v41 = vsel %vm7280_vm1, %v8619_v34, %v2986_v1  ;;  %v3149_v2 = vsub.f32 %v3053_v46, %v8634_v0 }
 0x404   : > { %v4083_v3 = vpack.c.bf16 %v3003_v4, %v3002_v41  ;;  %v2989_v40 = vsel %vm2618_vm0, %v2797_v35, %v4466_v54  ;;  %v2988_v6 = vsel %vm2618_vm0, %v2796_v61, %v4465_v50 }
 0x405   : > { %v3005_v47 = vsel %vm7280_vm1, %v7456_v24, %v2989_v40  ;;  %v3004_v48 = vsel %vm7280_vm1, %v7409_v7, %v2988_v6  ;;  %v8630_v24 = vld [vmem:[#allocation38_spill] sm:$0xff] }
 0x406   : > { %4143 = vst [vmem:[%s7310_s19 + $0x70] sm:$0xff] %v4083_v3   ;;  %v4088_v20 = vpack.c.bf16 %v3005_v47, %v3004_v48  ;;  %v3146_v60 = vsub.f32 %v3050_v55, %v8630_v24 }
 0x407   : > { %v4469_v18 = vpop.permute.xlu0 %4468 }
 0x408   : > { %4144 = vst [vmem:[%s7310_s19 + $0x78] sm:$0xff] %v4088_v20   ;;  %v4471_v7 = vunpack.i.h.bf16 %v4469_v18  ;;  %v4470_v59 = vunpack.i.l.bf16 %v4469_v18 }
 0x409   : > { %v4474_v8 = vpop.permute.xlu2 %4473 }
 0x40a   : > { %v3337_v29 = vsel %vm2618_vm0, %v3145_v63, %v4470_v59  ;;  %v3338_v36 = vsel %vm2618_vm0, %v3146_v60, %v4471_v7  ;;  %v4476_v5 = vunpack.i.h.bf16 %v4474_v8  ;;  %v4475_v37 = vunpack.i.l.bf16 %v4474_v8 }
 0x40b   : > { %v3353_v32 = vsel %vm7280_vm1, %v8628_v17, %v3337_v29  ;;  %v3354_v9 = vsel %vm7280_vm1, %v8627_v25, %v3338_v36 }
 0x40c   : > { %v4118_v23 = vpack.c.bf16 %v3354_v9, %v3353_v32  ;;  %v3340_v34 = vsel %vm2618_vm0, %v3148_v56, %v4476_v5  ;;  %v3339_v26 = vsel %vm2618_vm0, %v3147_v31, %v4475_v37 }
 0x40d   : > { %v3356_v15 = vsel %vm7280_vm1, %v8598_v62, %v3340_v34  ;;  %v3355_v39 = vsel %vm7280_vm1, %v8629_v12, %v3339_v26  ;;  %v3150_v62 = vsub.f32 %v3054_v51, %v7788_v14 }
 0x40e   : > { %4150 = vst [vmem:[%s7310_s19 + $0xa8] sm:$0xff] %v4118_v23   ;;  %v4123_v53 = vpack.c.bf16 %v3356_v15, %v3355_v39 }
 0x410   : > { %4151 = vst [vmem:[%s7310_s19 + $0xb0] sm:$0xff] %v4123_v53  }
 0x42f   : > { %v4479_v16 = vpop.permute.xlu1 %4478 }
 0x430   : > { %v4481_v49 = vunpack.i.h.bf16 %v4479_v16  ;;  %v4480_v33 = vunpack.i.l.bf16 %v4479_v16 }
 0x432   : > { %v3342_v30 = vsel %vm2618_vm0, %v3150_v62, %v4481_v49  ;;  %v3341_v19 = vsel %vm2618_vm0, %v3149_v2, %v4480_v33 }
 0x433   : > { %v3358_v57 = vsel %vm7280_vm1, %v7500_v52, %v3342_v30  ;;  %v3357_v43 = vsel %vm7280_vm1, %v8603_v38, %v3341_v19 }
 0x434   : > { %v4128_v10 = vpack.c.bf16 %v3358_v57, %v3357_v43 }
 0x436   : > { %4152 = vst [vmem:[%s7310_s19 + $0xb8] sm:$0xff] %v4128_v10  }
 0x437   : > { %s8635_s27 = sld [smem:[#allocation18_spill]]  ;;  %s3419_s5 = sshll.u32 %s7310_s19, 4  ;;  %s3420_s5 = int_to_ptr.vmem [resolvable:$true] %s3419_s5 }
 0x438   : > { %s4187_s2 = smul.u32 192, %s8412_s1  ;;  %s4816_s4 = smov 1024  }
 0x439   : > { %4196 = sst [smem:[#allocation10]] (%p5028_p2), %s4816_s4  ;;  %s4817_s21 = smov 2048  }
 0x43a   : > { %s8637_s10 = sld [smem:[#allocation95_spill]]  ;;  %s4818_s1 = smov 16  }
 0x43b   : > { %4197 = sst [smem:[#allocation10 + $0x1]] (%p5028_p2), %s4817_s21  ;;  %s4820_s16 = smov 4  }
 0x43c   : > { %4198 = sst [smem:[#allocation10 + $0x2]] (%p5028_p2), %s4818_s1  ;;  %s4821_s15 = smov [#allocation9]  }
 0x43d   : > { %s4186_s3 = smul.u32 96, %s8635_s27  ;;  %4201 = sst [smem:[#allocation10 + $0x5]] (%p5028_p2), %s4820_s16 }
 0x43e   : > { %s4822_s18 = smov 0  }
 0x43f   : > { %s3404_s14 = sadd.s32 %s4186_s3, %s5825_s8  ;;  %s4819_s8 = smov 64  }
 0x440   : > { %s3406_s17 = sadd.s32 %s4187_s2, %s3404_s14  ;;  %4199 = sst [smem:[#allocation10 + $0x3]] (%p5028_p2), %s4819_s8 }
 0x441   : > { %s3935_s6 = sshll.u32 %s3406_s17, 2  ;;  %4200 = sst [smem:[#allocation10 + $0x4]] (%p5028_p2), %s4819_s8 }
 0x442   : > { %s3408_s12 = scalar_lea.hbm %s8637_s10, %s3935_s6 }
 0x443   : > { %s3421_s29 = sshll.u32 %s3408_s12, 4  ;;  %s3422_s29 = int_to_ptr.hbm [resolvable:$true] %s3421_s29 }
 0x444   : > { %4202 = dma.general (%p5028_p2), %s3420_s5, 3072, %s3422_s29, %s3393_s7, %s4821_s15, [#allocation10], %s4822_s18, 0  }
 0x445 PF: > { %s8638_s19 = sld [smem:[#allocation22_spill]] }
 0x446   : > { %s8639_s27 = sld [smem:[#allocation15_spill]] }
 0x44b   : > { %p4222_p10 = scmp.ge.s32.totalorder %s8638_s19, 2 }
 0x44c   : > { %s3449_s2 = sand.u32 1, %s8639_s27  }
 0x44d   : > { %p4216_p1 = pnand %p4222_p10, %p5033_p12  ;;  %s3450_s14 = scalar_lea.sflag [#allocation4], %s3449_s2 }
 0x44f   : > { %p4217_p3 = pneg %p4216_p1 }
 0x451   : > { %4745 = dma.done.wait (%p4217_p3), %s3450_s14, 3072  }
 0x452   : > { %4747 = vsyncadd (%p4217_p3), %s3450_s14, 4294964224  ;;  %s23_s12 = sadd.s32 1, %s8638_s19   ;;  %s8642_s7 = smov %s5075_s24 }
 0x453   : > { %p8012_p6 = scmp.ge.s32.totalorder %s23_s12, 14   ;;  %s8643_s20 = sld [smem:[#allocation16_spill]] }
 0x454   : > { %s8644_s29 = sld [smem:[#allocation25_spill]]  ;;  %s8649_s21 = smov %s4754_s22 }
 0x455   : > { %s8645_s30 = sld [smem:[#allocation20_spill]]  ;;  %s8650_s22 = smov %s4758_s23 }
 0x456   : > { %s8646_s5 = sld [smem:[#allocation21_spill]]  ;;  %s8651_s23 = smov %s5084_s0 }
 0x457   : > { %s8647_s9 = sld [smem:[#allocation23_spill]]  ;;  %s8652_s24 = smov %s4766_s25 }
 0x458   : > { %s8648_s10 = sld [smem:[#allocation24_spill]]  ;;  %s8653_s25 = smov %s4770_s26 }
 0x459   : > { %s8654_s26 = smov %s8642_s7  ;;  %s8655_s27 = smov %s4778_s28 }
 0x45a   : > { %s8656_s28 = smov %s8643_s20  ;;  %s8658_s8 = smov %s4806_s11 }
 0x45b   : > { %s8659_s11 = smov %s8667_s13  ;;  %22 = sbr.rel (!%p8012_p6) target bundleno = 20 (0x14), region = 120 }
 0x45c   : > { %s8657_s7 = smov %s8646_s5 }
 0x460   :  { %3456 = vsyncpa [#allocation3], 1 }
 0x461   :  { %3458 = vsyncpa [#allocation3 + $0x1], 1 }
 0x462   :  { %3459 = vsyncpa [#allocation6], 1 }
 0x463   :  { %3460 = vsyncpa [#allocation4], 1 }
 0x464   :  { %3462 = vsyncpa [#allocation4 + $0x1], 1 }

</bundles_post_ra>
